<compile_context>
chip_gen: v7x
topology: tpu7x:2x2x1
jax: 0.10.0
libtpu: 0.0.40
codegen_flags: <defaults>
</compile_context>

<pallas_src>
import functools

import jax
import jax.numpy as jnp
from jax.experimental import pallas as pl
from jax.experimental.pallas import tpu as pltpu


def _round_up(x, m):
    return (x + m - 1) // m * m


# ----------------------------- in-kernel helpers -----------------------------

def _zero_halo(xp_ref, h_int, w_int):
    """Zero only the halo strips of a padded activation scratch.

    xp_ref : [Bt, Hp, Wa, C]; interior rows [1, h_int], cols [1, w_int].
    Everything outside the interior (1-px halo plus right-side alignment
    padding) is zeroed; interiors are fully overwritten every grid step.
    """
    Bt, Hp, Wa, C = xp_ref.shape
    dt = xp_ref.dtype
    xp_ref[:, 0:1, :, :] = jnp.zeros((Bt, 1, Wa, C), dt)
    xp_ref[:, h_int + 1:Hp, :, :] = jnp.zeros((Bt, Hp - h_int - 1, Wa, C), dt)
    xp_ref[:, :, 0:1, :] = jnp.zeros((Bt, Hp, 1, C), dt)
    xp_ref[:, :, w_int + 1:Wa, :] = jnp.zeros((Bt, Hp, Wa - w_int - 1, C), dt)


def _conv4x4_s2(xp_ref, w_ref, b_ref, *, Bt, Ho, Wo_pad, relu):
    """4x4 / stride-2 / pad-1 conv via per-tap MXU accumulation.

    xp_ref : [Bt, 2*Ho+2, 2*Wo_pad+2, Cin]  zero-halo padded input (f32)
    w_ref  : [16, Cin, Cout]                weights, tap index t = ki*4 + kj
    b_ref  : [1, Cout]
    returns [Bt*Ho*Wo_pad, Cout] f32, rows ordered (bt, oh, ow); rows with
    ow >= true output width are garbage from the width padding.
    """
    Cin = xp_ref.shape[-1]
    Cout = w_ref.shape[-1]
    Hp = xp_ref.shape[1]
    assert Hp == 2 * Ho + 2 and Wo_pad % 8 == 0
    M = Bt * Ho * Wo_pad

    acc = jnp.zeros((M, Cout), jnp.float32)
    for kj in range(4):
        # One sublane-strided plane read per kj (cols 2*ow + kj), shared by
        # the four ki taps.
        cols = xp_ref[:, :, pl.ds(kj, Wo_pad, stride=2), :]   # [Bt,Hp,Wo_pad,Cin]
        # Split the (major) row dim into (pair, parity): free, no relayout.
        cols = cols.reshape(Bt, Hp // 2, 2, Wo_pad, Cin)
        for ki in range(4):
            # Rows 2*oh + ki  ==  pair (oh + ki//2), parity (ki % 2).
            tap = cols[:, ki // 2:ki // 2 + Ho, ki % 2]        # [Bt,Ho,Wo_pad,Cin]
            lhs = tap.reshape(M, Cin)                          # aligned (Wo_pad%8==0)
            acc = acc + jnp.dot(lhs, w_ref[ki * 4 + kj],
                                preferred_element_type=jnp.float32)
    acc = acc + b_ref[...]
    if relu:
        acc = jnp.maximum(acc, 0.0)
    return acc


def _encoder_kernel(x_ref, w1_ref, b1_ref, w2_ref, b2_ref, w3_ref, b3_ref,
                    w4_ref, b4_ref, o_ref, xp0, xp1, xp2, *, Bt, H, W):
    C = w1_ref.shape[-1]
    Ho1, Wo1 = H // 2, W // 2
    Ho2, Wo2 = H // 4, W // 4
    Ho3, Wo3 = H // 8, W // 8
    Wp1, Wp2, Wp3 = (_round_up(w, 8) for w in (Wo1, Wo2, Wo3))

    # Zero only the halos; interiors are fully rewritten below.
    _zero_halo(xp0, H, W)
    _zero_halo(xp1, Ho1, Wo1)
    _zero_halo(xp2, Ho2, Wo2)

    # Stage the input image(s) into the padded scratch: one bulk store.
    xp0[:, 1:H + 1, 1:W + 1, :] = x_ref[...]

    # Layers 1..3: conv 4x4 s2 p1 + ReLU; intermediates never leave VMEM.
    a1 = _conv4x4_s2(xp0, w1_ref, b1_ref, Bt=Bt, Ho=Ho1, Wo_pad=Wp1, relu=True)
    xp1[:, 1:Ho1 + 1, 1:Wo1 + 1, :] = a1.reshape(Bt, Ho1, Wp1, C)[:, :, :Wo1, :]

    a2 = _conv4x4_s2(xp1, w2_ref, b2_ref, Bt=Bt, Ho=Ho2, Wo_pad=Wp2, relu=True)
    xp2[:, 1:Ho2 + 1, 1:Wo2 + 1, :] = a2.reshape(Bt, Ho2, Wp2, C)[:, :, :Wo2, :]

    a3 = _conv4x4_s2(xp2, w3_ref, b3_ref, Bt=Bt, Ho=Ho3, Wo_pad=Wp3, relu=True)

    # Layer 4: 1x1 conv == plain matmul.  Rows with ow >= Wo3 are padding
    # garbage; the host slices them off.
    out = jnp.dot(a3, w4_ref[...], preferred_element_type=jnp.float32) + b4_ref[...]
    o_ref[...] = out.astype(o_ref.dtype)


# ------------------------------ host wrapper --------------------------------

def _prep_conv_weight(w):
    # PyTorch [out_c, in_c, kh, kw] -> [kh*kw, in_c, out_c]; tap t = ki*kw + kj.
    out_c, in_c, kh, kw = w.shape
    return jnp.transpose(w, (2, 3, 1, 0)).reshape(kh * kw, in_c, out_c).astype(jnp.float32)


def _pick_block_batch(B):
    # Fold a few images into the matmul M dim while keeping >=2 grid steps so
    # the "parallel" batch axis can shard across v7x's two TensorCores.
    best = 1
    for d in range(1, min(B, 8) + 1):
        if B % d == 0 and B // d >= 2:
            best = d
    return best


@jax.jit
def encoder_forward(x_nchw, params):
    (w1, b1), (w2, b2), (w3, b3), (w4, b4) = params
    B, C_in, H, W = x_nchw.shape
    C = w1.shape[0]
    E = w4.shape[0]
    assert H % 8 == 0 and W % 8 == 0, (H, W)

    Ho1, Wo1 = H // 2, W // 2
    Ho2, Wo2 = H // 4, W // 4
    Ho3, Wo3 = H // 8, W // 8
    Wp1, Wp2, Wp3 = (_round_up(w, 8) for w in (Wo1, Wo2, Wo3))
    Bt = _pick_block_batch(B)

    # TODO(synk): feed NCHW directly (lane-dense H*W DMA) and re-layout in
    # kernel to save this extra HBM pass over the input.
    x_nhwc = jnp.transpose(x_nchw, (0, 2, 3, 1)).astype(jnp.float32)

    w1r = _prep_conv_weight(w1)                                  # [16, C_in, C]
    w2r = _prep_conv_weight(w2)                                  # [16, C,    C]
    w3r = _prep_conv_weight(w3)                                  # [16, C,    C]
    w4r = jnp.transpose(w4, (2, 3, 1, 0)).reshape(C, E).astype(jnp.float32)
    b1r = b1.reshape(1, C).astype(jnp.float32)
    b2r = b2.reshape(1, C).astype(jnp.float32)
    b3r = b3.reshape(1, C).astype(jnp.float32)
    b4r = b4.reshape(1, E).astype(jnp.float32)

    kernel = functools.partial(_encoder_kernel, Bt=Bt, H=H, W=W)
    m_step = Bt * Ho3 * Wp3        # output rows produced per grid step

    out2d = pl.pallas_call(
        kernel,
        out_shape=jax.ShapeDtypeStruct((B * Ho3 * Wp3, E), jnp.float32),
        grid_spec=pltpu.PrefetchScalarGridSpec(
            num_scalar_prefetch=0,
            grid=(B // Bt,),
            in_specs=[
                pl.BlockSpec((Bt, H, W, C_in), lambda b: (b, 0, 0, 0)),
                pl.BlockSpec((16, C_in, C), lambda b: (0, 0, 0)),
                pl.BlockSpec((1, C), lambda b: (0, 0)),
                pl.BlockSpec((16, C, C), lambda b: (0, 0, 0)),
                pl.BlockSpec((1, C), lambda b: (0, 0)),
                pl.BlockSpec((16, C, C), lambda b: (0, 0, 0)),
                pl.BlockSpec((1, C), lambda b: (0, 0)),
                pl.BlockSpec((C, E), lambda b: (0, 0)),
                pl.BlockSpec((1, E), lambda b: (0, 0)),
            ],
            out_specs=pl.BlockSpec((m_step, E), lambda b: (b, 0)),
            scratch_shapes=[
                # zero-halo padded activations (width padded for aligned taps)
                pltpu.VMEM((Bt, H + 2, 2 * Wp1 + 2, C_in), jnp.float32),
                pltpu.VMEM((Bt, Ho1 + 2, 2 * Wp2 + 2, C), jnp.float32),
                pltpu.VMEM((Bt, Ho2 + 2, 2 * Wp3 + 2, C), jnp.float32),
            ],
        ),
        compiler_params=pltpu.CompilerParams(
            dimension_semantics=("parallel",),
            # Stays under v7x's 64 MiB VMEM; plenty of headroom on v5e/v6e.
            vmem_limit_bytes=48 * 1024 * 1024,
        ),
    )(x_nhwc, w1r, b1r, w2r, b2r, w3r, b3r, w4r, b4r)

    out = out2d.reshape(B, Ho3, Wp3, E)[:, :, :Wo3, :]   # drop width padding
    return jnp.transpose(out, (0, 3, 1, 2))              # NHWC -> NCHW


# ------------------------------ params / reference ---------------------------

def init_encoder_params(key, in_channel, channel, embed_dim):
    """Deterministic init mimicking PyTorch Conv2d default (uniform +-1/sqrt(fan_in))."""
    shapes = [
        (channel, in_channel, 4, 4),
        (channel, channel, 4, 4),
        (channel, channel, 4, 4),
        (embed_dim, channel, 1, 1),
    ]
    params = []
    for shp in shapes:
        key, kw_, kb_ = jax.random.split(key, 3)
        fan_in = shp[1] * shp[2] * shp[3]
        bound = 1.0 / jnp.sqrt(jnp.float32(fan_in))
        w = jax.random.uniform(kw_, shp, jnp.float32, -bound, bound)
        b = jax.random.uniform(kb_, (shp[0],), jnp.float32, -bound, bound)
        params.append((w, b))
    return params


def encoder_forward_ref(x_nchw, params):
    x = x_nchw.astype(jnp.float32)
    dn = jax.lax.conv_dimension_numbers(x.shape, params[0][0].shape,
                                        ("NCHW", "OIHW", "NCHW"))
    strides = [(2, 2), (2, 2), (2, 2), (1, 1)]
    pads = [((1, 1), (1, 1))] * 3 + [((0, 0), (0, 0))]
    relus = [True, True, True, False]
    for (w, b), s, p, r in zip(params, strides, pads, relus):
        x = jax.lax.conv_general_dilated(x, w, s, p, dimension_numbers=dn,
                                         precision=jax.lax.Precision.HIGHEST)
        x = x + b[None, :, None, None]
        if r:
            x = jnp.maximum(x, 0.0)
    return x


if __name__ == "__main__":
    B, in_channel, H, W = 2, 4, 16, 16
    channel, embed_dim = 32, 8

    key = jax.random.PRNGKey(0)
    k_x, k_p = jax.random.split(key)
    x = jax.random.normal(k_x, (B, in_channel, H, W), jnp.float32)
    params = init_encoder_params(k_p, in_channel, channel, embed_dim)

    out = jax.block_until_ready(encoder_forward(x, params))
    assert out.shape == (B, embed_dim, H // 8, W // 8), out.shape

    ref = jax.block_until_ready(encoder_forward_ref(x, params))
    max_err = float(jnp.max(jnp.abs(out - ref)))
    assert jnp.allclose(out, ref, rtol=2e-2, atol=2e-2), max_err

    print("KERNEL_OK")
</pallas_src>

<mosaic_0001>
module attributes {stable_mosaic.version = 11 : i64} {
  func.func @_encoder_kernel(%arg0: i32, %arg1: memref<1x16x16x4xf32, #tpu.memory_space<vmem>>, %arg2: memref<16x4x32xf32, #tpu.memory_space<vmem>>, %arg3: memref<1x32xf32, #tpu.memory_space<vmem>>, %arg4: memref<16x32x32xf32, #tpu.memory_space<vmem>>, %arg5: memref<1x32xf32, #tpu.memory_space<vmem>>, %arg6: memref<16x32x32xf32, #tpu.memory_space<vmem>>, %arg7: memref<1x32xf32, #tpu.memory_space<vmem>>, %arg8: memref<32x8xf32, #tpu.memory_space<vmem>>, %arg9: memref<1x8xf32, #tpu.memory_space<vmem>>, %arg10: memref<16x8xf32, #tpu.memory_space<vmem>>, %arg11: memref<1x18x18x4xf32, #tpu.memory_space<vmem>>, %arg12: memref<1x10x18x32xf32, #tpu.memory_space<vmem>>, %arg13: memref<1x6x18x32xf32, #tpu.memory_space<vmem>>) attributes {dimension_semantics = [#tpu.dimension_semantics<parallel>], iteration_bounds = array<i64: 2>, scalar_prefetch = 0 : i64, scratch_operands = 3 : i64, tpu.core_type = #tpu.core_type<tc>, window_params = [{transform_indices = @transform_0, window_bounds = array<i64: 1, 16, 16, 4>}, {pipeline_mode = #tpu.pipeline_mode<synchronous>, transform_indices = @transform_1, window_bounds = array<i64: 16, 4, 32>}, {pipeline_mode = #tpu.pipeline_mode<synchronous>, transform_indices = @transform_2, window_bounds = array<i64: 1, 32>}, {pipeline_mode = #tpu.pipeline_mode<synchronous>, transform_indices = @transform_3, window_bounds = array<i64: 16, 32, 32>}, {pipeline_mode = #tpu.pipeline_mode<synchronous>, transform_indices = @transform_4, window_bounds = array<i64: 1, 32>}, {pipeline_mode = #tpu.pipeline_mode<synchronous>, transform_indices = @transform_5, window_bounds = array<i64: 16, 32, 32>}, {pipeline_mode = #tpu.pipeline_mode<synchronous>, transform_indices = @transform_6, window_bounds = array<i64: 1, 32>}, {pipeline_mode = #tpu.pipeline_mode<synchronous>, transform_indices = @transform_7, window_bounds = array<i64: 32, 8>}, {pipeline_mode = #tpu.pipeline_mode<synchronous>, transform_indices = @transform_8, window_bounds = array<i64: 1, 8>}, {transform_indices = @transform_9, window_bounds = array<i64: 16, 8>}]} {
    %cst = arith.constant 0.000000e+00 : f32
    %0 = vector.broadcast %cst : f32 to vector<1x1x18x4xf32>
    %c0 = arith.constant 0 : index
    %c0_0 = arith.constant 0 : index
    %c0_1 = arith.constant 0 : index
    %c0_2 = arith.constant 0 : index
    %1 = vector.load %arg11[%c0, %c0_0, %c0_1, %c0_2] : memref<1x18x18x4xf32, #tpu.memory_space<vmem>>, vector<1x1x18x4xf32>
    tpu.vector_store %arg11[%c0, %c0_0, %c0_1, %c0_2], %0 {strides = array<i32>} : memref<1x18x18x4xf32, #tpu.memory_space<vmem>>, vector<1x1x18x4xf32>,
    %cst_3 = arith.constant 0.000000e+00 : f32
    %2 = vector.broadcast %cst_3 : f32 to vector<1x1x18x4xf32>
    %c0_4 = arith.constant 0 : index
    %c17 = arith.constant 17 : index
    %c0_5 = arith.constant 0 : index
    %c0_6 = arith.constant 0 : index
    %3 = vector.load %arg11[%c0_4, %c17, %c0_5, %c0_6] : memref<1x18x18x4xf32, #tpu.memory_space<vmem>>, vector<1x1x18x4xf32>
    tpu.vector_store %arg11[%c0_4, %c17, %c0_5, %c0_6], %2 {strides = array<i32>} : memref<1x18x18x4xf32, #tpu.memory_space<vmem>>, vector<1x1x18x4xf32>,
    %cst_7 = arith.constant 0.000000e+00 : f32
    %4 = vector.broadcast %cst_7 : f32 to vector<1x18x1x4xf32>
    %c0_8 = arith.constant 0 : index
    %c0_9 = arith.constant 0 : index
    %c0_10 = arith.constant 0 : index
    %c0_11 = arith.constant 0 : index
    %5 = vector.load %arg11[%c0_8, %c0_9, %c0_10, %c0_11] : memref<1x18x18x4xf32, #tpu.memory_space<vmem>>, vector<1x18x1x4xf32>
    tpu.vector_store %arg11[%c0_8, %c0_9, %c0_10, %c0_11], %4 {strides = array<i32>} : memref<1x18x18x4xf32, #tpu.memory_space<vmem>>, vector<1x18x1x4xf32>,
    %cst_12 = arith.constant 0.000000e+00 : f32
    %6 = vector.broadcast %cst_12 : f32 to vector<1x18x1x4xf32>
    %c0_13 = arith.constant 0 : index
    %c0_14 = arith.constant 0 : index
    %c17_15 = arith.constant 17 : index
    %c0_16 = arith.constant 0 : index
    %7 = vector.load %arg11[%c0_13, %c0_14, %c17_15, %c0_16] : memref<1x18x18x4xf32, #tpu.memory_space<vmem>>, vector<1x18x1x4xf32>
    tpu.vector_store %arg11[%c0_13, %c0_14, %c17_15, %c0_16], %6 {strides = array<i32>} : memref<1x18x18x4xf32, #tpu.memory_space<vmem>>, vector<1x18x1x4xf32>,
    %cst_17 = arith.constant 0.000000e+00 : f32
    %8 = vector.broadcast %cst_17 : f32 to vector<1x1x18x32xf32>
    %c0_18 = arith.constant 0 : index
    %c0_19 = arith.constant 0 : index
    %c0_20 = arith.constant 0 : index
    %c0_21 = arith.constant 0 : index
    %9 = vector.load %arg12[%c0_18, %c0_19, %c0_20, %c0_21] : memref<1x10x18x32xf32, #tpu.memory_space<vmem>>, vector<1x1x18x32xf32>
    tpu.vector_store %arg12[%c0_18, %c0_19, %c0_20, %c0_21], %8 {strides = array<i32>} : memref<1x10x18x32xf32, #tpu.memory_space<vmem>>, vector<1x1x18x32xf32>,
    %cst_22 = arith.constant 0.000000e+00 : f32
    %10 = vector.broadcast %cst_22 : f32 to vector<1x1x18x32xf32>
    %c0_23 = arith.constant 0 : index
    %c9 = arith.constant 9 : index
    %c0_24 = arith.constant 0 : index
    %c0_25 = arith.constant 0 : index
    %11 = vector.load %arg12[%c0_23, %c9, %c0_24, %c0_25] : memref<1x10x18x32xf32, #tpu.memory_space<vmem>>, vector<1x1x18x32xf32>
    tpu.vector_store %arg12[%c0_23, %c9, %c0_24, %c0_25], %10 {strides = array<i32>} : memref<1x10x18x32xf32, #tpu.memory_space<vmem>>, vector<1x1x18x32xf32>,
    %cst_26 = arith.constant 0.000000e+00 : f32
    %12 = vector.broadcast %cst_26 : f32 to vector<1x10x1x32xf32>
    %c0_27 = arith.constant 0 : index
    %c0_28 = arith.constant 0 : index
    %c0_29 = arith.constant 0 : index
    %c0_30 = arith.constant 0 : index
    %13 = vector.load %arg12[%c0_27, %c0_28, %c0_29, %c0_30] : memref<1x10x18x32xf32, #tpu.memory_space<vmem>>, vector<1x10x1x32xf32>
    tpu.vector_store %arg12[%c0_27, %c0_28, %c0_29, %c0_30], %12 {strides = array<i32>} : memref<1x10x18x32xf32, #tpu.memory_space<vmem>>, vector<1x10x1x32xf32>,
    %cst_31 = arith.constant 0.000000e+00 : f32
    %14 = vector.broadcast %cst_31 : f32 to vector<1x10x9x32xf32>
    %c0_32 = arith.constant 0 : index
    %c0_33 = arith.constant 0 : index
    %c9_34 = arith.constant 9 : index
    %c0_35 = arith.constant 0 : index
    %15 = vector.load %arg12[%c0_32, %c0_33, %c9_34, %c0_35] : memref<1x10x18x32xf32, #tpu.memory_space<vmem>>, vector<1x10x9x32xf32>
    tpu.vector_store %arg12[%c0_32, %c0_33, %c9_34, %c0_35], %14 {strides = array<i32>} : memref<1x10x18x32xf32, #tpu.memory_space<vmem>>, vector<1x10x9x32xf32>,
    %cst_36 = arith.constant 0.000000e+00 : f32
    %16 = vector.broadcast %cst_36 : f32 to vector<1x1x18x32xf32>
    %c0_37 = arith.constant 0 : index
    %c0_38 = arith.constant 0 : index
    %c0_39 = arith.constant 0 : index
    %c0_40 = arith.constant 0 : index
    %17 = vector.load %arg13[%c0_37, %c0_38, %c0_39, %c0_40] : memref<1x6x18x32xf32, #tpu.memory_space<vmem>>, vector<1x1x18x32xf32>
    tpu.vector_store %arg13[%c0_37, %c0_38, %c0_39, %c0_40], %16 {strides = array<i32>} : memref<1x6x18x32xf32, #tpu.memory_space<vmem>>, vector<1x1x18x32xf32>,
    %cst_41 = arith.constant 0.000000e+00 : f32
    %18 = vector.broadcast %cst_41 : f32 to vector<1x1x18x32xf32>
    %c0_42 = arith.constant 0 : index
    %c5 = arith.constant 5 : index
    %c0_43 = arith.constant 0 : index
    %c0_44 = arith.constant 0 : index
    %19 = vector.load %arg13[%c0_42, %c5, %c0_43, %c0_44] : memref<1x6x18x32xf32, #tpu.memory_space<vmem>>, vector<1x1x18x32xf32>
    tpu.vector_store %arg13[%c0_42, %c5, %c0_43, %c0_44], %18 {strides = array<i32>} : memref<1x6x18x32xf32, #tpu.memory_space<vmem>>, vector<1x1x18x32xf32>,
    %cst_45 = arith.constant 0.000000e+00 : f32
    %20 = vector.broadcast %cst_45 : f32 to vector<1x6x1x32xf32>
    %c0_46 = arith.constant 0 : index
    %c0_47 = arith.constant 0 : index
    %c0_48 = arith.constant 0 : index
    %c0_49 = arith.constant 0 : index
    %21 = vector.load %arg13[%c0_46, %c0_47, %c0_48, %c0_49] : memref<1x6x18x32xf32, #tpu.memory_space<vmem>>, vector<1x6x1x32xf32>
    tpu.vector_store %arg13[%c0_46, %c0_47, %c0_48, %c0_49], %20 {strides = array<i32>} : memref<1x6x18x32xf32, #tpu.memory_space<vmem>>, vector<1x6x1x32xf32>,
    %cst_50 = arith.constant 0.000000e+00 : f32
    %22 = vector.broadcast %cst_50 : f32 to vector<1x6x13x32xf32>
    %c0_51 = arith.constant 0 : index
    %c0_52 = arith.constant 0 : index
    %c5_53 = arith.constant 5 : index
    %c0_54 = arith.constant 0 : index
    %23 = vector.load %arg13[%c0_51, %c0_52, %c5_53, %c0_54] : memref<1x6x18x32xf32, #tpu.memory_space<vmem>>, vector<1x6x13x32xf32>
    tpu.vector_store %arg13[%c0_51, %c0_52, %c5_53, %c0_54], %22 {strides = array<i32>} : memref<1x6x18x32xf32, #tpu.memory_space<vmem>>, vector<1x6x13x32xf32>,
    %c0_55 = arith.constant 0 : index
    %c0_56 = arith.constant 0 : index
    %c0_57 = arith.constant 0 : index
    %c0_58 = arith.constant 0 : index
    %24 = vector.load %arg1[%c0_55, %c0_56, %c0_57, %c0_58] : memref<1x16x16x4xf32, #tpu.memory_space<vmem>>, vector<1x16x16x4xf32>
    %c0_59 = arith.constant 0 : index
    %c1 = arith.constant 1 : index
    %c1_60 = arith.constant 1 : index
    %c0_61 = arith.constant 0 : index
    %25 = vector.load %arg11[%c0_59, %c1, %c1_60, %c0_61] : memref<1x18x18x4xf32, #tpu.memory_space<vmem>>, vector<1x16x16x4xf32>
    tpu.vector_store %arg11[%c0_59, %c1, %c1_60, %c0_61], %24 {strides = array<i32>} : memref<1x18x18x4xf32, #tpu.memory_space<vmem>>, vector<1x16x16x4xf32>,
    %cst_62 = arith.constant 0.000000e+00 : f32
    %26 = vector.broadcast %cst_62 : f32 to vector<64x32xf32>
    %c0_63 = arith.constant 0 : index
    %c0_64 = arith.constant 0 : index
    %c0_65 = arith.constant 0 : index
    %c0_66 = arith.constant 0 : index
    %27 = tpu.strided_load %arg11[%c0_63, %c0_64, %c0_65, %c0_66] {strides = array<i32: 1, 1, 2, 1>} : memref<1x18x18x4xf32, #tpu.memory_space<vmem>>, vector<1x18x8x4xf32>
    %28 = vector.shape_cast %27 : vector<1x18x8x4xf32> to vector<1x9x2x8x4xf32>
    %29 = vector.extract_strided_slice %28 {offsets = [0, 0, 0, 0, 0], sizes = [1, 8, 1, 8, 4], strides = [1, 1, 1, 1, 1]} : vector<1x9x2x8x4xf32> to vector<1x8x1x8x4xf32>
    %30 = vector.shape_cast %29 : vector<1x8x1x8x4xf32> to vector<1x8x8x4xf32>
    %31 = vector.shape_cast %30 : vector<1x8x8x4xf32> to vector<64x4xf32>
    %c0_67 = arith.constant 0 : index
    %c0_68 = arith.constant 0 : index
    %c0_69 = arith.constant 0 : index
    %32 = vector.load %arg2[%c0_67, %c0_68, %c0_69] : memref<16x4x32xf32, #tpu.memory_space<vmem>>, vector<1x4x32xf32>
    %33 = vector.shape_cast %32 : vector<1x4x32xf32> to vector<4x32xf32>
    %cst_70 = arith.constant dense<0.000000e+00> : vector<64x32xf32>
    %34 = tpu.matmul %31, %33, %cst_70 {dimension_numbers = #tpu.dot_dimension_numbers<[1], [0], [0], [1], [0, 0, 1, 1], [], []>} : vector<64x4xf32>, vector<4x32xf32>, vector<64x32xf32> -> vector<64x32xf32>
    %35 = arith.addf %26, %34 : vector<64x32xf32>
    %36 = vector.extract_strided_slice %28 {offsets = [0, 0, 1, 0, 0], sizes = [1, 8, 1, 8, 4], strides = [1, 1, 1, 1, 1]} : vector<1x9x2x8x4xf32> to vector<1x8x1x8x4xf32>
    %37 = vector.shape_cast %36 : vector<1x8x1x8x4xf32> to vector<1x8x8x4xf32>
    %38 = vector.shape_cast %37 : vector<1x8x8x4xf32> to vector<64x4xf32>
    %c4 = arith.constant 4 : index
    %c0_71 = arith.constant 0 : index
    %c0_72 = arith.constant 0 : index
    %39 = vector.load %arg2[%c4, %c0_71, %c0_72] : memref<16x4x32xf32, #tpu.memory_space<vmem>>, vector<1x4x32xf32>
    %40 = vector.shape_cast %39 : vector<1x4x32xf32> to vector<4x32xf32>
    %cst_73 = arith.constant dense<0.000000e+00> : vector<64x32xf32>
    %41 = tpu.matmul %38, %40, %cst_73 {dimension_numbers = #tpu.dot_dimension_numbers<[1], [0], [0], [1], [0, 0, 1, 1], [], []>} : vector<64x4xf32>, vector<4x32xf32>, vector<64x32xf32> -> vector<64x32xf32>
    %42 = arith.addf %35, %41 : vector<64x32xf32>
    %43 = vector.extract_strided_slice %28 {offsets = [0, 1, 0, 0, 0], sizes = [1, 8, 1, 8, 4], strides = [1, 1, 1, 1, 1]} : vector<1x9x2x8x4xf32> to vector<1x8x1x8x4xf32>
    %44 = vector.shape_cast %43 : vector<1x8x1x8x4xf32> to vector<1x8x8x4xf32>
    %45 = vector.shape_cast %44 : vector<1x8x8x4xf32> to vector<64x4xf32>
    %c8 = arith.constant 8 : index
    %c0_74 = arith.constant 0 : index
    %c0_75 = arith.constant 0 : index
    %46 = vector.load %arg2[%c8, %c0_74, %c0_75] : memref<16x4x32xf32, #tpu.memory_space<vmem>>, vector<1x4x32xf32>
    %47 = vector.shape_cast %46 : vector<1x4x32xf32> to vector<4x32xf32>
    %cst_76 = arith.constant dense<0.000000e+00> : vector<64x32xf32>
    %48 = tpu.matmul %45, %47, %cst_76 {dimension_numbers = #tpu.dot_dimension_numbers<[1], [0], [0], [1], [0, 0, 1, 1], [], []>} : vector<64x4xf32>, vector<4x32xf32>, vector<64x32xf32> -> vector<64x32xf32>
    %49 = arith.addf %42, %48 : vector<64x32xf32>
    %50 = vector.extract_strided_slice %28 {offsets = [0, 1, 1, 0, 0], sizes = [1, 8, 1, 8, 4], strides = [1, 1, 1, 1, 1]} : vector<1x9x2x8x4xf32> to vector<1x8x1x8x4xf32>
    %51 = vector.shape_cast %50 : vector<1x8x1x8x4xf32> to vector<1x8x8x4xf32>
    %52 = vector.shape_cast %51 : vector<1x8x8x4xf32> to vector<64x4xf32>
    %c12 = arith.constant 12 : index
    %c0_77 = arith.constant 0 : index
    %c0_78 = arith.constant 0 : index
    %53 = vector.load %arg2[%c12, %c0_77, %c0_78] : memref<16x4x32xf32, #tpu.memory_space<vmem>>, vector<1x4x32xf32>
    %54 = vector.shape_cast %53 : vector<1x4x32xf32> to vector<4x32xf32>
    %cst_79 = arith.constant dense<0.000000e+00> : vector<64x32xf32>
    %55 = tpu.matmul %52, %54, %cst_79 {dimension_numbers = #tpu.dot_dimension_numbers<[1], [0], [0], [1], [0, 0, 1, 1], [], []>} : vector<64x4xf32>, vector<4x32xf32>, vector<64x32xf32> -> vector<64x32xf32>
    %56 = arith.addf %49, %55 : vector<64x32xf32>
    %c0_80 = arith.constant 0 : index
    %c0_81 = arith.constant 0 : index
    %c1_82 = arith.constant 1 : index
    %c0_83 = arith.constant 0 : index
    %57 = tpu.strided_load %arg11[%c0_80, %c0_81, %c1_82, %c0_83] {strides = array<i32: 1, 1, 2, 1>} : memref<1x18x18x4xf32, #tpu.memory_space<vmem>>, vector<1x18x8x4xf32>
    %58 = vector.shape_cast %57 : vector<1x18x8x4xf32> to vector<1x9x2x8x4xf32>
    %59 = vector.extract_strided_slice %58 {offsets = [0, 0, 0, 0, 0], sizes = [1, 8, 1, 8, 4], strides = [1, 1, 1, 1, 1]} : vector<1x9x2x8x4xf32> to vector<1x8x1x8x4xf32>
    %60 = vector.shape_cast %59 : vector<1x8x1x8x4xf32> to vector<1x8x8x4xf32>
    %61 = vector.shape_cast %60 : vector<1x8x8x4xf32> to vector<64x4xf32>
    %c1_84 = arith.constant 1 : index
    %c0_85 = arith.constant 0 : index
    %c0_86 = arith.constant 0 : index
    %62 = vector.load %arg2[%c1_84, %c0_85, %c0_86] : memref<16x4x32xf32, #tpu.memory_space<vmem>>, vector<1x4x32xf32>
    %63 = vector.shape_cast %62 : vector<1x4x32xf32> to vector<4x32xf32>
    %cst_87 = arith.constant dense<0.000000e+00> : vector<64x32xf32>
    %64 = tpu.matmul %61, %63, %cst_87 {dimension_numbers = #tpu.dot_dimension_numbers<[1], [0], [0], [1], [0, 0, 1, 1], [], []>} : vector<64x4xf32>, vector<4x32xf32>, vector<64x32xf32> -> vector<64x32xf32>
    %65 = arith.addf %56, %64 : vector<64x32xf32>
    %66 = vector.extract_strided_slice %58 {offsets = [0, 0, 1, 0, 0], sizes = [1, 8, 1, 8, 4], strides = [1, 1, 1, 1, 1]} : vector<1x9x2x8x4xf32> to vector<1x8x1x8x4xf32>
    %67 = vector.shape_cast %66 : vector<1x8x1x8x4xf32> to vector<1x8x8x4xf32>
    %68 = vector.shape_cast %67 : vector<1x8x8x4xf32> to vector<64x4xf32>
    %c5_88 = arith.constant 5 : index
    %c0_89 = arith.constant 0 : index
    %c0_90 = arith.constant 0 : index
    %69 = vector.load %arg2[%c5_88, %c0_89, %c0_90] : memref<16x4x32xf32, #tpu.memory_space<vmem>>, vector<1x4x32xf32>
    %70 = vector.shape_cast %69 : vector<1x4x32xf32> to vector<4x32xf32>
    %cst_91 = arith.constant dense<0.000000e+00> : vector<64x32xf32>
    %71 = tpu.matmul %68, %70, %cst_91 {dimension_numbers = #tpu.dot_dimension_numbers<[1], [0], [0], [1], [0, 0, 1, 1], [], []>} : vector<64x4xf32>, vector<4x32xf32>, vector<64x32xf32> -> vector<64x32xf32>
    %72 = arith.addf %65, %71 : vector<64x32xf32>
    %73 = vector.extract_strided_slice %58 {offsets = [0, 1, 0, 0, 0], sizes = [1, 8, 1, 8, 4], strides = [1, 1, 1, 1, 1]} : vector<1x9x2x8x4xf32> to vector<1x8x1x8x4xf32>
    %74 = vector.shape_cast %73 : vector<1x8x1x8x4xf32> to vector<1x8x8x4xf32>
    %75 = vector.shape_cast %74 : vector<1x8x8x4xf32> to vector<64x4xf32>
    %c9_92 = arith.constant 9 : index
    %c0_93 = arith.constant 0 : index
    %c0_94 = arith.constant 0 : index
    %76 = vector.load %arg2[%c9_92, %c0_93, %c0_94] : memref<16x4x32xf32, #tpu.memory_space<vmem>>, vector<1x4x32xf32>
    %77 = vector.shape_cast %76 : vector<1x4x32xf32> to vector<4x32xf32>
    %cst_95 = arith.constant dense<0.000000e+00> : vector<64x32xf32>
    %78 = tpu.matmul %75, %77, %cst_95 {dimension_numbers = #tpu.dot_dimension_numbers<[1], [0], [0], [1], [0, 0, 1, 1], [], []>} : vector<64x4xf32>, vector<4x32xf32>, vector<64x32xf32> -> vector<64x32xf32>
    %79 = arith.addf %72, %78 : vector<64x32xf32>
    %80 = vector.extract_strided_slice %58 {offsets = [0, 1, 1, 0, 0], sizes = [1, 8, 1, 8, 4], strides = [1, 1, 1, 1, 1]} : vector<1x9x2x8x4xf32> to vector<1x8x1x8x4xf32>
    %81 = vector.shape_cast %80 : vector<1x8x1x8x4xf32> to vector<1x8x8x4xf32>
    %82 = vector.shape_cast %81 : vector<1x8x8x4xf32> to vector<64x4xf32>
    %c13 = arith.constant 13 : index
    %c0_96 = arith.constant 0 : index
    %c0_97 = arith.constant 0 : index
    %83 = vector.load %arg2[%c13, %c0_96, %c0_97] : memref<16x4x32xf32, #tpu.memory_space<vmem>>, vector<1x4x32xf32>
    %84 = vector.shape_cast %83 : vector<1x4x32xf32> to vector<4x32xf32>
    %cst_98 = arith.constant dense<0.000000e+00> : vector<64x32xf32>
    %85 = tpu.matmul %82, %84, %cst_98 {dimension_numbers = #tpu.dot_dimension_numbers<[1], [0], [0], [1], [0, 0, 1, 1], [], []>} : vector<64x4xf32>, vector<4x32xf32>, vector<64x32xf32> -> vector<64x32xf32>
    %86 = arith.addf %79, %85 : vector<64x32xf32>
    %c0_99 = arith.constant 0 : index
    %c0_100 = arith.constant 0 : index
    %c2 = arith.constant 2 : index
    %c0_101 = arith.constant 0 : index
    %87 = tpu.strided_load %arg11[%c0_99, %c0_100, %c2, %c0_101] {strides = array<i32: 1, 1, 2, 1>} : memref<1x18x18x4xf32, #tpu.memory_space<vmem>>, vector<1x18x8x4xf32>
    %88 = vector.shape_cast %87 : vector<1x18x8x4xf32> to vector<1x9x2x8x4xf32>
    %89 = vector.extract_strided_slice %88 {offsets = [0, 0, 0, 0, 0], sizes = [1, 8, 1, 8, 4], strides = [1, 1, 1, 1, 1]} : vector<1x9x2x8x4xf32> to vector<1x8x1x8x4xf32>
    %90 = vector.shape_cast %89 : vector<1x8x1x8x4xf32> to vector<1x8x8x4xf32>
    %91 = vector.shape_cast %90 : vector<1x8x8x4xf32> to vector<64x4xf32>
    %c2_102 = arith.constant 2 : index
    %c0_103 = arith.constant 0 : index
    %c0_104 = arith.constant 0 : index
    %92 = vector.load %arg2[%c2_102, %c0_103, %c0_104] : memref<16x4x32xf32, #tpu.memory_space<vmem>>, vector<1x4x32xf32>
    %93 = vector.shape_cast %92 : vector<1x4x32xf32> to vector<4x32xf32>
    %cst_105 = arith.constant dense<0.000000e+00> : vector<64x32xf32>
    %94 = tpu.matmul %91, %93, %cst_105 {dimension_numbers = #tpu.dot_dimension_numbers<[1], [0], [0], [1], [0, 0, 1, 1], [], []>} : vector<64x4xf32>, vector<4x32xf32>, vector<64x32xf32> -> vector<64x32xf32>
    %95 = arith.addf %86, %94 : vector<64x32xf32>
    %96 = vector.extract_strided_slice %88 {offsets = [0, 0, 1, 0, 0], sizes = [1, 8, 1, 8, 4], strides = [1, 1, 1, 1, 1]} : vector<1x9x2x8x4xf32> to vector<1x8x1x8x4xf32>
    %97 = vector.shape_cast %96 : vector<1x8x1x8x4xf32> to vector<1x8x8x4xf32>
    %98 = vector.shape_cast %97 : vector<1x8x8x4xf32> to vector<64x4xf32>
    %c6 = arith.constant 6 : index
    %c0_106 = arith.constant 0 : index
    %c0_107 = arith.constant 0 : index
    %99 = vector.load %arg2[%c6, %c0_106, %c0_107] : memref<16x4x32xf32, #tpu.memory_space<vmem>>, vector<1x4x32xf32>
    %100 = vector.shape_cast %99 : vector<1x4x32xf32> to vector<4x32xf32>
    %cst_108 = arith.constant dense<0.000000e+00> : vector<64x32xf32>
    %101 = tpu.matmul %98, %100, %cst_108 {dimension_numbers = #tpu.dot_dimension_numbers<[1], [0], [0], [1], [0, 0, 1, 1], [], []>} : vector<64x4xf32>, vector<4x32xf32>, vector<64x32xf32> -> vector<64x32xf32>
    %102 = arith.addf %95, %101 : vector<64x32xf32>
    %103 = vector.extract_strided_slice %88 {offsets = [0, 1, 0, 0, 0], sizes = [1, 8, 1, 8, 4], strides = [1, 1, 1, 1, 1]} : vector<1x9x2x8x4xf32> to vector<1x8x1x8x4xf32>
    %104 = vector.shape_cast %103 : vector<1x8x1x8x4xf32> to vector<1x8x8x4xf32>
    %105 = vector.shape_cast %104 : vector<1x8x8x4xf32> to vector<64x4xf32>
    %c10 = arith.constant 10 : index
    %c0_109 = arith.constant 0 : index
    %c0_110 = arith.constant 0 : index
    %106 = vector.load %arg2[%c10, %c0_109, %c0_110] : memref<16x4x32xf32, #tpu.memory_space<vmem>>, vector<1x4x32xf32>
    %107 = vector.shape_cast %106 : vector<1x4x32xf32> to vector<4x32xf32>
    %cst_111 = arith.constant dense<0.000000e+00> : vector<64x32xf32>
    %108 = tpu.matmul %105, %107, %cst_111 {dimension_numbers = #tpu.dot_dimension_numbers<[1], [0], [0], [1], [0, 0, 1, 1], [], []>} : vector<64x4xf32>, vector<4x32xf32>, vector<64x32xf32> -> vector<64x32xf32>
    %109 = arith.addf %102, %108 : vector<64x32xf32>
    %110 = vector.extract_strided_slice %88 {offsets = [0, 1, 1, 0, 0], sizes = [1, 8, 1, 8, 4], strides = [1, 1, 1, 1, 1]} : vector<1x9x2x8x4xf32> to vector<1x8x1x8x4xf32>
    %111 = vector.shape_cast %110 : vector<1x8x1x8x4xf32> to vector<1x8x8x4xf32>
    %112 = vector.shape_cast %111 : vector<1x8x8x4xf32> to vector<64x4xf32>
    %c14 = arith.constant 14 : index
    %c0_112 = arith.constant 0 : index
    %c0_113 = arith.constant 0 : index
    %113 = vector.load %arg2[%c14, %c0_112, %c0_113] : memref<16x4x32xf32, #tpu.memory_space<vmem>>, vector<1x4x32xf32>
    %114 = vector.shape_cast %113 : vector<1x4x32xf32> to vector<4x32xf32>
    %cst_114 = arith.constant dense<0.000000e+00> : vector<64x32xf32>
    %115 = tpu.matmul %112, %114, %cst_114 {dimension_numbers = #tpu.dot_dimension_numbers<[1], [0], [0], [1], [0, 0, 1, 1], [], []>} : vector<64x4xf32>, vector<4x32xf32>, vector<64x32xf32> -> vector<64x32xf32>
    %116 = arith.addf %109, %115 : vector<64x32xf32>
    %c0_115 = arith.constant 0 : index
    %c0_116 = arith.constant 0 : index
    %c3 = arith.constant 3 : index
    %c0_117 = arith.constant 0 : index
    %117 = tpu.strided_load %arg11[%c0_115, %c0_116, %c3, %c0_117] {strides = array<i32: 1, 1, 2, 1>} : memref<1x18x18x4xf32, #tpu.memory_space<vmem>>, vector<1x18x8x4xf32>
    %118 = vector.shape_cast %117 : vector<1x18x8x4xf32> to vector<1x9x2x8x4xf32>
    %119 = vector.extract_strided_slice %118 {offsets = [0, 0, 0, 0, 0], sizes = [1, 8, 1, 8, 4], strides = [1, 1, 1, 1, 1]} : vector<1x9x2x8x4xf32> to vector<1x8x1x8x4xf32>
    %120 = vector.shape_cast %119 : vector<1x8x1x8x4xf32> to vector<1x8x8x4xf32>
    %121 = vector.shape_cast %120 : vector<1x8x8x4xf32> to vector<64x4xf32>
    %c3_118 = arith.constant 3 : index
    %c0_119 = arith.constant 0 : index
    %c0_120 = arith.constant 0 : index
    %122 = vector.load %arg2[%c3_118, %c0_119, %c0_120] : memref<16x4x32xf32, #tpu.memory_space<vmem>>, vector<1x4x32xf32>
    %123 = vector.shape_cast %122 : vector<1x4x32xf32> to vector<4x32xf32>
    %cst_121 = arith.constant dense<0.000000e+00> : vector<64x32xf32>
    %124 = tpu.matmul %121, %123, %cst_121 {dimension_numbers = #tpu.dot_dimension_numbers<[1], [0], [0], [1], [0, 0, 1, 1], [], []>} : vector<64x4xf32>, vector<4x32xf32>, vector<64x32xf32> -> vector<64x32xf32>
    %125 = arith.addf %116, %124 : vector<64x32xf32>
    %126 = vector.extract_strided_slice %118 {offsets = [0, 0, 1, 0, 0], sizes = [1, 8, 1, 8, 4], strides = [1, 1, 1, 1, 1]} : vector<1x9x2x8x4xf32> to vector<1x8x1x8x4xf32>
    %127 = vector.shape_cast %126 : vector<1x8x1x8x4xf32> to vector<1x8x8x4xf32>
    %128 = vector.shape_cast %127 : vector<1x8x8x4xf32> to vector<64x4xf32>
    %c7 = arith.constant 7 : index
    %c0_122 = arith.constant 0 : index
    %c0_123 = arith.constant 0 : index
    %129 = vector.load %arg2[%c7, %c0_122, %c0_123] : memref<16x4x32xf32, #tpu.memory_space<vmem>>, vector<1x4x32xf32>
    %130 = vector.shape_cast %129 : vector<1x4x32xf32> to vector<4x32xf32>
    %cst_124 = arith.constant dense<0.000000e+00> : vector<64x32xf32>
    %131 = tpu.matmul %128, %130, %cst_124 {dimension_numbers = #tpu.dot_dimension_numbers<[1], [0], [0], [1], [0, 0, 1, 1], [], []>} : vector<64x4xf32>, vector<4x32xf32>, vector<64x32xf32> -> vector<64x32xf32>
    %132 = arith.addf %125, %131 : vector<64x32xf32>
    %133 = vector.extract_strided_slice %118 {offsets = [0, 1, 0, 0, 0], sizes = [1, 8, 1, 8, 4], strides = [1, 1, 1, 1, 1]} : vector<1x9x2x8x4xf32> to vector<1x8x1x8x4xf32>
    %134 = vector.shape_cast %133 : vector<1x8x1x8x4xf32> to vector<1x8x8x4xf32>
    %135 = vector.shape_cast %134 : vector<1x8x8x4xf32> to vector<64x4xf32>
    %c11 = arith.constant 11 : index
    %c0_125 = arith.constant 0 : index
    %c0_126 = arith.constant 0 : index
    %136 = vector.load %arg2[%c11, %c0_125, %c0_126] : memref<16x4x32xf32, #tpu.memory_space<vmem>>, vector<1x4x32xf32>
    %137 = vector.shape_cast %136 : vector<1x4x32xf32> to vector<4x32xf32>
    %cst_127 = arith.constant dense<0.000000e+00> : vector<64x32xf32>
    %138 = tpu.matmul %135, %137, %cst_127 {dimension_numbers = #tpu.dot_dimension_numbers<[1], [0], [0], [1], [0, 0, 1, 1], [], []>} : vector<64x4xf32>, vector<4x32xf32>, vector<64x32xf32> -> vector<64x32xf32>
    %139 = arith.addf %132, %138 : vector<64x32xf32>
    %140 = vector.extract_strided_slice %118 {offsets = [0, 1, 1, 0, 0], sizes = [1, 8, 1, 8, 4], strides = [1, 1, 1, 1, 1]} : vector<1x9x2x8x4xf32> to vector<1x8x1x8x4xf32>
    %141 = vector.shape_cast %140 : vector<1x8x1x8x4xf32> to vector<1x8x8x4xf32>
    %142 = vector.shape_cast %141 : vector<1x8x8x4xf32> to vector<64x4xf32>
    %c15 = arith.constant 15 : index
    %c0_128 = arith.constant 0 : index
    %c0_129 = arith.constant 0 : index
    %143 = vector.load %arg2[%c15, %c0_128, %c0_129] : memref<16x4x32xf32, #tpu.memory_space<vmem>>, vector<1x4x32xf32>
    %144 = vector.shape_cast %143 : vector<1x4x32xf32> to vector<4x32xf32>
    %cst_130 = arith.constant dense<0.000000e+00> : vector<64x32xf32>
    %145 = tpu.matmul %142, %144, %cst_130 {dimension_numbers = #tpu.dot_dimension_numbers<[1], [0], [0], [1], [0, 0, 1, 1], [], []>} : vector<64x4xf32>, vector<4x32xf32>, vector<64x32xf32> -> vector<64x32xf32>
    %146 = arith.addf %139, %145 : vector<64x32xf32>
    %c0_131 = arith.constant 0 : index
    %c0_132 = arith.constant 0 : index
    %147 = vector.load %arg3[%c0_131, %c0_132] : memref<1x32xf32, #tpu.memory_space<vmem>>, vector<1x32xf32>
    %148 = vector.broadcast %147 : vector<1x32xf32> to vector<64x32xf32>
    %149 = arith.addf %146, %148 : vector<64x32xf32>
    %cst_133 = arith.constant 0.000000e+00 : f32
    %150 = vector.broadcast %cst_133 : f32 to vector<64x32xf32>
    %151 = arith.maximumf %149, %150 : vector<64x32xf32>
    %152 = vector.shape_cast %151 : vector<64x32xf32> to vector<1x8x8x32xf32>
    %c0_134 = arith.constant 0 : index
    %c1_135 = arith.constant 1 : index
    %c1_136 = arith.constant 1 : index
    %c0_137 = arith.constant 0 : index
    %153 = vector.load %arg12[%c0_134, %c1_135, %c1_136, %c0_137] : memref<1x10x18x32xf32, #tpu.memory_space<vmem>>, vector<1x8x8x32xf32>
    tpu.vector_store %arg12[%c0_134, %c1_135, %c1_136, %c0_137], %152 {strides = array<i32>} : memref<1x10x18x32xf32, #tpu.memory_space<vmem>>, vector<1x8x8x32xf32>,
    %cst_138 = arith.constant 0.000000e+00 : f32
    %154 = vector.broadcast %cst_138 : f32 to vector<32x32xf32>
    %c0_139 = arith.constant 0 : index
    %c0_140 = arith.constant 0 : index
    %c0_141 = arith.constant 0 : index
    %c0_142 = arith.constant 0 : index
    %155 = tpu.strided_load %arg12[%c0_139, %c0_140, %c0_141, %c0_142] {strides = array<i32: 1, 1, 2, 1>} : memref<1x10x18x32xf32, #tpu.memory_space<vmem>>, vector<1x10x8x32xf32>
    %156 = vector.shape_cast %155 : vector<1x10x8x32xf32> to vector<1x5x2x8x32xf32>
    %157 = vector.extract_strided_slice %156 {offsets = [0, 0, 0, 0, 0], sizes = [1, 4, 1, 8, 32], strides = [1, 1, 1, 1, 1]} : vector<1x5x2x8x32xf32> to vector<1x4x1x8x32xf32>
    %158 = vector.shape_cast %157 : vector<1x4x1x8x32xf32> to vector<1x4x8x32xf32>
    %159 = vector.shape_cast %158 : vector<1x4x8x32xf32> to vector<32x32xf32>
    %c0_143 = arith.constant 0 : index
    %c0_144 = arith.constant 0 : index
    %c0_145 = arith.constant 0 : index
    %160 = vector.load %arg4[%c0_143, %c0_144, %c0_145] : memref<16x32x32xf32, #tpu.memory_space<vmem>>, vector<1x32x32xf32>
    %161 = vector.shape_cast %160 : vector<1x32x32xf32> to vector<32x32xf32>
    %cst_146 = arith.constant dense<0.000000e+00> : vector<32x32xf32>
    %162 = tpu.matmul %159, %161, %cst_146 {dimension_numbers = #tpu.dot_dimension_numbers<[1], [0], [0], [1], [0, 0, 1, 1], [], []>} : vector<32x32xf32>, vector<32x32xf32>, vector<32x32xf32> -> vector<32x32xf32>
    %163 = arith.addf %154, %162 : vector<32x32xf32>
    %164 = vector.extract_strided_slice %156 {offsets = [0, 0, 1, 0, 0], sizes = [1, 4, 1, 8, 32], strides = [1, 1, 1, 1, 1]} : vector<1x5x2x8x32xf32> to vector<1x4x1x8x32xf32>
    %165 = vector.shape_cast %164 : vector<1x4x1x8x32xf32> to vector<1x4x8x32xf32>
    %166 = vector.shape_cast %165 : vector<1x4x8x32xf32> to vector<32x32xf32>
    %c4_147 = arith.constant 4 : index
    %c0_148 = arith.constant 0 : index
    %c0_149 = arith.constant 0 : index
    %167 = vector.load %arg4[%c4_147, %c0_148, %c0_149] : memref<16x32x32xf32, #tpu.memory_space<vmem>>, vector<1x32x32xf32>
    %168 = vector.shape_cast %167 : vector<1x32x32xf32> to vector<32x32xf32>
    %cst_150 = arith.constant dense<0.000000e+00> : vector<32x32xf32>
    %169 = tpu.matmul %166, %168, %cst_150 {dimension_numbers = #tpu.dot_dimension_numbers<[1], [0], [0], [1], [0, 0, 1, 1], [], []>} : vector<32x32xf32>, vector<32x32xf32>, vector<32x32xf32> -> vector<32x32xf32>
    %170 = arith.addf %163, %169 : vector<32x32xf32>
    %171 = vector.extract_strided_slice %156 {offsets = [0, 1, 0, 0, 0], sizes = [1, 4, 1, 8, 32], strides = [1, 1, 1, 1, 1]} : vector<1x5x2x8x32xf32> to vector<1x4x1x8x32xf32>
    %172 = vector.shape_cast %171 : vector<1x4x1x8x32xf32> to vector<1x4x8x32xf32>
    %173 = vector.shape_cast %172 : vector<1x4x8x32xf32> to vector<32x32xf32>
    %c8_151 = arith.constant 8 : index
    %c0_152 = arith.constant 0 : index
    %c0_153 = arith.constant 0 : index
    %174 = vector.load %arg4[%c8_151, %c0_152, %c0_153] : memref<16x32x32xf32, #tpu.memory_space<vmem>>, vector<1x32x32xf32>
    %175 = vector.shape_cast %174 : vector<1x32x32xf32> to vector<32x32xf32>
    %cst_154 = arith.constant dense<0.000000e+00> : vector<32x32xf32>
    %176 = tpu.matmul %173, %175, %cst_154 {dimension_numbers = #tpu.dot_dimension_numbers<[1], [0], [0], [1], [0, 0, 1, 1], [], []>} : vector<32x32xf32>, vector<32x32xf32>, vector<32x32xf32> -> vector<32x32xf32>
    %177 = arith.addf %170, %176 : vector<32x32xf32>
    %178 = vector.extract_strided_slice %156 {offsets = [0, 1, 1, 0, 0], sizes = [1, 4, 1, 8, 32], strides = [1, 1, 1, 1, 1]} : vector<1x5x2x8x32xf32> to vector<1x4x1x8x32xf32>
    %179 = vector.shape_cast %178 : vector<1x4x1x8x32xf32> to vector<1x4x8x32xf32>
    %180 = vector.shape_cast %179 : vector<1x4x8x32xf32> to vector<32x32xf32>
    %c12_155 = arith.constant 12 : index
    %c0_156 = arith.constant 0 : index
    %c0_157 = arith.constant 0 : index
    %181 = vector.load %arg4[%c12_155, %c0_156, %c0_157] : memref<16x32x32xf32, #tpu.memory_space<vmem>>, vector<1x32x32xf32>
    %182 = vector.shape_cast %181 : vector<1x32x32xf32> to vector<32x32xf32>
    %cst_158 = arith.constant dense<0.000000e+00> : vector<32x32xf32>
    %183 = tpu.matmul %180, %182, %cst_158 {dimension_numbers = #tpu.dot_dimension_numbers<[1], [0], [0], [1], [0, 0, 1, 1], [], []>} : vector<32x32xf32>, vector<32x32xf32>, vector<32x32xf32> -> vector<32x32xf32>
    %184 = arith.addf %177, %183 : vector<32x32xf32>
    %c0_159 = arith.constant 0 : index
    %c0_160 = arith.constant 0 : index
    %c1_161 = arith.constant 1 : index
    %c0_162 = arith.constant 0 : index
    %185 = tpu.strided_load %arg12[%c0_159, %c0_160, %c1_161, %c0_162] {strides = array<i32: 1, 1, 2, 1>} : memref<1x10x18x32xf32, #tpu.memory_space<vmem>>, vector<1x10x8x32xf32>
    %186 = vector.shape_cast %185 : vector<1x10x8x32xf32> to vector<1x5x2x8x32xf32>
    %187 = vector.extract_strided_slice %186 {offsets = [0, 0, 0, 0, 0], sizes = [1, 4, 1, 8, 32], strides = [1, 1, 1, 1, 1]} : vector<1x5x2x8x32xf32> to vector<1x4x1x8x32xf32>
    %188 = vector.shape_cast %187 : vector<1x4x1x8x32xf32> to vector<1x4x8x32xf32>
    %189 = vector.shape_cast %188 : vector<1x4x8x32xf32> to vector<32x32xf32>
    %c1_163 = arith.constant 1 : index
    %c0_164 = arith.constant 0 : index
    %c0_165 = arith.constant 0 : index
    %190 = vector.load %arg4[%c1_163, %c0_164, %c0_165] : memref<16x32x32xf32, #tpu.memory_space<vmem>>, vector<1x32x32xf32>
    %191 = vector.shape_cast %190 : vector<1x32x32xf32> to vector<32x32xf32>
    %cst_166 = arith.constant dense<0.000000e+00> : vector<32x32xf32>
    %192 = tpu.matmul %189, %191, %cst_166 {dimension_numbers = #tpu.dot_dimension_numbers<[1], [0], [0], [1], [0, 0, 1, 1], [], []>} : vector<32x32xf32>, vector<32x32xf32>, vector<32x32xf32> -> vector<32x32xf32>
    %193 = arith.addf %184, %192 : vector<32x32xf32>
    %194 = vector.extract_strided_slice %186 {offsets = [0, 0, 1, 0, 0], sizes = [1, 4, 1, 8, 32], strides = [1, 1, 1, 1, 1]} : vector<1x5x2x8x32xf32> to vector<1x4x1x8x32xf32>
    %195 = vector.shape_cast %194 : vector<1x4x1x8x32xf32> to vector<1x4x8x32xf32>
    %196 = vector.shape_cast %195 : vector<1x4x8x32xf32> to vector<32x32xf32>
    %c5_167 = arith.constant 5 : index
    %c0_168 = arith.constant 0 : index
    %c0_169 = arith.constant 0 : index
    %197 = vector.load %arg4[%c5_167, %c0_168, %c0_169] : memref<16x32x32xf32, #tpu.memory_space<vmem>>, vector<1x32x32xf32>
    %198 = vector.shape_cast %197 : vector<1x32x32xf32> to vector<32x32xf32>
    %cst_170 = arith.constant dense<0.000000e+00> : vector<32x32xf32>
    %199 = tpu.matmul %196, %198, %cst_170 {dimension_numbers = #tpu.dot_dimension_numbers<[1], [0], [0], [1], [0, 0, 1, 1], [], []>} : vector<32x32xf32>, vector<32x32xf32>, vector<32x32xf32> -> vector<32x32xf32>
    %200 = arith.addf %193, %199 : vector<32x32xf32>
    %201 = vector.extract_strided_slice %186 {offsets = [0, 1, 0, 0, 0], sizes = [1, 4, 1, 8, 32], strides = [1, 1, 1, 1, 1]} : vector<1x5x2x8x32xf32> to vector<1x4x1x8x32xf32>
    %202 = vector.shape_cast %201 : vector<1x4x1x8x32xf32> to vector<1x4x8x32xf32>
    %203 = vector.shape_cast %202 : vector<1x4x8x32xf32> to vector<32x32xf32>
    %c9_171 = arith.constant 9 : index
    %c0_172 = arith.constant 0 : index
    %c0_173 = arith.constant 0 : index
    %204 = vector.load %arg4[%c9_171, %c0_172, %c0_173] : memref<16x32x32xf32, #tpu.memory_space<vmem>>, vector<1x32x32xf32>
    %205 = vector.shape_cast %204 : vector<1x32x32xf32> to vector<32x32xf32>
    %cst_174 = arith.constant dense<0.000000e+00> : vector<32x32xf32>
    %206 = tpu.matmul %203, %205, %cst_174 {dimension_numbers = #tpu.dot_dimension_numbers<[1], [0], [0], [1], [0, 0, 1, 1], [], []>} : vector<32x32xf32>, vector<32x32xf32>, vector<32x32xf32> -> vector<32x32xf32>
    %207 = arith.addf %200, %206 : vector<32x32xf32>
    %208 = vector.extract_strided_slice %186 {offsets = [0, 1, 1, 0, 0], sizes = [1, 4, 1, 8, 32], strides = [1, 1, 1, 1, 1]} : vector<1x5x2x8x32xf32> to vector<1x4x1x8x32xf32>
    %209 = vector.shape_cast %208 : vector<1x4x1x8x32xf32> to vector<1x4x8x32xf32>
    %210 = vector.shape_cast %209 : vector<1x4x8x32xf32> to vector<32x32xf32>
    %c13_175 = arith.constant 13 : index
    %c0_176 = arith.constant 0 : index
    %c0_177 = arith.constant 0 : index
    %211 = vector.load %arg4[%c13_175, %c0_176, %c0_177] : memref<16x32x32xf32, #tpu.memory_space<vmem>>, vector<1x32x32xf32>
    %212 = vector.shape_cast %211 : vector<1x32x32xf32> to vector<32x32xf32>
    %cst_178 = arith.constant dense<0.000000e+00> : vector<32x32xf32>
    %213 = tpu.matmul %210, %212, %cst_178 {dimension_numbers = #tpu.dot_dimension_numbers<[1], [0], [0], [1], [0, 0, 1, 1], [], []>} : vector<32x32xf32>, vector<32x32xf32>, vector<32x32xf32> -> vector<32x32xf32>
    %214 = arith.addf %207, %213 : vector<32x32xf32>
    %c0_179 = arith.constant 0 : index
    %c0_180 = arith.constant 0 : index
    %c2_181 = arith.constant 2 : index
    %c0_182 = arith.constant 0 : index
    %215 = tpu.strided_load %arg12[%c0_179, %c0_180, %c2_181, %c0_182] {strides = array<i32: 1, 1, 2, 1>} : memref<1x10x18x32xf32, #tpu.memory_space<vmem>>, vector<1x10x8x32xf32>
    %216 = vector.shape_cast %215 : vector<1x10x8x32xf32> to vector<1x5x2x8x32xf32>
    %217 = vector.extract_strided_slice %216 {offsets = [0, 0, 0, 0, 0], sizes = [1, 4, 1, 8, 32], strides = [1, 1, 1, 1, 1]} : vector<1x5x2x8x32xf32> to vector<1x4x1x8x32xf32>
    %218 = vector.shape_cast %217 : vector<1x4x1x8x32xf32> to vector<1x4x8x32xf32>
    %219 = vector.shape_cast %218 : vector<1x4x8x32xf32> to vector<32x32xf32>
    %c2_183 = arith.constant 2 : index
    %c0_184 = arith.constant 0 : index
    %c0_185 = arith.constant 0 : index
    %220 = vector.load %arg4[%c2_183, %c0_184, %c0_185] : memref<16x32x32xf32, #tpu.memory_space<vmem>>, vector<1x32x32xf32>
    %221 = vector.shape_cast %220 : vector<1x32x32xf32> to vector<32x32xf32>
    %cst_186 = arith.constant dense<0.000000e+00> : vector<32x32xf32>
    %222 = tpu.matmul %219, %221, %cst_186 {dimension_numbers = #tpu.dot_dimension_numbers<[1], [0], [0], [1], [0, 0, 1, 1], [], []>} : vector<32x32xf32>, vector<32x32xf32>, vector<32x32xf32> -> vector<32x32xf32>
    %223 = arith.addf %214, %222 : vector<32x32xf32>
    %224 = vector.extract_strided_slice %216 {offsets = [0, 0, 1, 0, 0], sizes = [1, 4, 1, 8, 32], strides = [1, 1, 1, 1, 1]} : vector<1x5x2x8x32xf32> to vector<1x4x1x8x32xf32>
    %225 = vector.shape_cast %224 : vector<1x4x1x8x32xf32> to vector<1x4x8x32xf32>
    %226 = vector.shape_cast %225 : vector<1x4x8x32xf32> to vector<32x32xf32>
    %c6_187 = arith.constant 6 : index
    %c0_188 = arith.constant 0 : index
    %c0_189 = arith.constant 0 : index
    %227 = vector.load %arg4[%c6_187, %c0_188, %c0_189] : memref<16x32x32xf32, #tpu.memory_space<vmem>>, vector<1x32x32xf32>
    %228 = vector.shape_cast %227 : vector<1x32x32xf32> to vector<32x32xf32>
    %cst_190 = arith.constant dense<0.000000e+00> : vector<32x32xf32>
    %229 = tpu.matmul %226, %228, %cst_190 {dimension_numbers = #tpu.dot_dimension_numbers<[1], [0], [0], [1], [0, 0, 1, 1], [], []>} : vector<32x32xf32>, vector<32x32xf32>, vector<32x32xf32> -> vector<32x32xf32>
    %230 = arith.addf %223, %229 : vector<32x32xf32>
    %231 = vector.extract_strided_slice %216 {offsets = [0, 1, 0, 0, 0], sizes = [1, 4, 1, 8, 32], strides = [1, 1, 1, 1, 1]} : vector<1x5x2x8x32xf32> to vector<1x4x1x8x32xf32>
    %232 = vector.shape_cast %231 : vector<1x4x1x8x32xf32> to vector<1x4x8x32xf32>
    %233 = vector.shape_cast %232 : vector<1x4x8x32xf32> to vector<32x32xf32>
    %c10_191 = arith.constant 10 : index
    %c0_192 = arith.constant 0 : index
    %c0_193 = arith.constant 0 : index
    %234 = vector.load %arg4[%c10_191, %c0_192, %c0_193] : memref<16x32x32xf32, #tpu.memory_space<vmem>>, vector<1x32x32xf32>
    %235 = vector.shape_cast %234 : vector<1x32x32xf32> to vector<32x32xf32>
    %cst_194 = arith.constant dense<0.000000e+00> : vector<32x32xf32>
    %236 = tpu.matmul %233, %235, %cst_194 {dimension_numbers = #tpu.dot_dimension_numbers<[1], [0], [0], [1], [0, 0, 1, 1], [], []>} : vector<32x32xf32>, vector<32x32xf32>, vector<32x32xf32> -> vector<32x32xf32>
    %237 = arith.addf %230, %236 : vector<32x32xf32>
    %238 = vector.extract_strided_slice %216 {offsets = [0, 1, 1, 0, 0], sizes = [1, 4, 1, 8, 32], strides = [1, 1, 1, 1, 1]} : vector<1x5x2x8x32xf32> to vector<1x4x1x8x32xf32>
    %239 = vector.shape_cast %238 : vector<1x4x1x8x32xf32> to vector<1x4x8x32xf32>
    %240 = vector.shape_cast %239 : vector<1x4x8x32xf32> to vector<32x32xf32>
    %c14_195 = arith.constant 14 : index
    %c0_196 = arith.constant 0 : index
    %c0_197 = arith.constant 0 : index
    %241 = vector.load %arg4[%c14_195, %c0_196, %c0_197] : memref<16x32x32xf32, #tpu.memory_space<vmem>>, vector<1x32x32xf32>
    %242 = vector.shape_cast %241 : vector<1x32x32xf32> to vector<32x32xf32>
    %cst_198 = arith.constant dense<0.000000e+00> : vector<32x32xf32>
    %243 = tpu.matmul %240, %242, %cst_198 {dimension_numbers = #tpu.dot_dimension_numbers<[1], [0], [0], [1], [0, 0, 1, 1], [], []>} : vector<32x32xf32>, vector<32x32xf32>, vector<32x32xf32> -> vector<32x32xf32>
    %244 = arith.addf %237, %243 : vector<32x32xf32>
    %c0_199 = arith.constant 0 : index
    %c0_200 = arith.constant 0 : index
    %c3_201 = arith.constant 3 : index
    %c0_202 = arith.constant 0 : index
    %245 = tpu.strided_load %arg12[%c0_199, %c0_200, %c3_201, %c0_202] {strides = array<i32: 1, 1, 2, 1>} : memref<1x10x18x32xf32, #tpu.memory_space<vmem>>, vector<1x10x8x32xf32>
    %246 = vector.shape_cast %245 : vector<1x10x8x32xf32> to vector<1x5x2x8x32xf32>
    %247 = vector.extract_strided_slice %246 {offsets = [0, 0, 0, 0, 0], sizes = [1, 4, 1, 8, 32], strides = [1, 1, 1, 1, 1]} : vector<1x5x2x8x32xf32> to vector<1x4x1x8x32xf32>
    %248 = vector.shape_cast %247 : vector<1x4x1x8x32xf32> to vector<1x4x8x32xf32>
    %249 = vector.shape_cast %248 : vector<1x4x8x32xf32> to vector<32x32xf32>
    %c3_203 = arith.constant 3 : index
    %c0_204 = arith.constant 0 : index
    %c0_205 = arith.constant 0 : index
    %250 = vector.load %arg4[%c3_203, %c0_204, %c0_205] : memref<16x32x32xf32, #tpu.memory_space<vmem>>, vector<1x32x32xf32>
    %251 = vector.shape_cast %250 : vector<1x32x32xf32> to vector<32x32xf32>
    %cst_206 = arith.constant dense<0.000000e+00> : vector<32x32xf32>
    %252 = tpu.matmul %249, %251, %cst_206 {dimension_numbers = #tpu.dot_dimension_numbers<[1], [0], [0], [1], [0, 0, 1, 1], [], []>} : vector<32x32xf32>, vector<32x32xf32>, vector<32x32xf32> -> vector<32x32xf32>
    %253 = arith.addf %244, %252 : vector<32x32xf32>
    %254 = vector.extract_strided_slice %246 {offsets = [0, 0, 1, 0, 0], sizes = [1, 4, 1, 8, 32], strides = [1, 1, 1, 1, 1]} : vector<1x5x2x8x32xf32> to vector<1x4x1x8x32xf32>
    %255 = vector.shape_cast %254 : vector<1x4x1x8x32xf32> to vector<1x4x8x32xf32>
    %256 = vector.shape_cast %255 : vector<1x4x8x32xf32> to vector<32x32xf32>
    %c7_207 = arith.constant 7 : index
    %c0_208 = arith.constant 0 : index
    %c0_209 = arith.constant 0 : index
    %257 = vector.load %arg4[%c7_207, %c0_208, %c0_209] : memref<16x32x32xf32, #tpu.memory_space<vmem>>, vector<1x32x32xf32>
    %258 = vector.shape_cast %257 : vector<1x32x32xf32> to vector<32x32xf32>
    %cst_210 = arith.constant dense<0.000000e+00> : vector<32x32xf32>
    %259 = tpu.matmul %256, %258, %cst_210 {dimension_numbers = #tpu.dot_dimension_numbers<[1], [0], [0], [1], [0, 0, 1, 1], [], []>} : vector<32x32xf32>, vector<32x32xf32>, vector<32x32xf32> -> vector<32x32xf32>
    %260 = arith.addf %253, %259 : vector<32x32xf32>
    %261 = vector.extract_strided_slice %246 {offsets = [0, 1, 0, 0, 0], sizes = [1, 4, 1, 8, 32], strides = [1, 1, 1, 1, 1]} : vector<1x5x2x8x32xf32> to vector<1x4x1x8x32xf32>
    %262 = vector.shape_cast %261 : vector<1x4x1x8x32xf32> to vector<1x4x8x32xf32>
    %263 = vector.shape_cast %262 : vector<1x4x8x32xf32> to vector<32x32xf32>
    %c11_211 = arith.constant 11 : index
    %c0_212 = arith.constant 0 : index
    %c0_213 = arith.constant 0 : index
    %264 = vector.load %arg4[%c11_211, %c0_212, %c0_213] : memref<16x32x32xf32, #tpu.memory_space<vmem>>, vector<1x32x32xf32>
    %265 = vector.shape_cast %264 : vector<1x32x32xf32> to vector<32x32xf32>
    %cst_214 = arith.constant dense<0.000000e+00> : vector<32x32xf32>
    %266 = tpu.matmul %263, %265, %cst_214 {dimension_numbers = #tpu.dot_dimension_numbers<[1], [0], [0], [1], [0, 0, 1, 1], [], []>} : vector<32x32xf32>, vector<32x32xf32>, vector<32x32xf32> -> vector<32x32xf32>
    %267 = arith.addf %260, %266 : vector<32x32xf32>
    %268 = vector.extract_strided_slice %246 {offsets = [0, 1, 1, 0, 0], sizes = [1, 4, 1, 8, 32], strides = [1, 1, 1, 1, 1]} : vector<1x5x2x8x32xf32> to vector<1x4x1x8x32xf32>
    %269 = vector.shape_cast %268 : vector<1x4x1x8x32xf32> to vector<1x4x8x32xf32>
    %270 = vector.shape_cast %269 : vector<1x4x8x32xf32> to vector<32x32xf32>
    %c15_215 = arith.constant 15 : index
    %c0_216 = arith.constant 0 : index
    %c0_217 = arith.constant 0 : index
    %271 = vector.load %arg4[%c15_215, %c0_216, %c0_217] : memref<16x32x32xf32, #tpu.memory_space<vmem>>, vector<1x32x32xf32>
    %272 = vector.shape_cast %271 : vector<1x32x32xf32> to vector<32x32xf32>
    %cst_218 = arith.constant dense<0.000000e+00> : vector<32x32xf32>
    %273 = tpu.matmul %270, %272, %cst_218 {dimension_numbers = #tpu.dot_dimension_numbers<[1], [0], [0], [1], [0, 0, 1, 1], [], []>} : vector<32x32xf32>, vector<32x32xf32>, vector<32x32xf32> -> vector<32x32xf32>
    %274 = arith.addf %267, %273 : vector<32x32xf32>
    %c0_219 = arith.constant 0 : index
    %c0_220 = arith.constant 0 : index
    %275 = vector.load %arg5[%c0_219, %c0_220] : memref<1x32xf32, #tpu.memory_space<vmem>>, vector<1x32xf32>
    %276 = vector.broadcast %275 : vector<1x32xf32> to vector<32x32xf32>
    %277 = arith.addf %274, %276 : vector<32x32xf32>
    %cst_221 = arith.constant 0.000000e+00 : f32
    %278 = vector.broadcast %cst_221 : f32 to vector<32x32xf32>
    %279 = arith.maximumf %277, %278 : vector<32x32xf32>
    %280 = vector.shape_cast %279 : vector<32x32xf32> to vector<1x4x8x32xf32>
    %281 = vector.extract_strided_slice %280 {offsets = [0, 0, 0, 0], sizes = [1, 4, 4, 32], strides = [1, 1, 1, 1]} : vector<1x4x8x32xf32> to vector<1x4x4x32xf32>
    %c0_222 = arith.constant 0 : index
    %c1_223 = arith.constant 1 : index
    %c1_224 = arith.constant 1 : index
    %c0_225 = arith.constant 0 : index
    %282 = vector.load %arg13[%c0_222, %c1_223, %c1_224, %c0_225] : memref<1x6x18x32xf32, #tpu.memory_space<vmem>>, vector<1x4x4x32xf32>
    tpu.vector_store %arg13[%c0_222, %c1_223, %c1_224, %c0_225], %281 {strides = array<i32>} : memref<1x6x18x32xf32, #tpu.memory_space<vmem>>, vector<1x4x4x32xf32>,
    %cst_226 = arith.constant 0.000000e+00 : f32
    %283 = vector.broadcast %cst_226 : f32 to vector<16x32xf32>
    %c0_227 = arith.constant 0 : index
    %c0_228 = arith.constant 0 : index
    %c0_229 = arith.constant 0 : index
    %c0_230 = arith.constant 0 : index
    %284 = tpu.strided_load %arg13[%c0_227, %c0_228, %c0_229, %c0_230] {strides = array<i32: 1, 1, 2, 1>} : memref<1x6x18x32xf32, #tpu.memory_space<vmem>>, vector<1x6x8x32xf32>
    %285 = vector.shape_cast %284 : vector<1x6x8x32xf32> to vector<1x3x2x8x32xf32>
    %286 = vector.extract_strided_slice %285 {offsets = [0, 0, 0, 0, 0], sizes = [1, 2, 1, 8, 32], strides = [1, 1, 1, 1, 1]} : vector<1x3x2x8x32xf32> to vector<1x2x1x8x32xf32>
    %287 = vector.shape_cast %286 : vector<1x2x1x8x32xf32> to vector<1x2x8x32xf32>
    %288 = vector.shape_cast %287 : vector<1x2x8x32xf32> to vector<16x32xf32>
    %c0_231 = arith.constant 0 : index
    %c0_232 = arith.constant 0 : index
    %c0_233 = arith.constant 0 : index
    %289 = vector.load %arg6[%c0_231, %c0_232, %c0_233] : memref<16x32x32xf32, #tpu.memory_space<vmem>>, vector<1x32x32xf32>
    %290 = vector.shape_cast %289 : vector<1x32x32xf32> to vector<32x32xf32>
    %cst_234 = arith.constant dense<0.000000e+00> : vector<16x32xf32>
    %291 = tpu.matmul %288, %290, %cst_234 {dimension_numbers = #tpu.dot_dimension_numbers<[1], [0], [0], [1], [0, 0, 1, 1], [], []>} : vector<16x32xf32>, vector<32x32xf32>, vector<16x32xf32> -> vector<16x32xf32>
    %292 = arith.addf %283, %291 : vector<16x32xf32>
    %293 = vector.extract_strided_slice %285 {offsets = [0, 0, 1, 0, 0], sizes = [1, 2, 1, 8, 32], strides = [1, 1, 1, 1, 1]} : vector<1x3x2x8x32xf32> to vector<1x2x1x8x32xf32>
    %294 = vector.shape_cast %293 : vector<1x2x1x8x32xf32> to vector<1x2x8x32xf32>
    %295 = vector.shape_cast %294 : vector<1x2x8x32xf32> to vector<16x32xf32>
    %c4_235 = arith.constant 4 : index
    %c0_236 = arith.constant 0 : index
    %c0_237 = arith.constant 0 : index
    %296 = vector.load %arg6[%c4_235, %c0_236, %c0_237] : memref<16x32x32xf32, #tpu.memory_space<vmem>>, vector<1x32x32xf32>
    %297 = vector.shape_cast %296 : vector<1x32x32xf32> to vector<32x32xf32>
    %cst_238 = arith.constant dense<0.000000e+00> : vector<16x32xf32>
    %298 = tpu.matmul %295, %297, %cst_238 {dimension_numbers = #tpu.dot_dimension_numbers<[1], [0], [0], [1], [0, 0, 1, 1], [], []>} : vector<16x32xf32>, vector<32x32xf32>, vector<16x32xf32> -> vector<16x32xf32>
    %299 = arith.addf %292, %298 : vector<16x32xf32>
    %300 = vector.extract_strided_slice %285 {offsets = [0, 1, 0, 0, 0], sizes = [1, 2, 1, 8, 32], strides = [1, 1, 1, 1, 1]} : vector<1x3x2x8x32xf32> to vector<1x2x1x8x32xf32>
    %301 = vector.shape_cast %300 : vector<1x2x1x8x32xf32> to vector<1x2x8x32xf32>
    %302 = vector.shape_cast %301 : vector<1x2x8x32xf32> to vector<16x32xf32>
    %c8_239 = arith.constant 8 : index
    %c0_240 = arith.constant 0 : index
    %c0_241 = arith.constant 0 : index
    %303 = vector.load %arg6[%c8_239, %c0_240, %c0_241] : memref<16x32x32xf32, #tpu.memory_space<vmem>>, vector<1x32x32xf32>
    %304 = vector.shape_cast %303 : vector<1x32x32xf32> to vector<32x32xf32>
    %cst_242 = arith.constant dense<0.000000e+00> : vector<16x32xf32>
    %305 = tpu.matmul %302, %304, %cst_242 {dimension_numbers = #tpu.dot_dimension_numbers<[1], [0], [0], [1], [0, 0, 1, 1], [], []>} : vector<16x32xf32>, vector<32x32xf32>, vector<16x32xf32> -> vector<16x32xf32>
    %306 = arith.addf %299, %305 : vector<16x32xf32>
    %307 = vector.extract_strided_slice %285 {offsets = [0, 1, 1, 0, 0], sizes = [1, 2, 1, 8, 32], strides = [1, 1, 1, 1, 1]} : vector<1x3x2x8x32xf32> to vector<1x2x1x8x32xf32>
    %308 = vector.shape_cast %307 : vector<1x2x1x8x32xf32> to vector<1x2x8x32xf32>
    %309 = vector.shape_cast %308 : vector<1x2x8x32xf32> to vector<16x32xf32>
    %c12_243 = arith.constant 12 : index
    %c0_244 = arith.constant 0 : index
    %c0_245 = arith.constant 0 : index
    %310 = vector.load %arg6[%c12_243, %c0_244, %c0_245] : memref<16x32x32xf32, #tpu.memory_space<vmem>>, vector<1x32x32xf32>
    %311 = vector.shape_cast %310 : vector<1x32x32xf32> to vector<32x32xf32>
    %cst_246 = arith.constant dense<0.000000e+00> : vector<16x32xf32>
    %312 = tpu.matmul %309, %311, %cst_246 {dimension_numbers = #tpu.dot_dimension_numbers<[1], [0], [0], [1], [0, 0, 1, 1], [], []>} : vector<16x32xf32>, vector<32x32xf32>, vector<16x32xf32> -> vector<16x32xf32>
    %313 = arith.addf %306, %312 : vector<16x32xf32>
    %c0_247 = arith.constant 0 : index
    %c0_248 = arith.constant 0 : index
    %c1_249 = arith.constant 1 : index
    %c0_250 = arith.constant 0 : index
    %314 = tpu.strided_load %arg13[%c0_247, %c0_248, %c1_249, %c0_250] {strides = array<i32: 1, 1, 2, 1>} : memref<1x6x18x32xf32, #tpu.memory_space<vmem>>, vector<1x6x8x32xf32>
    %315 = vector.shape_cast %314 : vector<1x6x8x32xf32> to vector<1x3x2x8x32xf32>
    %316 = vector.extract_strided_slice %315 {offsets = [0, 0, 0, 0, 0], sizes = [1, 2, 1, 8, 32], strides = [1, 1, 1, 1, 1]} : vector<1x3x2x8x32xf32> to vector<1x2x1x8x32xf32>
    %317 = vector.shape_cast %316 : vector<1x2x1x8x32xf32> to vector<1x2x8x32xf32>
    %318 = vector.shape_cast %317 : vector<1x2x8x32xf32> to vector<16x32xf32>
    %c1_251 = arith.constant 1 : index
    %c0_252 = arith.constant 0 : index
    %c0_253 = arith.constant 0 : index
    %319 = vector.load %arg6[%c1_251, %c0_252, %c0_253] : memref<16x32x32xf32, #tpu.memory_space<vmem>>, vector<1x32x32xf32>
    %320 = vector.shape_cast %319 : vector<1x32x32xf32> to vector<32x32xf32>
    %cst_254 = arith.constant dense<0.000000e+00> : vector<16x32xf32>
    %321 = tpu.matmul %318, %320, %cst_254 {dimension_numbers = #tpu.dot_dimension_numbers<[1], [0], [0], [1], [0, 0, 1, 1], [], []>} : vector<16x32xf32>, vector<32x32xf32>, vector<16x32xf32> -> vector<16x32xf32>
    %322 = arith.addf %313, %321 : vector<16x32xf32>
    %323 = vector.extract_strided_slice %315 {offsets = [0, 0, 1, 0, 0], sizes = [1, 2, 1, 8, 32], strides = [1, 1, 1, 1, 1]} : vector<1x3x2x8x32xf32> to vector<1x2x1x8x32xf32>
    %324 = vector.shape_cast %323 : vector<1x2x1x8x32xf32> to vector<1x2x8x32xf32>
    %325 = vector.shape_cast %324 : vector<1x2x8x32xf32> to vector<16x32xf32>
    %c5_255 = arith.constant 5 : index
    %c0_256 = arith.constant 0 : index
    %c0_257 = arith.constant 0 : index
    %326 = vector.load %arg6[%c5_255, %c0_256, %c0_257] : memref<16x32x32xf32, #tpu.memory_space<vmem>>, vector<1x32x32xf32>
    %327 = vector.shape_cast %326 : vector<1x32x32xf32> to vector<32x32xf32>
    %cst_258 = arith.constant dense<0.000000e+00> : vector<16x32xf32>
    %328 = tpu.matmul %325, %327, %cst_258 {dimension_numbers = #tpu.dot_dimension_numbers<[1], [0], [0], [1], [0, 0, 1, 1], [], []>} : vector<16x32xf32>, vector<32x32xf32>, vector<16x32xf32> -> vector<16x32xf32>
    %329 = arith.addf %322, %328 : vector<16x32xf32>
    %330 = vector.extract_strided_slice %315 {offsets = [0, 1, 0, 0, 0], sizes = [1, 2, 1, 8, 32], strides = [1, 1, 1, 1, 1]} : vector<1x3x2x8x32xf32> to vector<1x2x1x8x32xf32>
    %331 = vector.shape_cast %330 : vector<1x2x1x8x32xf32> to vector<1x2x8x32xf32>
    %332 = vector.shape_cast %331 : vector<1x2x8x32xf32> to vector<16x32xf32>
    %c9_259 = arith.constant 9 : index
    %c0_260 = arith.constant 0 : index
    %c0_261 = arith.constant 0 : index
    %333 = vector.load %arg6[%c9_259, %c0_260, %c0_261] : memref<16x32x32xf32, #tpu.memory_space<vmem>>, vector<1x32x32xf32>
    %334 = vector.shape_cast %333 : vector<1x32x32xf32> to vector<32x32xf32>
    %cst_262 = arith.constant dense<0.000000e+00> : vector<16x32xf32>
    %335 = tpu.matmul %332, %334, %cst_262 {dimension_numbers = #tpu.dot_dimension_numbers<[1], [0], [0], [1], [0, 0, 1, 1], [], []>} : vector<16x32xf32>, vector<32x32xf32>, vector<16x32xf32> -> vector<16x32xf32>
    %336 = arith.addf %329, %335 : vector<16x32xf32>
    %337 = vector.extract_strided_slice %315 {offsets = [0, 1, 1, 0, 0], sizes = [1, 2, 1, 8, 32], strides = [1, 1, 1, 1, 1]} : vector<1x3x2x8x32xf32> to vector<1x2x1x8x32xf32>
    %338 = vector.shape_cast %337 : vector<1x2x1x8x32xf32> to vector<1x2x8x32xf32>
    %339 = vector.shape_cast %338 : vector<1x2x8x32xf32> to vector<16x32xf32>
    %c13_263 = arith.constant 13 : index
    %c0_264 = arith.constant 0 : index
    %c0_265 = arith.constant 0 : index
    %340 = vector.load %arg6[%c13_263, %c0_264, %c0_265] : memref<16x32x32xf32, #tpu.memory_space<vmem>>, vector<1x32x32xf32>
    %341 = vector.shape_cast %340 : vector<1x32x32xf32> to vector<32x32xf32>
    %cst_266 = arith.constant dense<0.000000e+00> : vector<16x32xf32>
    %342 = tpu.matmul %339, %341, %cst_266 {dimension_numbers = #tpu.dot_dimension_numbers<[1], [0], [0], [1], [0, 0, 1, 1], [], []>} : vector<16x32xf32>, vector<32x32xf32>, vector<16x32xf32> -> vector<16x32xf32>
    %343 = arith.addf %336, %342 : vector<16x32xf32>
    %c0_267 = arith.constant 0 : index
    %c0_268 = arith.constant 0 : index
    %c2_269 = arith.constant 2 : index
    %c0_270 = arith.constant 0 : index
    %344 = tpu.strided_load %arg13[%c0_267, %c0_268, %c2_269, %c0_270] {strides = array<i32: 1, 1, 2, 1>} : memref<1x6x18x32xf32, #tpu.memory_space<vmem>>, vector<1x6x8x32xf32>
    %345 = vector.shape_cast %344 : vector<1x6x8x32xf32> to vector<1x3x2x8x32xf32>
    %346 = vector.extract_strided_slice %345 {offsets = [0, 0, 0, 0, 0], sizes = [1, 2, 1, 8, 32], strides = [1, 1, 1, 1, 1]} : vector<1x3x2x8x32xf32> to vector<1x2x1x8x32xf32>
    %347 = vector.shape_cast %346 : vector<1x2x1x8x32xf32> to vector<1x2x8x32xf32>
    %348 = vector.shape_cast %347 : vector<1x2x8x32xf32> to vector<16x32xf32>
    %c2_271 = arith.constant 2 : index
    %c0_272 = arith.constant 0 : index
    %c0_273 = arith.constant 0 : index
    %349 = vector.load %arg6[%c2_271, %c0_272, %c0_273] : memref<16x32x32xf32, #tpu.memory_space<vmem>>, vector<1x32x32xf32>
    %350 = vector.shape_cast %349 : vector<1x32x32xf32> to vector<32x32xf32>
    %cst_274 = arith.constant dense<0.000000e+00> : vector<16x32xf32>
    %351 = tpu.matmul %348, %350, %cst_274 {dimension_numbers = #tpu.dot_dimension_numbers<[1], [0], [0], [1], [0, 0, 1, 1], [], []>} : vector<16x32xf32>, vector<32x32xf32>, vector<16x32xf32> -> vector<16x32xf32>
    %352 = arith.addf %343, %351 : vector<16x32xf32>
    %353 = vector.extract_strided_slice %345 {offsets = [0, 0, 1, 0, 0], sizes = [1, 2, 1, 8, 32], strides = [1, 1, 1, 1, 1]} : vector<1x3x2x8x32xf32> to vector<1x2x1x8x32xf32>
    %354 = vector.shape_cast %353 : vector<1x2x1x8x32xf32> to vector<1x2x8x32xf32>
    %355 = vector.shape_cast %354 : vector<1x2x8x32xf32> to vector<16x32xf32>
    %c6_275 = arith.constant 6 : index
    %c0_276 = arith.constant 0 : index
    %c0_277 = arith.constant 0 : index
    %356 = vector.load %arg6[%c6_275, %c0_276, %c0_277] : memref<16x32x32xf32, #tpu.memory_space<vmem>>, vector<1x32x32xf32>
    %357 = vector.shape_cast %356 : vector<1x32x32xf32> to vector<32x32xf32>
    %cst_278 = arith.constant dense<0.000000e+00> : vector<16x32xf32>
    %358 = tpu.matmul %355, %357, %cst_278 {dimension_numbers = #tpu.dot_dimension_numbers<[1], [0], [0], [1], [0, 0, 1, 1], [], []>} : vector<16x32xf32>, vector<32x32xf32>, vector<16x32xf32> -> vector<16x32xf32>
    %359 = arith.addf %352, %358 : vector<16x32xf32>
    %360 = vector.extract_strided_slice %345 {offsets = [0, 1, 0, 0, 0], sizes = [1, 2, 1, 8, 32], strides = [1, 1, 1, 1, 1]} : vector<1x3x2x8x32xf32> to vector<1x2x1x8x32xf32>
    %361 = vector.shape_cast %360 : vector<1x2x1x8x32xf32> to vector<1x2x8x32xf32>
    %362 = vector.shape_cast %361 : vector<1x2x8x32xf32> to vector<16x32xf32>
    %c10_279 = arith.constant 10 : index
    %c0_280 = arith.constant 0 : index
    %c0_281 = arith.constant 0 : index
    %363 = vector.load %arg6[%c10_279, %c0_280, %c0_281] : memref<16x32x32xf32, #tpu.memory_space<vmem>>, vector<1x32x32xf32>
    %364 = vector.shape_cast %363 : vector<1x32x32xf32> to vector<32x32xf32>
    %cst_282 = arith.constant dense<0.000000e+00> : vector<16x32xf32>
    %365 = tpu.matmul %362, %364, %cst_282 {dimension_numbers = #tpu.dot_dimension_numbers<[1], [0], [0], [1], [0, 0, 1, 1], [], []>} : vector<16x32xf32>, vector<32x32xf32>, vector<16x32xf32> -> vector<16x32xf32>
    %366 = arith.addf %359, %365 : vector<16x32xf32>
    %367 = vector.extract_strided_slice %345 {offsets = [0, 1, 1, 0, 0], sizes = [1, 2, 1, 8, 32], strides = [1, 1, 1, 1, 1]} : vector<1x3x2x8x32xf32> to vector<1x2x1x8x32xf32>
    %368 = vector.shape_cast %367 : vector<1x2x1x8x32xf32> to vector<1x2x8x32xf32>
    %369 = vector.shape_cast %368 : vector<1x2x8x32xf32> to vector<16x32xf32>
    %c14_283 = arith.constant 14 : index
    %c0_284 = arith.constant 0 : index
    %c0_285 = arith.constant 0 : index
    %370 = vector.load %arg6[%c14_283, %c0_284, %c0_285] : memref<16x32x32xf32, #tpu.memory_space<vmem>>, vector<1x32x32xf32>
    %371 = vector.shape_cast %370 : vector<1x32x32xf32> to vector<32x32xf32>
    %cst_286 = arith.constant dense<0.000000e+00> : vector<16x32xf32>
    %372 = tpu.matmul %369, %371, %cst_286 {dimension_numbers = #tpu.dot_dimension_numbers<[1], [0], [0], [1], [0, 0, 1, 1], [], []>} : vector<16x32xf32>, vector<32x32xf32>, vector<16x32xf32> -> vector<16x32xf32>
    %373 = arith.addf %366, %372 : vector<16x32xf32>
    %c0_287 = arith.constant 0 : index
    %c0_288 = arith.constant 0 : index
    %c3_289 = arith.constant 3 : index
    %c0_290 = arith.constant 0 : index
    %374 = tpu.strided_load %arg13[%c0_287, %c0_288, %c3_289, %c0_290] {strides = array<i32: 1, 1, 2, 1>} : memref<1x6x18x32xf32, #tpu.memory_space<vmem>>, vector<1x6x8x32xf32>
    %375 = vector.shape_cast %374 : vector<1x6x8x32xf32> to vector<1x3x2x8x32xf32>
    %376 = vector.extract_strided_slice %375 {offsets = [0, 0, 0, 0, 0], sizes = [1, 2, 1, 8, 32], strides = [1, 1, 1, 1, 1]} : vector<1x3x2x8x32xf32> to vector<1x2x1x8x32xf32>
    %377 = vector.shape_cast %376 : vector<1x2x1x8x32xf32> to vector<1x2x8x32xf32>
    %378 = vector.shape_cast %377 : vector<1x2x8x32xf32> to vector<16x32xf32>
    %c3_291 = arith.constant 3 : index
    %c0_292 = arith.constant 0 : index
    %c0_293 = arith.constant 0 : index
    %379 = vector.load %arg6[%c3_291, %c0_292, %c0_293] : memref<16x32x32xf32, #tpu.memory_space<vmem>>, vector<1x32x32xf32>
    %380 = vector.shape_cast %379 : vector<1x32x32xf32> to vector<32x32xf32>
    %cst_294 = arith.constant dense<0.000000e+00> : vector<16x32xf32>
    %381 = tpu.matmul %378, %380, %cst_294 {dimension_numbers = #tpu.dot_dimension_numbers<[1], [0], [0], [1], [0, 0, 1, 1], [], []>} : vector<16x32xf32>, vector<32x32xf32>, vector<16x32xf32> -> vector<16x32xf32>
    %382 = arith.addf %373, %381 : vector<16x32xf32>
    %383 = vector.extract_strided_slice %375 {offsets = [0, 0, 1, 0, 0], sizes = [1, 2, 1, 8, 32], strides = [1, 1, 1, 1, 1]} : vector<1x3x2x8x32xf32> to vector<1x2x1x8x32xf32>
    %384 = vector.shape_cast %383 : vector<1x2x1x8x32xf32> to vector<1x2x8x32xf32>
    %385 = vector.shape_cast %384 : vector<1x2x8x32xf32> to vector<16x32xf32>
    %c7_295 = arith.constant 7 : index
    %c0_296 = arith.constant 0 : index
    %c0_297 = arith.constant 0 : index
    %386 = vector.load %arg6[%c7_295, %c0_296, %c0_297] : memref<16x32x32xf32, #tpu.memory_space<vmem>>, vector<1x32x32xf32>
    %387 = vector.shape_cast %386 : vector<1x32x32xf32> to vector<32x32xf32>
    %cst_298 = arith.constant dense<0.000000e+00> : vector<16x32xf32>
    %388 = tpu.matmul %385, %387, %cst_298 {dimension_numbers = #tpu.dot_dimension_numbers<[1], [0], [0], [1], [0, 0, 1, 1], [], []>} : vector<16x32xf32>, vector<32x32xf32>, vector<16x32xf32> -> vector<16x32xf32>
    %389 = arith.addf %382, %388 : vector<16x32xf32>
    %390 = vector.extract_strided_slice %375 {offsets = [0, 1, 0, 0, 0], sizes = [1, 2, 1, 8, 32], strides = [1, 1, 1, 1, 1]} : vector<1x3x2x8x32xf32> to vector<1x2x1x8x32xf32>
    %391 = vector.shape_cast %390 : vector<1x2x1x8x32xf32> to vector<1x2x8x32xf32>
    %392 = vector.shape_cast %391 : vector<1x2x8x32xf32> to vector<16x32xf32>
    %c11_299 = arith.constant 11 : index
    %c0_300 = arith.constant 0 : index
    %c0_301 = arith.constant 0 : index
    %393 = vector.load %arg6[%c11_299, %c0_300, %c0_301] : memref<16x32x32xf32, #tpu.memory_space<vmem>>, vector<1x32x32xf32>
    %394 = vector.shape_cast %393 : vector<1x32x32xf32> to vector<32x32xf32>
    %cst_302 = arith.constant dense<0.000000e+00> : vector<16x32xf32>
    %395 = tpu.matmul %392, %394, %cst_302 {dimension_numbers = #tpu.dot_dimension_numbers<[1], [0], [0], [1], [0, 0, 1, 1], [], []>} : vector<16x32xf32>, vector<32x32xf32>, vector<16x32xf32> -> vector<16x32xf32>
    %396 = arith.addf %389, %395 : vector<16x32xf32>
    %397 = vector.extract_strided_slice %375 {offsets = [0, 1, 1, 0, 0], sizes = [1, 2, 1, 8, 32], strides = [1, 1, 1, 1, 1]} : vector<1x3x2x8x32xf32> to vector<1x2x1x8x32xf32>
    %398 = vector.shape_cast %397 : vector<1x2x1x8x32xf32> to vector<1x2x8x32xf32>
    %399 = vector.shape_cast %398 : vector<1x2x8x32xf32> to vector<16x32xf32>
    %c15_303 = arith.constant 15 : index
    %c0_304 = arith.constant 0 : index
    %c0_305 = arith.constant 0 : index
    %400 = vector.load %arg6[%c15_303, %c0_304, %c0_305] : memref<16x32x32xf32, #tpu.memory_space<vmem>>, vector<1x32x32xf32>
    %401 = vector.shape_cast %400 : vector<1x32x32xf32> to vector<32x32xf32>
    %cst_306 = arith.constant dense<0.000000e+00> : vector<16x32xf32>
    %402 = tpu.matmul %399, %401, %cst_306 {dimension_numbers = #tpu.dot_dimension_numbers<[1], [0], [0], [1], [0, 0, 1, 1], [], []>} : vector<16x32xf32>, vector<32x32xf32>, vector<16x32xf32> -> vector<16x32xf32>
    %403 = arith.addf %396, %402 : vector<16x32xf32>
    %c0_307 = arith.constant 0 : index
    %c0_308 = arith.constant 0 : index
    %404 = vector.load %arg7[%c0_307, %c0_308] : memref<1x32xf32, #tpu.memory_space<vmem>>, vector<1x32xf32>
    %405 = vector.broadcast %404 : vector<1x32xf32> to vector<16x32xf32>
    %406 = arith.addf %403, %405 : vector<16x32xf32>
    %cst_309 = arith.constant 0.000000e+00 : f32
    %407 = vector.broadcast %cst_309 : f32 to vector<16x32xf32>
    %408 = arith.maximumf %406, %407 : vector<16x32xf32>
    %c0_310 = arith.constant 0 : index
    %c0_311 = arith.constant 0 : index
    %409 = vector.load %arg8[%c0_310, %c0_311] : memref<32x8xf32, #tpu.memory_space<vmem>>, vector<32x8xf32>
    %cst_312 = arith.constant dense<0.000000e+00> : vector<16x8xf32>
    %410 = tpu.matmul %408, %409, %cst_312 {dimension_numbers = #tpu.dot_dimension_numbers<[1], [0], [0], [1], [0, 0, 1, 1], [], []>} : vector<16x32xf32>, vector<32x8xf32>, vector<16x8xf32> -> vector<16x8xf32>
    %c0_313 = arith.constant 0 : index
    %c0_314 = arith.constant 0 : index
    %411 = vector.load %arg9[%c0_313, %c0_314] : memref<1x8xf32, #tpu.memory_space<vmem>>, vector<1x8xf32>
    %412 = vector.broadcast %411 : vector<1x8xf32> to vector<16x8xf32>
    %413 = arith.addf %410, %412 : vector<16x8xf32>
    %c0_315 = arith.constant 0 : index
    %c0_316 = arith.constant 0 : index
    %414 = vector.load %arg10[%c0_315, %c0_316] : memref<16x8xf32, #tpu.memory_space<vmem>>, vector<16x8xf32>
    tpu.vector_store %arg10[%c0_315, %c0_316], %413 {strides = array<i32>} : memref<16x8xf32, #tpu.memory_space<vmem>>, vector<16x8xf32>,
    return
  }
  func.func @transform_0(%arg0: i32) -> (i32, i32, i32, i32) {
    %c0_i32 = arith.constant 0 : i32
    %c0_i32_0 = arith.constant 0 : i32
    %c0_i32_1 = arith.constant 0 : i32
    %c0_i32_2 = arith.constant 0 : i32
    return %arg0, %c0_i32, %c0_i32_0, %c0_i32_1 : i32, i32, i32, i32
  }
  func.func @transform_1(%arg0: i32) -> (i32, i32, i32) {
    %c0_i32 = arith.constant 0 : i32
    %c0_i32_0 = arith.constant 0 : i32
    %c0_i32_1 = arith.constant 0 : i32
    %c0_i32_2 = arith.constant 0 : i32
    return %c0_i32, %c0_i32_0, %c0_i32_1 : i32, i32, i32
  }
  func.func @transform_2(%arg0: i32) -> (i32, i32) {
    %c0_i32 = arith.constant 0 : i32
    %c0_i32_0 = arith.constant 0 : i32
    %c0_i32_1 = arith.constant 0 : i32
    return %c0_i32, %c0_i32_0 : i32, i32
  }
  func.func @transform_3(%arg0: i32) -> (i32, i32, i32) {
    %c0_i32 = arith.constant 0 : i32
    %c0_i32_0 = arith.constant 0 : i32
    %c0_i32_1 = arith.constant 0 : i32
    %c0_i32_2 = arith.constant 0 : i32
    return %c0_i32, %c0_i32_0, %c0_i32_1 : i32, i32, i32
  }
  func.func @transform_4(%arg0: i32) -> (i32, i32) {
    %c0_i32 = arith.constant 0 : i32
    %c0_i32_0 = arith.constant 0 : i32
    %c0_i32_1 = arith.constant 0 : i32
    return %c0_i32, %c0_i32_0 : i32, i32
  }
  func.func @transform_5(%arg0: i32) -> (i32, i32, i32) {
    %c0_i32 = arith.constant 0 : i32
    %c0_i32_0 = arith.constant 0 : i32
    %c0_i32_1 = arith.constant 0 : i32
    %c0_i32_2 = arith.constant 0 : i32
    return %c0_i32, %c0_i32_0, %c0_i32_1 : i32, i32, i32
  }
  func.func @transform_6(%arg0: i32) -> (i32, i32) {
    %c0_i32 = arith.constant 0 : i32
    %c0_i32_0 = arith.constant 0 : i32
    %c0_i32_1 = arith.constant 0 : i32
    return %c0_i32, %c0_i32_0 : i32, i32
  }
  func.func @transform_7(%arg0: i32) -> (i32, i32) {
    %c0_i32 = arith.constant 0 : i32
    %c0_i32_0 = arith.constant 0 : i32
    %c0_i32_1 = arith.constant 0 : i32
    return %c0_i32, %c0_i32_0 : i32, i32
  }
  func.func @transform_8(%arg0: i32) -> (i32, i32) {
    %c0_i32 = arith.constant 0 : i32
    %c0_i32_0 = arith.constant 0 : i32
    %c0_i32_1 = arith.constant 0 : i32
    return %c0_i32, %c0_i32_0 : i32, i32
  }
  func.func @transform_9(%arg0: i32) -> (i32, i32) {
    %c0_i32 = arith.constant 0 : i32
    %c0_i32_0 = arith.constant 0 : i32
    return %arg0, %c0_i32 : i32, i32
  }
}

</mosaic_0001>

<bundles_post_ra>
// kernel: encoder_forward.1
= control target key start
LH: loop header
LB: loop body
LE: loop exit
PB: predicated region body
PF: predicated region fallthrough
CT: control target
= control target key end

     0   :  { %s8021_s30 = smov 0   ;;  %s9038_s0 = inlined_call_operand.vmem [shape: f32[2,16,16,4], index: 0, kind: input, shape index: {}]   ;;  %s9039_s1 = inlined_call_operand.vmem [shape: f32[16,4,32], index: 1, kind: input, shape index: {}]   ;;  %s9040_s2 = inlined_call_operand.vmem [shape: f32[1,32], index: 2, kind: input, shape index: {}]   ;;  %s9041_s3 = inlined_call_operand.vmem [shape: f32[16,32,32], index: 3, kind: input, shape index: {}]   ;;  %s9042_s4 = inlined_call_operand.vmem [shape: f32[1,32], index: 4, kind: input, shape index: {}]   ;;  %s9043_s5 = inlined_call_operand.vmem [shape: f32[16,32,32], index: 5, kind: input, shape index: {}]   ;;  %s9044_s6 = inlined_call_operand.vmem [shape: f32[1,32], index: 6, kind: input, shape index: {}]   ;;  %s9045_s7 = inlined_call_operand.vmem [shape: f32[32,8], index: 7, kind: input, shape index: {}]   ;;  %s9046_s8 = inlined_call_operand.vmem [shape: f32[1,8], index: 8, kind: input, shape index: {}]   ;;  %s9047_s9 = inlined_call_operand.vmem [shape: f32[32,8], index: 9, kind: output, shape index: {}]  }
   0x1 LB: > { %s8027_s10 = sadd.s32 4294967295, %s7968_s30   ;;  %p6081_p0 = scmp.ge.s32.totalorder %s7968_s30, 1  ;;  %s7968_s30 = sphi %s8021_s30, %s19_s30  }
   0x2   : > { %p287_p1 = scmp.lt.s32.totalorder %s7968_s30, 3 }
   0x4   : > { %p288_p2 = pnand %p6081_p0, %p287_p1 }
   0x5   : > { %v6086_v0 = vld [vmem:[%s9039_s1 + $0x10] sm:$0xf] (!%p288_p2)  ;;  %vm573_vm0 = vcmask (!%p288_p2), 1043456   ;;  %p323_p3 = scmp.lt.s32.totalorder (!%p288_p2), %s8027_s10, 1  ;;  %vm334_vm1 = vcmask (!%p288_p2), 31744   ;;  %vm343_vm2 = vcmask (!%p288_p2), 24576  }
   0x6   : > { %291 = sbr.rel (%p288_p2) target bundleno = 1411 (0x583), region = 56  ;;  %6844 = vmatprep.subr.msk.mxu0 (!%p288_p2), %vm573_vm0, %v6086_v0  ;;  %v7970_v1 = vmov (!%p288_p2), 0.0   ;;  %v8047_v2 = vld [vmem:[%s9039_s1] sm:$0xf] (!%p288_p2)  ;;  %vm337_vm3 = vcmask (!%p288_p2), 25600   ;;  %vm380_vm4 = vcmask (!%p288_p2), 261120  }
   0x7   : > { %335 = vst.msk [vmem:[#allocation2] sm:$0xff] (!%p288_p2), %vm334_vm1, %v7970_v1  ;;  %336 = vst.msk [vmem:[#allocation2 + $0x8] sm:$0xff] (!%p288_p2), %vm334_vm1, %v7970_v1  ;;  %6845 = vmatpush3.msk.msra.mxu0 (!%p288_p2), %vm573_vm0, %v6086_v0  ;;  %v6105_v23 = vld [vmem:[%s9039_s1 + $0x20] sm:$0xf] (!%p288_p2)  ;;  %v6115_v47 = vld [vmem:[%s9039_s1 + $0x30] sm:$0xf] (!%p288_p2) }
   0x8   : > { %340 = vst.msk [vmem:[#allocation2 + $0x198] sm:$0xff] (!%p288_p2), %vm334_vm1, %v7970_v1  ;;  %341 = vst.msk [vmem:[#allocation2 + $0x1a0] sm:$0xff] (!%p288_p2), %vm334_vm1, %v7970_v1  ;;  %6858 = vmatprep.subr.msk.mxu0 (!%p288_p2), %vm573_vm0, %v8047_v2  ;;  %v6125_v53 = vld [vmem:[%s9039_s1 + $0x4] sm:$0xf] (!%p288_p2)  ;;  %v6135_v55 = vld [vmem:[%s9039_s1 + $0x14] sm:$0xf] (!%p288_p2) }
   0x9   : > { %345 = vst.msk [vmem:[#allocation2 + $0x18] sm:$0x1] (!%p288_p2), %vm343_vm2, %v7970_v1  ;;  %346 = vst.msk [vmem:[#allocation2 + $0x30] sm:$0x1] (!%p288_p2), %vm343_vm2, %v7970_v1  ;;  %v6145_v60 = vld [vmem:[%s9039_s1 + $0x24] sm:$0xf] (!%p288_p2) }
   0xa   : > { %347 = vst.msk [vmem:[#allocation2 + $0x48] sm:$0x1] (!%p288_p2), %vm343_vm2, %v7970_v1  ;;  %348 = vst.msk [vmem:[#allocation2 + $0x60] sm:$0x1] (!%p288_p2), %vm343_vm2, %v7970_v1  ;;  %vm389_vm5 = vcmask (!%p288_p2), 253952   ;;  %vm383_vm6 = vcmask (!%p288_p2), 254976  }
   0xb   : > { %349 = vst.msk [vmem:[#allocation2 + $0x78] sm:$0x1] (!%p288_p2), %vm343_vm2, %v7970_v1  ;;  %350 = vst.msk [vmem:[#allocation2 + $0x90] sm:$0x1] (!%p288_p2), %vm343_vm2, %v7970_v1  ;;  %vm434_vm7 = vcmask (!%p288_p2), 258048   ;;  %vm4484_vm8 = vcmask (!%p288_p2), 257024  }
   0xc   : > { %351 = vst.msk [vmem:[#allocation2 + $0xa8] sm:$0x1] (!%p288_p2), %vm343_vm2, %v7970_v1  ;;  %352 = vst.msk [vmem:[#allocation2 + $0xc0] sm:$0x1] (!%p288_p2), %vm343_vm2, %v7970_v1  ;;  %s6084_s14 = sshll.u32 (!%p288_p2), %s8027_s10, 1  ;;  %vm6018_vm9 = vcmask (!%p288_p2), 64512  }
   0xd   : > { %s8051_s15 = scalar_select %p323_p3, %s8027_s10, 1  ;;  %353 = vst.msk [vmem:[#allocation2 + $0xd8] sm:$0x1] %vm343_vm2, %v7970_v1  ;;  %354 = vst.msk [vmem:[#allocation2 + $0xf0] sm:$0x1] %vm343_vm2, %v7970_v1 }
   0xe   : > { %355 = vst.msk [vmem:[#allocation2 + $0x108] sm:$0x1] %vm343_vm2, %v7970_v1  ;;  %356 = vst.msk [vmem:[#allocation2 + $0x120] sm:$0x1] %vm343_vm2, %v7970_v1  ;;  %v1057_v57 = vld [vmem:[#allocation2 + $0x1] ss:$2 sm:$0xff] }
   0xf   : > { %357 = vst.msk [vmem:[#allocation2 + $0x138] sm:$0x1] %vm343_vm2, %v7970_v1  ;;  %358 = vst.msk [vmem:[#allocation2 + $0x150] sm:$0x1] %vm343_vm2, %v7970_v1  ;;  %s6469_s16 = sshll.u32 %s8051_s15, 8  ;;  %p329_p4 = scmp.lt.s32.totalorder %s6084_s14, 3 }
  0x10   : > { %359 = vst.msk [vmem:[#allocation2 + $0x168] sm:$0x1] %vm343_vm2, %v7970_v1  ;;  %360 = vst.msk [vmem:[#allocation2 + $0x180] sm:$0x1] %vm343_vm2, %v7970_v1  ;;  %s8127_s19 = scalar_lea.vmem %s9038_s0, %s6469_s16 }
  0x11   : > { %363 = vst.msk [vmem:[#allocation2 + $0x29] sm:$0x1] %vm343_vm2, %v7970_v1  ;;  %364 = vst.msk [vmem:[#allocation2 + $0x41] sm:$0x1] %vm343_vm2, %v7970_v1  ;;  %v446_v3 = vld [vmem:[%s8127_s19] sm:$0xff]  ;;  %v447_v4 = vld [vmem:[%s8127_s19 + $0x8] sm:$0xff] }
  0x12   : > { %365 = vst.msk [vmem:[#allocation2 + $0x59] sm:$0x1] %vm343_vm2, %v7970_v1  ;;  %366 = vst.msk [vmem:[#allocation2 + $0x71] sm:$0x1] %vm343_vm2, %v7970_v1  ;;  %v450_v5 = vld [vmem:[%s8127_s19 + $0x20] sm:$0xff]  ;;  %v451_v6 = vld [vmem:[%s8127_s19 + $0x28] sm:$0xff] }
  0x13   : > { %367 = vst.msk [vmem:[#allocation2 + $0x89] sm:$0x1] %vm343_vm2, %v7970_v1  ;;  %368 = vst.msk [vmem:[#allocation2 + $0xa1] sm:$0x1] %vm343_vm2, %v7970_v1  ;;  %v454_v7 = vld [vmem:[%s8127_s19 + $0x40] sm:$0xff]  ;;  %v455_v8 = vld [vmem:[%s8127_s19 + $0x48] sm:$0xff] }
  0x14   : > { %369 = vst.msk [vmem:[#allocation2 + $0xb9] sm:$0x1] %vm343_vm2, %v7970_v1  ;;  %370 = vst.msk [vmem:[#allocation2 + $0xd1] sm:$0x1] %vm343_vm2, %v7970_v1  ;;  %v458_v9 = vld [vmem:[%s8127_s19 + $0x60] sm:$0xff]  ;;  %v459_v10 = vld [vmem:[%s8127_s19 + $0x68] sm:$0xff] }
  0x15   : > { %371 = vst.msk [vmem:[#allocation2 + $0xe9] sm:$0x1] %vm343_vm2, %v7970_v1  ;;  %372 = vst.msk [vmem:[#allocation2 + $0x101] sm:$0x1] %vm343_vm2, %v7970_v1  ;;  %v462_v11 = vld [vmem:[%s8127_s19 + $0x80] sm:$0xff]  ;;  %v463_v12 = vld [vmem:[%s8127_s19 + $0x88] sm:$0xff] }
  0x16   : > { %373 = vst.msk [vmem:[#allocation2 + $0x119] sm:$0x1] %vm343_vm2, %v7970_v1  ;;  %374 = vst.msk [vmem:[#allocation2 + $0x131] sm:$0x1] %vm343_vm2, %v7970_v1  ;;  %v466_v13 = vld [vmem:[%s8127_s19 + $0xa0] sm:$0xff]  ;;  %v467_v14 = vld [vmem:[%s8127_s19 + $0xa8] sm:$0xff] }
  0x17   : > { %375 = vst.msk [vmem:[#allocation2 + $0x149] sm:$0x1] %vm343_vm2, %v7970_v1  ;;  %376 = vst.msk [vmem:[#allocation2 + $0x161] sm:$0x1] %vm343_vm2, %v7970_v1  ;;  %v470_v15 = vld [vmem:[%s8127_s19 + $0xc0] sm:$0xff]  ;;  %v471_v16 = vld [vmem:[%s8127_s19 + $0xc8] sm:$0xff] }
  0x18   : > { %377 = vst.msk [vmem:[#allocation2 + $0x179] sm:$0x1] %vm343_vm2, %v7970_v1  ;;  %378 = vst.msk [vmem:[#allocation2 + $0x191] sm:$0x1] %vm343_vm2, %v7970_v1  ;;  %v474_v17 = vld [vmem:[%s8127_s19 + $0xe0] sm:$0xff]  ;;  %v475_v18 = vld [vmem:[%s8127_s19 + $0xe8] sm:$0xff] }
  0x19   : > { %344 = vst.msk [vmem:[#allocation2] sm:$0x1] %vm343_vm2, %v7970_v1  ;;  %361 = vst.msk [vmem:[#allocation2 + $0x198] sm:$0x1] %vm343_vm2, %v7970_v1  ;;  %v448_v19 = vld [vmem:[%s8127_s19 + $0x10] sm:$0xff]  ;;  %v449_v20 = vld [vmem:[%s8127_s19 + $0x18] sm:$0xff] }
  0x1a   : > { %479 = vst.msk [vmem:[#allocation2 + $0x19] sm:$0xff] %vm334_vm1, %v446_v3  ;;  %480 = vst.msk [vmem:[#allocation2 + $0x21] sm:$0xff] %vm334_vm1, %v447_v4  ;;  %v452_v21 = vld [vmem:[%s8127_s19 + $0x30] sm:$0xff]  ;;  %v453_v22 = vld [vmem:[%s8127_s19 + $0x38] sm:$0xff]  ;;  %s9049_s14 = smov (!%p329_p4, %s6084_s14), 3 }
  0x1b   : > { %483 = vst.msk [vmem:[#allocation2 + $0x49] sm:$0xff] %vm334_vm1, %v450_v5  ;;  %484 = vst.msk [vmem:[#allocation2 + $0x51] sm:$0xff] %vm334_vm1, %v451_v6  ;;  %v456_v24 = vld [vmem:[%s8127_s19 + $0x50] sm:$0xff]  ;;  %v457_v25 = vld [vmem:[%s8127_s19 + $0x58] sm:$0xff]  ;;  %s6085_s15 = sshll.u32 %s9049_s14, 3 }
  0x1c   : > { %338 = vst.msk [vmem:[#allocation2 + $0x10] sm:$0x3] %vm337_vm3, %v7970_v1  ;;  %342 = vst.msk [vmem:[#allocation2 + $0x1a8] sm:$0x3] %vm337_vm3, %v7970_v1  ;;  %v460_v26 = vld [vmem:[%s8127_s19 + $0x70] sm:$0xff]  ;;  %v461_v28 = vld [vmem:[%s8127_s19 + $0x78] sm:$0xff]  ;;  %s332_s20 = scalar_lea.vmem %s9047_s9, %s6085_s15 }
  0x1d   : > { %487 = vst.msk [vmem:[#allocation2 + $0x79] sm:$0xff] %vm334_vm1, %v454_v7  ;;  %488 = vst.msk [vmem:[#allocation2 + $0x81] sm:$0xff] %vm334_vm1, %v455_v8  ;;  %v464_v29 = vld [vmem:[%s8127_s19 + $0x90] sm:$0xff]  ;;  %v465_v32 = vld [vmem:[%s8127_s19 + $0x98] sm:$0xff] }
  0x1e   : > { %362 = vst.msk [vmem:[#allocation2 + $0x11] sm:$0x1] %vm343_vm2, %v7970_v1  ;;  %379 = vst.msk [vmem:[#allocation2 + $0x1a9] sm:$0x1] %vm343_vm2, %v7970_v1  ;;  %v468_v33 = vld [vmem:[%s8127_s19 + $0xb0] sm:$0xff]  ;;  %v469_v34 = vld [vmem:[%s8127_s19 + $0xb8] sm:$0xff] }
  0x1f   : > { %491 = vst.msk [vmem:[#allocation2 + $0xa9] sm:$0xff] %vm334_vm1, %v458_v9  ;;  %492 = vst.msk [vmem:[#allocation2 + $0xb1] sm:$0xff] %vm334_vm1, %v459_v10  ;;  %v472_v36 = vld [vmem:[%s8127_s19 + $0xd0] sm:$0xff]  ;;  %v473_v38 = vld [vmem:[%s8127_s19 + $0xd8] sm:$0xff] }
  0x20   : > { %495 = vst.msk [vmem:[#allocation2 + $0xd9] sm:$0xff] %vm334_vm1, %v462_v11  ;;  %496 = vst.msk [vmem:[#allocation2 + $0xe1] sm:$0xff] %vm334_vm1, %v463_v12  ;;  %v476_v39 = vld [vmem:[%s8127_s19 + $0xf0] sm:$0xff]  ;;  %v477_v40 = vld [vmem:[%s8127_s19 + $0xf8] sm:$0xff] }
  0x21   : > { %499 = vst.msk [vmem:[#allocation2 + $0x109] sm:$0xff] %vm334_vm1, %v466_v13  ;;  %500 = vst.msk [vmem:[#allocation2 + $0x111] sm:$0xff] %vm334_vm1, %v467_v14  ;;  %v513_v27 = vld [vmem:[#allocation2 + $0x18] ss:$2 sm:$0xff]  ;;  %v1059_v3 = vld [vmem:[#allocation2 + $0x19] ss:$2 sm:$0xff] }
  0x22   : > { %503 = vst.msk [vmem:[#allocation2 + $0x139] sm:$0xff] %vm334_vm1, %v470_v15  ;;  %504 = vst.msk [vmem:[#allocation2 + $0x141] sm:$0xff] %vm334_vm1, %v471_v16  ;;  %6846 = vmatprep.mubr.msk.f32.mxu0 %vm334_vm1, %v513_v27  ;;  %v8187_v30 = vld [vmem:[#allocation2 + $0x48] ss:$2 sm:$0xff]  ;;  %v545_v56 = vld [vmem:[#allocation2 + $0x198] ss:$2 sm:$0xff] }
  0x23   : > { %507 = vst.msk [vmem:[#allocation2 + $0x169] sm:$0xff] %vm334_vm1, %v474_v17  ;;  %508 = vst.msk [vmem:[#allocation2 + $0x171] sm:$0xff] %vm334_vm1, %v475_v18  ;;  %6847 = vmatmul.mubr.msk.f32.vlgmr.msra.gmra.mrb[0].mxu0 %vm334_vm1, %v8187_v30  ;;  %v511_v44 = vld [vmem:[#allocation2] ss:$2 sm:$0xff]  ;;  %v1063_v4 = vld [vmem:[#allocation2 + $0x49] ss:$2 sm:$0xff] }
  0x24   : > { %481 = vst.msk [vmem:[#allocation2 + $0x31] sm:$0xff] %vm334_vm1, %v448_v19  ;;  %482 = vst.msk [vmem:[#allocation2 + $0x39] sm:$0xff] %vm334_vm1, %v449_v20  ;;  %v8189_v31 = vld [vmem:[#allocation2 + $0x78] ss:$2 sm:$0xff]  ;;  %6859 = vmatpush3.msk.msra.mxu0 %vm573_vm0, %v8047_v2  ;;  %v1067_v5 = vld [vmem:[#allocation2 + $0x79] ss:$2 sm:$0xff] }
  0x25   : > { %485 = vst.msk [vmem:[#allocation2 + $0x61] sm:$0xff] %vm334_vm1, %v452_v21  ;;  %486 = vst.msk [vmem:[#allocation2 + $0x69] sm:$0xff] %vm334_vm1, %v453_v22  ;;  %6849 = vmatprep.mubr.msk.f32.mxu0 %vm334_vm1, %v8189_v31  ;;  %6872 = vmatprep.subr.msk.mxu0 %vm573_vm0, %v6105_v23  ;;  %v6155_v6 = vld [vmem:[%s9039_s1 + $0x34] sm:$0xf]  ;;  %v6165_v12 = vld [vmem:[%s9039_s1 + $0x8] sm:$0xf] }
  0x26   : > { %489 = vst.msk [vmem:[#allocation2 + $0x91] sm:$0xff] %vm334_vm1, %v456_v24  ;;  %490 = vst.msk [vmem:[#allocation2 + $0x99] sm:$0xff] %vm334_vm1, %v457_v25  ;;  %v525_v35 = vld [vmem:[#allocation2 + $0xa8] ss:$2 sm:$0xff]  ;;  %v1071_v7 = vld [vmem:[#allocation2 + $0xa9] ss:$2 sm:$0xff] }
  0x27   : > { %493 = vst.msk [vmem:[#allocation2 + $0xc1] sm:$0xff] %vm334_vm1, %v460_v26  ;;  %494 = vst.msk [vmem:[#allocation2 + $0xc9] sm:$0xff] %vm334_vm1, %v461_v28  ;;  %v529_v37 = vld [vmem:[#allocation2 + $0xd8] ss:$2 sm:$0xff]  ;;  %6850 = vmatmul.mubr.msk.f32.gmra.mrb[2].mxu0 %vm334_vm1, %v525_v35  ;;  %v1075_v8 = vld [vmem:[#allocation2 + $0xd9] ss:$2 sm:$0xff] }
  0x28   : > { %497 = vst.msk [vmem:[#allocation2 + $0xf1] sm:$0xff] %vm334_vm1, %v464_v29  ;;  %498 = vst.msk [vmem:[#allocation2 + $0xf9] sm:$0xff] %vm334_vm1, %v465_v32  ;;  %6852 = vmatprep.mubr.msk.f32.mxu0 %vm334_vm1, %v529_v37  ;;  %v533_v41 = vld [vmem:[#allocation2 + $0x108] ss:$2 sm:$0xff]  ;;  %v1079_v9 = vld [vmem:[#allocation2 + $0x109] ss:$2 sm:$0xff] }
  0x29   : > { %501 = vst.msk [vmem:[#allocation2 + $0x121] sm:$0xff] %vm334_vm1, %v468_v33  ;;  %502 = vst.msk [vmem:[#allocation2 + $0x129] sm:$0xff] %vm334_vm1, %v469_v34  ;;  %v537_v42 = vld [vmem:[#allocation2 + $0x138] ss:$2 sm:$0xff]  ;;  %v1083_v10 = vld [vmem:[#allocation2 + $0x139] ss:$2 sm:$0xff] }
  0x2a   : > { %505 = vst.msk [vmem:[#allocation2 + $0x151] sm:$0xff] %vm334_vm1, %v472_v36  ;;  %506 = vst.msk [vmem:[#allocation2 + $0x159] sm:$0xff] %vm334_vm1, %v473_v38  ;;  %v541_v43 = vld [vmem:[#allocation2 + $0x168] ss:$2 sm:$0xff]  ;;  %v1087_v11 = vld [vmem:[#allocation2 + $0x169] ss:$2 sm:$0xff] }
  0x2b   : > { %509 = vst.msk [vmem:[#allocation2 + $0x181] sm:$0xff] %vm334_vm1, %v476_v39  ;;  %510 = vst.msk [vmem:[#allocation2 + $0x189] sm:$0xff] %vm334_vm1, %v477_v40  ;;  %6853 = vmatmul.mubr.msk.f32.gmra.mrb[4].mxu0 %vm334_vm1, %v533_v41  ;;  %v515_v45 = vld [vmem:[#allocation2 + $0x30] ss:$2 sm:$0xff]  ;;  %v1061_v58 = vld [vmem:[#allocation2 + $0x31] ss:$2 sm:$0xff] }
  0x2c   : > { %6855 = vmatprep.mubr.msk.f32.mxu0 %vm334_vm1, %v537_v42  ;;  %v519_v46 = vld [vmem:[#allocation2 + $0x60] ss:$2 sm:$0xff]  ;;  %v1065_v59 = vld [vmem:[#allocation2 + $0x61] ss:$2 sm:$0xff]  ;;  %v6175_v14 = vld [vmem:[%s9039_s1 + $0x18] sm:$0xf] }
  0x2d   : > { %v523_v48 = vld [vmem:[#allocation2 + $0x90] ss:$2 sm:$0xff]  ;;  %v1069_v61 = vld [vmem:[#allocation2 + $0x91] ss:$2 sm:$0xff]  ;;  %381 = vst.msk [vmem:[#allocation3] sm:$0xff] %vm380_vm4, %v7970_v1  ;;  %382 = vst.msk [vmem:[#allocation3 + $0x8] sm:$0xff] %vm380_vm4, %v7970_v1 }
  0x2e   : > { %v527_v49 = vld [vmem:[#allocation2 + $0xc0] ss:$2 sm:$0xff]  ;;  %v1073_v62 = vld [vmem:[#allocation2 + $0xc1] ss:$2 sm:$0xff]  ;;  %386 = vst.msk [vmem:[#allocation3 + $0xd8] sm:$0xff] %vm380_vm4, %v7970_v1  ;;  %387 = vst.msk [vmem:[#allocation3 + $0xe0] sm:$0xff] %vm380_vm4, %v7970_v1 }
  0x2f   : > { %6856 = vmatmul.mubr.msk.f32.gmra.mrb[6].mxu0 %vm334_vm1, %v541_v43  ;;  %v531_v50 = vld [vmem:[#allocation2 + $0xf0] ss:$2 sm:$0xff]  ;;  %v1077_v63 = vld [vmem:[#allocation2 + $0xf1] ss:$2 sm:$0xff]  ;;  %402 = vst.msk [vmem:[#allocation3 + $0x21] sm:$0xff] %vm380_vm4, %v7970_v1  ;;  %404 = vst.msk [vmem:[#allocation3 + $0x39] sm:$0xff] %vm380_vm4, %v7970_v1 }
  0x30   : > { %6860 = vmatprep.mubr.msk.f32.mxu0 %vm334_vm1, %v511_v44  ;;  %v535_v51 = vld [vmem:[#allocation2 + $0x120] ss:$2 sm:$0xff]  ;;  %v1081_v0 = vld [vmem:[#allocation2 + $0x121] ss:$2 sm:$0xff]  ;;  %406 = vst.msk [vmem:[#allocation3 + $0x51] sm:$0xff] %vm380_vm4, %v7970_v1  ;;  %408 = vst.msk [vmem:[#allocation3 + $0x69] sm:$0xff] %vm380_vm4, %v7970_v1 }
  0x31   : > { %v539_v52 = vld [vmem:[#allocation2 + $0x150] ss:$2 sm:$0xff]  ;;  %v1085_v2 = vld [vmem:[#allocation2 + $0x151] ss:$2 sm:$0xff]  ;;  %410 = vst.msk [vmem:[#allocation3 + $0x81] sm:$0xff] %vm380_vm4, %v7970_v1  ;;  %412 = vst.msk [vmem:[#allocation3 + $0x99] sm:$0xff] %vm380_vm4, %v7970_v1 }
  0x32   : > { %v543_v54 = vld [vmem:[#allocation2 + $0x180] ss:$2 sm:$0xff]  ;;  %v1089_v13 = vld [vmem:[#allocation2 + $0x181] ss:$2 sm:$0xff]  ;;  %414 = vst.msk [vmem:[#allocation3 + $0xb1] sm:$0xff] %vm380_vm4, %v7970_v1  ;;  %416 = vst.msk [vmem:[#allocation3 + $0xc9] sm:$0xff] %vm380_vm4, %v7970_v1 }
  0x33   : > { %6861 = vmatmul.mubr.msk.f32.vlgmr.msra.gmra.mrb[0].mxu0 %vm334_vm1, %v515_v45  ;;  %v1091_v15 = vld [vmem:[#allocation2 + $0x199] ss:$2 sm:$0xff]  ;;  %v1619_v16 = vld [vmem:[#allocation2 + $0x2] ss:$2 sm:$0xff]  ;;  %v1623_v17 = vld [vmem:[#allocation2 + $0x32] ss:$2 sm:$0xff] }
  0x34   : > { %6873 = vmatpush3.msk.msra.mxu0 %vm573_vm0, %v6105_v23  ;;  %6863 = vmatprep.mubr.msk.f32.mxu0 %vm334_vm1, %v519_v46  ;;  %420 = vst.msk [vmem:[#allocation4] sm:$0xff] %vm380_vm4, %v7970_v1  ;;  %421 = vst.msk [vmem:[#allocation4 + $0x8] sm:$0xff] %vm380_vm4, %v7970_v1  ;;  %v1627_v18 = vld [vmem:[#allocation2 + $0x62] ss:$2 sm:$0xff]  ;;  %v1631_v20 = vld [vmem:[#allocation2 + $0x92] ss:$2 sm:$0xff] }
  0x35   : > { %6886 = vmatprep.subr.msk.mxu0 %vm573_vm0, %v6115_v47  ;;  %424 = vst.msk [vmem:[#allocation4 + $0x78] sm:$0xff] %vm380_vm4, %v7970_v1  ;;  %425 = vst.msk [vmem:[#allocation4 + $0x80] sm:$0xff] %vm380_vm4, %v7970_v1  ;;  %v6185_v19 = vld [vmem:[%s9039_s1 + $0x28] sm:$0xf]  ;;  %v1639_v22 = vld [vmem:[#allocation2 + $0xf2] ss:$2 sm:$0xff] }
  0x36   : > { %436 = vst.msk [vmem:[#allocation4 + $0x1d] sm:$0xff] %vm380_vm4, %v7970_v1  ;;  %438 = vst.msk [vmem:[#allocation4 + $0x35] sm:$0xff] %vm380_vm4, %v7970_v1  ;;  %v1635_v21 = vld [vmem:[#allocation2 + $0xc2] ss:$2 sm:$0xff]  ;;  %v1647_v24 = vld [vmem:[#allocation2 + $0x152] ss:$2 sm:$0xff] }
  0x37   : > { %6864 = vmatmul.mubr.msk.f32.gmra.mrb[2].mxu0 %vm334_vm1, %v523_v48  ;;  %440 = vst.msk [vmem:[#allocation4 + $0x4d] sm:$0xff] %vm380_vm4, %v7970_v1  ;;  %442 = vst.msk [vmem:[#allocation4 + $0x65] sm:$0xff] %vm380_vm4, %v7970_v1  ;;  %v1643_v23 = vld [vmem:[#allocation2 + $0x122] ss:$2 sm:$0xff]  ;;  %v6195_v28 = vld [vmem:[%s9039_s1 + $0x38] sm:$0xf] }
  0x38   : > { %6866 = vmatprep.mubr.msk.f32.mxu0 %vm334_vm1, %v527_v49  ;;  %433 = vst.msk [vmem:[#allocation4 + $0x5] sm:$0xff] %vm380_vm4, %v7970_v1  ;;  %444 = vst.msk [vmem:[#allocation4 + $0x7d] sm:$0xff] %vm380_vm4, %v7970_v1  ;;  %v1621_v25 = vld [vmem:[#allocation2 + $0x1a] ss:$2 sm:$0xff]  ;;  %v1625_v26 = vld [vmem:[#allocation2 + $0x4a] ss:$2 sm:$0xff] }
  0x39   : > { %v1629_v27 = vld [vmem:[#allocation2 + $0x7a] ss:$2 sm:$0xff]  ;;  %v1633_v29 = vld [vmem:[#allocation2 + $0xaa] ss:$2 sm:$0xff]  ;;  %v2181_v38 = vld [vmem:[#allocation2 + $0x3] ss:$2 sm:$0xff] }
  0x3a   : > { %v1645_v32 = vld [vmem:[#allocation2 + $0x13a] ss:$2 sm:$0xff]  ;;  %v1649_v33 = vld [vmem:[#allocation2 + $0x16a] ss:$2 sm:$0xff]  ;;  %v2185_v39 = vld [vmem:[#allocation2 + $0x33] ss:$2 sm:$0xff] }
  0x3b   : > { %6867 = vmatmul.mubr.msk.f32.gmra.mrb[4].mxu0 %vm334_vm1, %v531_v50  ;;  %v6205_v34 = vld [vmem:[%s9039_s1 + $0xc] sm:$0xf]  ;;  %v6215_v36 = vld [vmem:[%s9039_s1 + $0x1c] sm:$0xf]  ;;  %391 = vst.msk [vmem:[#allocation3 + $0x18] sm:$0x1] %vm389_vm5, %v7970_v1 }
  0x3c   : > { %6869 = vmatprep.mubr.msk.f32.mxu0 %vm334_vm1, %v535_v51  ;;  %v2189_v40 = vld [vmem:[#allocation2 + $0x63] ss:$2 sm:$0xff]  ;;  %v2201_v44 = vld [vmem:[#allocation2 + $0xf3] ss:$2 sm:$0xff]  ;;  %390 = vst.msk [vmem:[#allocation3] sm:$0x1] %vm389_vm5, %v7970_v1 }
  0x3d   : > { %392 = vst.msk [vmem:[#allocation3 + $0x30] sm:$0x1] %vm389_vm5, %v7970_v1  ;;  %393 = vst.msk [vmem:[#allocation3 + $0x48] sm:$0x1] %vm389_vm5, %v7970_v1 }
  0x3e   : > { %394 = vst.msk [vmem:[#allocation3 + $0x60] sm:$0x1] %vm389_vm5, %v7970_v1  ;;  %395 = vst.msk [vmem:[#allocation3 + $0x78] sm:$0x1] %vm389_vm5, %v7970_v1 }
  0x3f   : > { %6870 = vmatmul.mubr.msk.f32.gmra.mrb[6].mxu0 %vm334_vm1, %v539_v52  ;;  %396 = vst.msk [vmem:[#allocation3 + $0x90] sm:$0x1] %vm389_vm5, %v7970_v1  ;;  %397 = vst.msk [vmem:[#allocation3 + $0xa8] sm:$0x1] %vm389_vm5, %v7970_v1 }
  0x40   : > { %6874 = vmatprep.mubr.msk.f32.mxu0 %vm334_vm1, %v515_v45  ;;  %v2205_v45 = vld [vmem:[#allocation2 + $0x123] ss:$2 sm:$0xff]  ;;  %398 = vst.msk [vmem:[#allocation3 + $0xc0] sm:$0x1] %vm389_vm5, %v7970_v1  ;;  %399 = vst.msk [vmem:[#allocation3 + $0xd8] sm:$0x1] %vm389_vm5, %v7970_v1 }
  0x41   : > { %403 = vst.msk [vmem:[#allocation3 + $0x29] sm:$0x1] %vm389_vm5, %v7970_v1  ;;  %405 = vst.msk [vmem:[#allocation3 + $0x41] sm:$0x1] %vm389_vm5, %v7970_v1 }
  0x42   : > { %407 = vst.msk [vmem:[#allocation3 + $0x59] sm:$0x1] %vm389_vm5, %v7970_v1  ;;  %409 = vst.msk [vmem:[#allocation3 + $0x71] sm:$0x1] %vm389_vm5, %v7970_v1 }
  0x43   : > { %6875 = vmatmul.mubr.msk.f32.vlgmr.msra.gmra.mrb[0].mxu0 %vm334_vm1, %v519_v46  ;;  %v2209_v46 = vld [vmem:[#allocation2 + $0x153] ss:$2 sm:$0xff]  ;;  %411 = vst.msk [vmem:[#allocation3 + $0x89] sm:$0x1] %vm389_vm5, %v7970_v1  ;;  %413 = vst.msk [vmem:[#allocation3 + $0xa1] sm:$0x1] %vm389_vm5, %v7970_v1 }
  0x44   : > { %6887 = vmatpush3.msk.msra.mxu0 %vm573_vm0, %v6115_v47  ;;  %6877 = vmatprep.mubr.msk.f32.mxu0 %vm334_vm1, %v523_v48  ;;  %v2183_v47 = vld [vmem:[#allocation2 + $0x1b] ss:$2 sm:$0xff]  ;;  %v2187_v48 = vld [vmem:[#allocation2 + $0x4b] ss:$2 sm:$0xff]  ;;  %415 = vst.msk [vmem:[#allocation3 + $0xb9] sm:$0x1] %vm389_vm5, %v7970_v1 }
  0x45   : > { %6900 = vmatprep.subr.msk.mxu0 %vm573_vm0, %v6125_v53  ;;  %417 = vst.msk [vmem:[#allocation3 + $0xd1] sm:$0x1] %vm389_vm5, %v7970_v1  ;;  %427 = vst.msk [vmem:[#allocation4] sm:$0x1] %vm389_vm5, %v7970_v1 }
  0x46   : > { %428 = vst.msk [vmem:[#allocation4 + $0x18] sm:$0x1] %vm389_vm5, %v7970_v1  ;;  %429 = vst.msk [vmem:[#allocation4 + $0x30] sm:$0x1] %vm389_vm5, %v7970_v1 }
  0x47   : > { %6878 = vmatmul.mubr.msk.f32.gmra.mrb[2].mxu0 %vm334_vm1, %v527_v49  ;;  %v2191_v49 = vld [vmem:[#allocation2 + $0x7b] ss:$2 sm:$0xff]  ;;  %430 = vst.msk [vmem:[#allocation4 + $0x48] sm:$0x1] %vm389_vm5, %v7970_v1  ;;  %431 = vst.msk [vmem:[#allocation4 + $0x60] sm:$0x1] %vm389_vm5, %v7970_v1 }
  0x48   : > { %6880 = vmatprep.mubr.msk.f32.mxu0 %vm334_vm1, %v531_v50  ;;  %v6235_v50 = vld [vmem:[%s9039_s1 + $0x3c] sm:$0xf]  ;;  %432 = vst.msk [vmem:[#allocation4 + $0x78] sm:$0x1] %vm389_vm5, %v7970_v1 }
  0x49   : > { %384 = vst.msk [vmem:[#allocation3 + $0x10] sm:$0x3] %vm383_vm6, %v7970_v1  ;;  %388 = vst.msk [vmem:[#allocation3 + $0xe8] sm:$0x3] %vm383_vm6, %v7970_v1 }
  0x4a   : > { %422 = vst.msk [vmem:[#allocation4 + $0x10] sm:$0x3] %vm383_vm6, %v7970_v1  ;;  %426 = vst.msk [vmem:[#allocation4 + $0x88] sm:$0x3] %vm383_vm6, %v7970_v1 }
  0x4b   : > { %6881 = vmatmul.mubr.msk.f32.gmra.mrb[4].mxu0 %vm334_vm1, %v535_v51  ;;  %v2195_v51 = vld [vmem:[#allocation2 + $0xab] ss:$2 sm:$0xff]  ;;  %400 = vst.msk [vmem:[#allocation3 + $0x9] sm:$0xff] %vm380_vm4, %v7970_v1  ;;  %418 = vst.msk [vmem:[#allocation3 + $0xe1] sm:$0xff] %vm380_vm4, %v7970_v1 }
  0x4c   : > { %6883 = vmatprep.mubr.msk.f32.mxu0 %vm334_vm1, %v539_v52  ;;  %v2199_v52 = vld [vmem:[#allocation2 + $0xdb] ss:$2 sm:$0xff]  ;;  %401 = vst.msk [vmem:[#allocation3 + $0x11] sm:$0x1] %vm389_vm5, %v7970_v1  ;;  %419 = vst.msk [vmem:[#allocation3 + $0xe9] sm:$0x1] %vm389_vm5, %v7970_v1 }
  0x4d   : > { %437 = vst.msk [vmem:[#allocation4 + $0x25] sm:$0x1f] %vm434_vm7, %v7970_v1  ;;  %435 = vst.msk [vmem:[#allocation4 + $0xd] sm:$0x1f] %vm434_vm7, %v7970_v1 }
  0x4e   : > { %439 = vst.msk [vmem:[#allocation4 + $0x3d] sm:$0x1f] %vm434_vm7, %v7970_v1  ;;  %441 = vst.msk [vmem:[#allocation4 + $0x55] sm:$0x1f] %vm434_vm7, %v7970_v1 }
  0x4f   : > { %6884 = vmatmul.mubr.msk.f32.gmra.mrb[6].mxu0 %vm334_vm1, %v543_v54  ;;  %v2207_v54 = vld [vmem:[#allocation2 + $0x13b] ss:$2 sm:$0xff]  ;;  %443 = vst.msk [vmem:[#allocation4 + $0x6d] sm:$0x1f] %vm434_vm7, %v7970_v1  ;;  %445 = vst.msk [vmem:[#allocation4 + $0x85] sm:$0x1f] %vm434_vm7, %v7970_v1 }
  0x50   : > { %6888 = vmatprep.mubr.msk.f32.mxu0 %vm334_vm1, %v8187_v30  ;;  %v1637_v30 = vld [vmem:[#allocation2 + $0xda] ss:$2 sm:$0xff] }
  0x51   : > { %v4500_v1 = vld [vmem:[%s9043_s5] sm:$0xff] }
  0x53   : > { %6889 = vmatmul.mubr.msk.f32.vlgmr.msra.gmra.mrb[0].mxu0 %vm334_vm1, %v8189_v31  ;;  %v1641_v31 = vld [vmem:[#allocation2 + $0x10a] ss:$2 sm:$0xff] }
  0x54   : > { %6901 = vmatpush3.msk.msra.mxu0 %vm573_vm0, %v6125_v53  ;;  %6891 = vmatprep.mubr.msk.f32.mxu0 %vm334_vm1, %v525_v35  ;;  %v1651_v35 = vld [vmem:[#allocation2 + $0x182] ss:$2 sm:$0xff]  ;;  %v2203_v53 = vld [vmem:[#allocation2 + $0x10b] ss:$2 sm:$0xff] }
  0x55   : > { %6914 = vmatprep.subr.msk.mxu0 %vm573_vm0, %v6135_v55 }
  0x57   : > { %6892 = vmatmul.mubr.msk.f32.gmra.mrb[2].mxu0 %vm334_vm1, %v529_v37  ;;  %v1653_v37 = vld [vmem:[#allocation2 + $0x19a] ss:$2 sm:$0xff] }
  0x58   : > { %6894 = vmatprep.mubr.msk.f32.mxu0 %vm334_vm1, %v533_v41  ;;  %v6225_v41 = vld [vmem:[%s9039_s1 + $0x2c] sm:$0xf] }
  0x5b   : > { %6895 = vmatmul.mubr.msk.f32.gmra.mrb[4].mxu0 %vm334_vm1, %v537_v42  ;;  %v2193_v42 = vld [vmem:[#allocation2 + $0x93] ss:$2 sm:$0xff] }
  0x5c   : > { %6897 = vmatprep.mubr.msk.f32.mxu0 %vm334_vm1, %v541_v43  ;;  %v2197_v43 = vld [vmem:[#allocation2 + $0xc3] ss:$2 sm:$0xff] }
  0x5f   : > { %6898 = vmatmul.mubr.msk.f32.gmra.mrb[6].mxu0 %vm334_vm1, %v545_v56  ;;  %v2213_v56 = vld [vmem:[#allocation2 + $0x183] ss:$2 sm:$0xff] }
  0x60   : > { %6902 = vmatprep.mubr.msk.f32.mxu0 %vm334_vm1, %v1057_v57  ;;  %v2215_v57 = vld [vmem:[#allocation2 + $0x19b] ss:$2 sm:$0xff] }
  0x63   : > { %6903 = vmatmul.mubr.msk.f32.vlgmr.msra.gmra.mrb[0].mxu0 %vm334_vm1, %v1061_v58 }
  0x64   : > { %6915 = vmatpush3.msk.msra.mxu0 %vm573_vm0, %v6135_v55  ;;  %6905 = vmatprep.mubr.msk.f32.mxu0 %vm334_vm1, %v1065_v59  ;;  %v2211_v55 = vld [vmem:[#allocation2 + $0x16b] ss:$2 sm:$0xff] }
  0x65   : > { %6928 = vmatprep.subr.msk.mxu0 %vm573_vm0, %v6145_v60 }
  0x67   : > { %6906 = vmatmul.mubr.msk.f32.gmra.mrb[2].mxu0 %vm334_vm1, %v1069_v61 }
  0x68   : > { %6908 = vmatprep.mubr.msk.f32.mxu0 %vm334_vm1, %v1073_v62 }
  0x6b   : > { %6909 = vmatmul.mubr.msk.f32.gmra.mrb[4].mxu0 %vm334_vm1, %v1077_v63 }
  0x6c   : > { %6911 = vmatprep.mubr.msk.f32.mxu0 %vm334_vm1, %v1081_v0 }
  0x6f   : > { %6912 = vmatmul.mubr.msk.f32.gmra.mrb[6].mxu0 %vm334_vm1, %v1085_v2 }
  0x70   : > { %6916 = vmatprep.mubr.msk.f32.mxu0 %vm334_vm1, %v1059_v3 }
  0x73   : > { %6917 = vmatmul.mubr.msk.f32.vlgmr.msra.gmra.mrb[0].mxu0 %vm334_vm1, %v1063_v4 }
  0x74   : > { %6929 = vmatpush3.msk.msra.mxu0 %vm573_vm0, %v6145_v60  ;;  %6919 = vmatprep.mubr.msk.f32.mxu0 %vm334_vm1, %v1067_v5 }
  0x75   : > { %6942 = vmatprep.subr.msk.mxu0 %vm573_vm0, %v6155_v6 }
  0x77   : > { %6920 = vmatmul.mubr.msk.f32.gmra.mrb[2].mxu0 %vm334_vm1, %v1071_v7 }
  0x78   : > { %6922 = vmatprep.mubr.msk.f32.mxu0 %vm334_vm1, %v1075_v8 }
  0x7b   : > { %6923 = vmatmul.mubr.msk.f32.gmra.mrb[4].mxu0 %vm334_vm1, %v1079_v9 }
  0x7c   : > { %6925 = vmatprep.mubr.msk.f32.mxu0 %vm334_vm1, %v1083_v10 }
  0x7f   : > { %6926 = vmatmul.mubr.msk.f32.gmra.mrb[6].mxu0 %vm334_vm1, %v1087_v11 }
  0x80   : > { %6930 = vmatprep.mubr.msk.f32.mxu0 %vm334_vm1, %v1061_v58  ;;  %v6246_v58 = vld [vmem:[%s9041_s3 + $0x80] sm:$0xff] }
  0x83   : > { %6931 = vmatmul.mubr.msk.f32.vlgmr.msra.gmra.mrb[0].mxu0 %vm334_vm1, %v1065_v59  ;;  %v6247_v59 = vld [vmem:[%s9041_s3 + $0x88] sm:$0xff] }
  0x84   : > { %6943 = vmatpush3.msk.msra.mxu0 %vm573_vm0, %v6155_v6  ;;  %6933 = vmatprep.mubr.msk.f32.mxu0 %vm334_vm1, %v1069_v61  ;;  %v7479_v60 = vpack.c.bf16 %v6247_v59, %v6246_v58  ;;  %v6248_v61 = vld [vmem:[%s9041_s3 + $0x90] sm:$0xff]  ;;  %v6282_v59 = vld [vmem:[%s9041_s3 + $0xa0] sm:$0xff] }
  0x85   : > { %6956 = vmatprep.subr.msk.mxu0 %vm573_vm0, %v6165_v12 }
  0x86   : > { %7480 = vmatprep.subr.bf16.mxu1 %v7479_v60 }
  0x87   : > { %6934 = vmatmul.mubr.msk.f32.gmra.mrb[2].mxu0 %vm334_vm1, %v1073_v62  ;;  %7482 = vmatpush3.bf16.msra.mxu1 %v7479_v60  ;;  %v6249_v62 = vld [vmem:[%s9041_s3 + $0x98] sm:$0xff]  ;;  %v6283_v60 = vld [vmem:[%s9041_s3 + $0xa8] sm:$0xff] }
  0x88   : > { %6936 = vmatprep.mubr.msk.f32.mxu0 %vm334_vm1, %v1077_v63  ;;  %v7483_v63 = vpack.c.bf16 %v6249_v62, %v6248_v61  ;;  %v2792_v61 = vld [vmem:[#allocation3 + $0xd8] ss:$2 sm:$0xff]  ;;  %v3191_v62 = vld [vmem:[#allocation3 + $0x1] ss:$2 sm:$0xff] }
  0x8a   : > { %7484 = vmatprep.subr.bf16.mxu1 %v7483_v63 }
  0x8b   : > { %6937 = vmatmul.mubr.msk.f32.gmra.mrb[4].mxu0 %vm334_vm1, %v1081_v0  ;;  %7486 = vmatpush3.bf16.msra.mxu1 %v7483_v63  ;;  %v2793_v0 = vld [vmem:[%s9041_s3] sm:$0xff]  ;;  %v7519_v63 = vpack.c.bf16 %v6283_v60, %v6282_v59 }
  0x8c   : > { %6939 = vmatprep.mubr.msk.f32.mxu0 %vm334_vm1, %v1085_v2  ;;  %v2794_v2 = vld [vmem:[%s9041_s3 + $0x8] sm:$0xff] }
  0x8d   : > { %v7487_v3 = vpack.c.bf16 %v2794_v2, %v2793_v0  ;;  %v6284_v0 = vld [vmem:[%s9041_s3 + $0xb0] sm:$0xff]  ;;  %v6285_v2 = vld [vmem:[%s9041_s3 + $0xb8] sm:$0xff] }
  0x8f   : > { %6940 = vmatmul.mubr.msk.f32.gmra.mrb[6].mxu0 %vm334_vm1, %v1089_v13  ;;  %7488 = vmatprep.subr.bf16.mxu1 %v7487_v3 }
  0x90   : > { %6944 = vmatprep.mubr.msk.f32.mxu0 %vm334_vm1, %v1063_v4  ;;  %v6245_v4 = vld [vmem:[%s9040_s2] ss:$0 sm:$0xff] }
  0x93   : > { %6945 = vmatmul.mubr.msk.f32.vlgmr.msra.gmra.mrb[0].mxu0 %vm334_vm1, %v1067_v5 }
  0x94   : > { %6957 = vmatpush3.msk.msra.mxu0 %vm573_vm0, %v6165_v12  ;;  %6947 = vmatprep.mubr.msk.f32.mxu0 %vm334_vm1, %v1071_v7 }
  0x95   : > { %6970 = vmatprep.subr.msk.mxu0 %vm573_vm0, %v6175_v14 }
  0x97   : > { %6948 = vmatmul.mubr.msk.f32.gmra.mrb[2].mxu0 %vm334_vm1, %v1075_v8 }
  0x98   : > { %6950 = vmatprep.mubr.msk.f32.mxu0 %vm334_vm1, %v1079_v9 }
  0x9b   : > { %6951 = vmatmul.mubr.msk.f32.gmra.mrb[4].mxu0 %vm334_vm1, %v1083_v10 }
  0x9c   : > { %6953 = vmatprep.mubr.msk.f32.mxu0 %vm334_vm1, %v1087_v11 }
  0x9f   : > { %6954 = vmatmul.mubr.msk.f32.gmra.mrb[6].mxu0 %vm334_vm1, %v1091_v15 }
  0xa0   : > { %6958 = vmatprep.mubr.msk.f32.mxu0 %vm334_vm1, %v1619_v16 }
  0xa3   : > { %6959 = vmatmul.mubr.msk.f32.vlgmr.msra.gmra.mrb[0].mxu0 %vm334_vm1, %v1623_v17 }
  0xa4   : > { %6971 = vmatpush3.msk.msra.mxu0 %vm573_vm0, %v6175_v14  ;;  %6961 = vmatprep.mubr.msk.f32.mxu0 %vm334_vm1, %v1627_v18 }
  0xa5   : > { %6984 = vmatprep.subr.msk.mxu0 %vm573_vm0, %v6185_v19 }
  0xa7   : > { %6962 = vmatmul.mubr.msk.f32.gmra.mrb[2].mxu0 %vm334_vm1, %v1631_v20 }
  0xa8   : > { %6964 = vmatprep.mubr.msk.f32.mxu0 %vm334_vm1, %v1635_v21 }
  0xab   : > { %6965 = vmatmul.mubr.msk.f32.gmra.mrb[4].mxu0 %vm334_vm1, %v1639_v22 }
  0xac   : > { %6967 = vmatprep.mubr.msk.f32.mxu0 %vm334_vm1, %v1643_v23 }
  0xaf   : > { %6968 = vmatmul.mubr.msk.f32.gmra.mrb[6].mxu0 %vm334_vm1, %v1647_v24 }
  0xb0   : > { %6972 = vmatprep.mubr.msk.f32.mxu0 %vm334_vm1, %v1621_v25 }
  0xb3   : > { %6973 = vmatmul.mubr.msk.f32.vlgmr.msra.gmra.mrb[0].mxu0 %vm334_vm1, %v1625_v26 }
  0xb4   : > { %6985 = vmatpush3.msk.msra.mxu0 %vm573_vm0, %v6185_v19  ;;  %6975 = vmatprep.mubr.msk.f32.mxu0 %vm334_vm1, %v1629_v27 }
  0xb5   : > { %6998 = vmatprep.subr.msk.mxu0 %vm573_vm0, %v6195_v28 }
  0xb7   : > { %6976 = vmatmul.mubr.msk.f32.gmra.mrb[2].mxu0 %vm334_vm1, %v1633_v29 }
  0xb8   : > { %6978 = vmatprep.mubr.msk.f32.mxu0 %vm334_vm1, %v1637_v30 }
  0xbb   : > { %6979 = vmatmul.mubr.msk.f32.gmra.mrb[4].mxu0 %vm334_vm1, %v1641_v31 }
  0xbc   : > { %6981 = vmatprep.mubr.msk.f32.mxu0 %vm334_vm1, %v1645_v32 }
  0xbf   : > { %6982 = vmatmul.mubr.msk.f32.gmra.mrb[6].mxu0 %vm334_vm1, %v1649_v33 }
  0xc0   : > { %6986 = vmatprep.mubr.msk.f32.mxu0 %vm334_vm1, %v1623_v17 }
  0xc3   : > { %6987 = vmatmul.mubr.msk.f32.vlgmr.msra.gmra.mrb[0].mxu0 %vm334_vm1, %v1627_v18 }
  0xc4   : > { %6999 = vmatpush3.msk.msra.mxu0 %vm573_vm0, %v6195_v28  ;;  %6989 = vmatprep.mubr.msk.f32.mxu0 %vm334_vm1, %v1631_v20  ;;  %v2796_v28 = vld [vmem:[%s9041_s3 + $0x18] sm:$0xff] }
  0xc5   : > { %7012 = vmatprep.subr.msk.mxu0 %vm573_vm0, %v6205_v34 }
  0xc7   : > { %6990 = vmatmul.mubr.msk.f32.gmra.mrb[2].mxu0 %vm334_vm1, %v1635_v21 }
  0xc8   : > { %6992 = vmatprep.mubr.msk.f32.mxu0 %vm334_vm1, %v1639_v22 }
  0xcb   : > { %6993 = vmatmul.mubr.msk.f32.gmra.mrb[4].mxu0 %vm334_vm1, %v1643_v23 }
  0xcc   : > { %6995 = vmatprep.mubr.msk.f32.mxu0 %vm334_vm1, %v1647_v24 }
  0xcf   : > { %6996 = vmatmul.mubr.msk.f32.gmra.mrb[6].mxu0 %vm334_vm1, %v1651_v35  ;;  %v6259_v35 = vld [vmem:[%s9041_s3 + $0x108] sm:$0xff] }
  0xd0   : > { %7000 = vmatprep.mubr.msk.f32.mxu0 %vm334_vm1, %v1625_v26 }
  0xd3   : > { %7001 = vmatmul.mubr.msk.f32.vlgmr.msra.gmra.mrb[0].mxu0 %vm334_vm1, %v1629_v27  ;;  %v2795_v27 = vld [vmem:[%s9041_s3 + $0x10] sm:$0xff] }
  0xd4   : > { %7013 = vmatpush3.msk.msra.mxu0 %vm573_vm0, %v6205_v34  ;;  %7003 = vmatprep.mubr.msk.f32.mxu0 %vm334_vm1, %v1633_v29  ;;  %v6258_v34 = vld [vmem:[%s9041_s3 + $0x100] sm:$0xff] }
  0xd5   : > { %7026 = vmatprep.subr.msk.mxu0 %vm573_vm0, %v6215_v36 }
  0xd7   : > { %7004 = vmatmul.mubr.msk.f32.gmra.mrb[2].mxu0 %vm334_vm1, %v1637_v30 }
  0xd8   : > { %7006 = vmatprep.mubr.msk.f32.mxu0 %vm334_vm1, %v1641_v31 }
  0xdb   : > { %7007 = vmatmul.mubr.msk.f32.gmra.mrb[4].mxu0 %vm334_vm1, %v1645_v32  ;;  %v7491_v32 = vpack.c.bf16 %v2796_v28, %v2795_v27  ;;  %v6308_v27 = vld [vmem:[%s9041_s3 + $0x50] sm:$0xff]  ;;  %v6309_v28 = vld [vmem:[%s9041_s3 + $0x58] sm:$0xff] }
  0xdc   : > { %7009 = vmatprep.mubr.msk.f32.mxu0 %vm334_vm1, %v1649_v33 }
  0xdf   : > { %7010 = vmatmul.mubr.msk.f32.gmra.mrb[6].mxu0 %vm334_vm1, %v1653_v37 }
  0xe0   : > { %7014 = vmatprep.mubr.msk.f32.mxu0 %vm334_vm1, %v2181_v38  ;;  %v2774_v38 = vld [vmem:[#allocation3] ss:$2 sm:$0xff] }
  0xe3   : > { %7015 = vmatmul.mubr.msk.f32.vlgmr.msra.gmra.mrb[0].mxu0 %vm334_vm1, %v2185_v39 }
  0xe4   : > { %7027 = vmatpush3.msk.msra.mxu0 %vm573_vm0, %v6215_v36  ;;  %7017 = vmatprep.mubr.msk.f32.mxu0 %vm334_vm1, %v2189_v40  ;;  %v7495_v36 = vpack.c.bf16 %v6259_v35, %v6258_v34  ;;  %v6316_v35 = vld [vmem:[%s9041_s3 + $0xd0] sm:$0xff] }
  0xe5   : > { %7040 = vmatprep.subr.msk.mxu0 %vm573_vm0, %v6225_v41 }
  0xe7   : > { %7018 = vmatmul.mubr.msk.f32.gmra.mrb[2].mxu0 %vm334_vm1, %v2193_v42 }
  0xe8   : > { %7020 = vmatprep.mubr.msk.f32.mxu0 %vm334_vm1, %v2197_v43 }
  0xeb   : > { %7021 = vmatmul.mubr.msk.f32.gmra.mrb[4].mxu0 %vm334_vm1, %v2201_v44 }
  0xec   : > { %7023 = vmatprep.mubr.msk.f32.mxu0 %vm334_vm1, %v2205_v45 }
  0xef   : > { %7024 = vmatmul.mubr.msk.f32.gmra.mrb[6].mxu0 %vm334_vm1, %v2209_v46 }
  0xf0   : > { %7028 = vmatprep.mubr.msk.f32.mxu0 %vm334_vm1, %v2183_v47 }
  0xf3   : > { %7029 = vmatmul.mubr.msk.f32.vlgmr.msra.gmra.mrb[0].mxu0 %vm334_vm1, %v2187_v48 }
  0xf4   : > { %7041 = vmatpush3.msk.msra.mxu0 %vm573_vm0, %v6225_v41  ;;  %7031 = vmatprep.mubr.msk.f32.mxu0 %vm334_vm1, %v2191_v49  ;;  %v6261_v41 = vld [vmem:[%s9041_s3 + $0x118] sm:$0xff] }
  0xf5   : > { %7054 = vmatprep.subr.msk.mxu0 %vm573_vm0, %v6235_v50 }
  0xf7   : > { %7032 = vmatmul.mubr.msk.f32.gmra.mrb[2].mxu0 %vm334_vm1, %v2195_v51 }
  0xf8   : > { %7034 = vmatprep.mubr.msk.f32.mxu0 %vm334_vm1, %v2199_v52 }
  0xfb   : > { %7035 = vmatmul.mubr.msk.f32.gmra.mrb[4].mxu0 %vm334_vm1, %v2203_v53 }
  0xfc   : > { %7037 = vmatprep.mubr.msk.f32.mxu0 %vm334_vm1, %v2207_v54 }
  0xff   : > { %7038 = vmatmul.mubr.msk.f32.gmra.mrb[6].mxu0 %vm334_vm1, %v2211_v55 }
 0x100   : > { %7042 = vmatprep.mubr.msk.f32.mxu0 %vm334_vm1, %v2185_v39 }
 0x103   : > { %7043 = vmatmul.mubr.msk.f32.vlgmr.msra.gmra.mrb[0].mxu0 %vm334_vm1, %v2189_v40  ;;  %v6260_v40 = vld [vmem:[%s9041_s3 + $0x110] sm:$0xff] }
 0x104   : > { %7055 = vmatpush3.msk.msra.mxu0 %vm573_vm0, %v6235_v50  ;;  %7045 = vmatprep.mubr.msk.f32.mxu0 %vm334_vm1, %v2193_v42  ;;  %v7499_v42 = vpack.c.bf16 %v6261_v41, %v6260_v40  ;;  %v6269_v50 = vld [vmem:[%s9041_s3 + $0x198] sm:$0xff]  ;;  %v6323_v40 = vld [vmem:[%s9041_s3 + $0x148] sm:$0xff] }
 0x107   : > { %7046 = vmatmul.mubr.msk.f32.gmra.mrb[2].mxu0 %vm334_vm1, %v2197_v43 }
 0x108   : > { %7048 = vmatprep.mubr.msk.f32.mxu0 %vm334_vm1, %v2201_v44  ;;  %v6266_v44 = vld [vmem:[%s9041_s3 + $0x180] sm:$0xff] }
 0x10b   : > { %7049 = vmatmul.mubr.msk.f32.gmra.mrb[4].mxu0 %vm334_vm1, %v2205_v45  ;;  %v6267_v45 = vld [vmem:[%s9041_s3 + $0x188] sm:$0xff] }
 0x10c   : > { %7051 = vmatprep.mubr.msk.f32.mxu0 %vm334_vm1, %v2209_v46  ;;  %v7503_v47 = vpack.c.bf16 %v6267_v45, %v6266_v44  ;;  %v6324_v44 = vld [vmem:[%s9041_s3 + $0x150] sm:$0xff]  ;;  %v6325_v45 = vld [vmem:[%s9041_s3 + $0x158] sm:$0xff] }
 0x10f   : > { %7052 = vmatmul.mubr.msk.f32.gmra.mrb[6].mxu0 %vm334_vm1, %v2213_v56  ;;  %v6276_v56 = vld [vmem:[%s9041_s3 + $0x30] sm:$0xff] }
 0x110   : > { %7056 = vmatprep.mubr.msk.f32.mxu0 %vm334_vm1, %v2187_v48 }
 0x113   : > { %7057 = vmatmul.mubr.msk.f32.vlgmr.msra.gmra.mrb[0].mxu0 %vm334_vm1, %v2191_v49  ;;  %v6268_v49 = vld [vmem:[%s9041_s3 + $0x190] sm:$0xff] }
 0x114   : > { %7059 = vmatprep.mubr.msk.f32.mxu0 %vm334_vm1, %v2195_v51  ;;  %v7507_v51 = vpack.c.bf16 %v6269_v50, %v6268_v49  ;;  %v6330_v49 = vld [vmem:[%s9041_s3 + $0x1c0] sm:$0xff]  ;;  %v6331_v50 = vld [vmem:[%s9041_s3 + $0x1c8] sm:$0xff] }
 0x117   : > { %7060 = vmatmul.mubr.msk.f32.gmra.mrb[2].mxu0 %vm334_vm1, %v2199_v52  ;;  %v6274_v52 = vld [vmem:[%s9041_s3 + $0x20] sm:$0xff] }
 0x118   : > { %7062 = vmatprep.mubr.msk.f32.mxu0 %vm334_vm1, %v2203_v53  ;;  %v6275_v53 = vld [vmem:[%s9041_s3 + $0x28] sm:$0xff] }
 0x11b   : > { %7063 = vmatmul.mubr.msk.f32.gmra.mrb[4].mxu0 %vm334_vm1, %v2207_v54  ;;  %v7511_v54 = vpack.c.bf16 %v6275_v53, %v6274_v52  ;;  %v7567_v52 = vpack.c.bf16 %v6331_v50, %v6330_v49 }
 0x11c   : > { %7065 = vmatprep.mubr.msk.f32.mxu0 %vm334_vm1, %v2211_v55 }
 0x11f   : > { %7066 = vmatmul.mubr.msk.f32.gmra.mrb[6].mxu0 %vm334_vm1, %v2215_v57  ;;  %v6277_v57 = vld [vmem:[%s9041_s3 + $0x38] sm:$0xff] }
 0x120   : > { %v7515_v58 = vpack.c.bf16 %v6277_v57, %v6276_v56  ;;  %v6338_v57 = vld [vmem:[%s9041_s3 + $0x60] sm:$0xff] }
 0x1e6   : > { %v7058_v5 = vpop.f32.mrb[0].mxu0 }
 0x1e7   : > { %v2750_v6 = vadd.f32 %v7058_v5, %v6245_v4  ;;  %v2695_v7 = vpop.f32.mrb[1].mxu0  ;;  %v6290_v5 = vld [vmem:[%s9041_s3 + $0x120] sm:$0xff] }
 0x1e8   : > { %v2749_v8 = vadd.f32 %v6245_v4, %v2695_v7 }
 0x1e9   : > { %v2758_v9 = vmax.f32 %v2750_v6, 0.0  ;;  %v6291_v6 = vld [vmem:[%s9041_s3 + $0x128] sm:$0xff] }
 0x1ea   : > { %v2757_v10 = vmax.f32 %v2749_v8, 0.0  ;;  %v7061_v11 = vpop.f32.mrb[2].mxu0  ;;  %v7527_v8 = vpack.c.bf16 %v6291_v6, %v6290_v5  ;;  %v6348_v6 = vld [vmem:[%s9041_s3 + $0xf0] sm:$0xff] }
 0x1eb   : > { %2767 = vst.msk [vmem:[#allocation3 + $0x31] sm:$0xff] %vm380_vm4, %v2758_v9  ;;  %v2752_v12 = vadd.f32 %v7061_v11, %v6245_v4  ;;  %v2705_v13 = vpop.f32.mrb[3].mxu0  ;;  %v6293_v11 = vld [vmem:[%s9041_s3 + $0x138] sm:$0xff] }
 0x1ec   : > { %2766 = vst.msk [vmem:[#allocation3 + $0x19] sm:$0xff] %vm380_vm4, %v2757_v10  ;;  %v2751_v14 = vadd.f32 %v6245_v4, %v2705_v13  ;;  %v6292_v10 = vld [vmem:[%s9041_s3 + $0x130] sm:$0xff] }
 0x1ed   : > { %v2760_v15 = vmax.f32 %v2752_v12, 0.0  ;;  %v7531_v13 = vpack.c.bf16 %v6293_v11, %v6292_v10  ;;  %v6354_v10 = vld [vmem:[%s9041_s3 + $0x160] sm:$0xff]  ;;  %v6355_v11 = vld [vmem:[%s9041_s3 + $0x168] sm:$0xff] }
 0x1ee   : > { %v2759_v16 = vmax.f32 %v2751_v14, 0.0  ;;  %v7064_v17 = vpop.f32.mrb[4].mxu0 }
 0x1ef   : > { %2769 = vst.msk [vmem:[#allocation3 + $0x61] sm:$0xff] %vm380_vm4, %v2760_v15  ;;  %v2754_v18 = vadd.f32 %v7064_v17, %v6245_v4  ;;  %v2715_v19 = vpop.f32.mrb[5].mxu0  ;;  %v6298_v15 = vld [vmem:[%s9041_s3 + $0x1a0] sm:$0xff] }
 0x1f0   : > { %2768 = vst.msk [vmem:[#allocation3 + $0x49] sm:$0xff] %vm380_vm4, %v2759_v16  ;;  %v2753_v20 = vadd.f32 %v6245_v4, %v2715_v19  ;;  %v6299_v16 = vld [vmem:[%s9041_s3 + $0x1a8] sm:$0xff] }
 0x1f1   : > { %v2762_v21 = vmax.f32 %v2754_v18, 0.0  ;;  %v7535_v18 = vpack.c.bf16 %v6299_v16, %v6298_v15  ;;  %v6356_v15 = vld [vmem:[%s9041_s3 + $0x170] sm:$0xff]  ;;  %v6357_v16 = vld [vmem:[%s9041_s3 + $0x178] sm:$0xff] }
 0x1f2   : > { %v2761_v22 = vmax.f32 %v2753_v20, 0.0  ;;  %v7067_v23 = vpop.f32.mrb[6].mxu0  ;;  %v2778_v43 = vld [vmem:[#allocation3 + $0x30] ss:$2 sm:$0xff]  ;;  %v6300_v20 = vld [vmem:[%s9041_s3 + $0x1b0] sm:$0xff] }
 0x1f3   : > { %2771 = vst.msk [vmem:[#allocation3 + $0x91] sm:$0xff] %vm380_vm4, %v2762_v21  ;;  %v2756_v24 = vadd.f32 %v7067_v23, %v6245_v4  ;;  %v2725_v25 = vpop.f32.mrb[7].mxu0  ;;  %v2776_v26 = vld [vmem:[#allocation3 + $0x18] ss:$2 sm:$0xff]  ;;  %v3193_v12 = vld [vmem:[#allocation3 + $0x19] ss:$2 sm:$0xff] }
 0x1f4   : > { %2770 = vst.msk [vmem:[#allocation3 + $0x79] sm:$0xff] %vm380_vm4, %v2761_v22  ;;  %v2755_v29 = vadd.f32 %v6245_v4, %v2725_v25  ;;  %7076 = vmatprep.mubr.msk.f32.mxu1 %vm380_vm4, %v2776_v26  ;;  %v3195_v4 = vld [vmem:[#allocation3 + $0x31] ss:$2 sm:$0xff]  ;;  %v6301_v21 = vld [vmem:[%s9041_s3 + $0x1b8] sm:$0xff] }
 0x1f5   : > { %v2764_v30 = vmax.f32 %v2756_v24, 0.0  ;;  %v7539_v22 = vpack.c.bf16 %v6301_v21, %v6300_v20  ;;  %v6306_v23 = vld [vmem:[%s9041_s3 + $0x40] sm:$0xff]  ;;  %v6307_v24 = vld [vmem:[%s9041_s3 + $0x48] sm:$0xff] }
 0x1f6   : > { %v2763_v31 = vmax.f32 %v2755_v29, 0.0  ;;  %v2782_v46 = vld [vmem:[#allocation3 + $0x60] ss:$2 sm:$0xff]  ;;  %v3199_v7 = vld [vmem:[#allocation3 + $0x61] ss:$2 sm:$0xff]  ;;  %v7543_v25 = vpack.c.bf16 %v6307_v24, %v6306_v23  ;;  %v7547_v29 = vpack.c.bf16 %v6309_v28, %v6308_v27  ;;  %v6362_v20 = vld [vmem:[%s9041_s3 + $0x1e0] sm:$0xff] }
 0x1f7   : > { %2773 = vst.msk [vmem:[#allocation3 + $0xc1] sm:$0xff] %vm380_vm4, %v2764_v30  ;;  %v2780_v33 = vld [vmem:[#allocation3 + $0x48] ss:$2 sm:$0xff]  ;;  %v3197_v14 = vld [vmem:[#allocation3 + $0x49] ss:$2 sm:$0xff]  ;;  %v6363_v21 = vld [vmem:[%s9041_s3 + $0x1e8] sm:$0xff] }
 0x1f8   : > { %2772 = vst.msk [vmem:[#allocation3 + $0xa9] sm:$0xff] %vm380_vm4, %v2763_v31  ;;  %7077 = vmatmul.mubr.msk.f32.vlgmr.msra.gmra.mrb[0].mxu1 %vm380_vm4, %v2780_v33  ;;  %v6314_v30 = vld [vmem:[%s9041_s3 + $0xc0] sm:$0xff]  ;;  %v6315_v31 = vld [vmem:[%s9041_s3 + $0xc8] sm:$0xff]  ;;  %v7599_v23 = vpack.c.bf16 %v6363_v21, %v6362_v20 }
 0x1f9   : > { %7490 = vmatpush3.bf16.msra.mxu1 %v7487_v3  ;;  %v7523_v3 = vpack.c.bf16 %v6285_v2, %v6284_v0  ;;  %v7551_v34 = vpack.c.bf16 %v6315_v31, %v6314_v30  ;;  %v3625_v41 = vld [vmem:[#allocation3 + $0x62] ss:$2 sm:$0xff]  ;;  %v6347_v2 = vld [vmem:[%s9041_s3 + $0xe8] sm:$0xff] }
 0x1fa   : > { %7492 = vmatprep.subr.bf16.mxu1 %v7491_v32  ;;  %v2786_v48 = vld [vmem:[#allocation3 + $0x90] ss:$2 sm:$0xff]  ;;  %v3203_v9 = vld [vmem:[#allocation3 + $0x91] ss:$2 sm:$0xff] }
 0x1fb   : > { %v2784_v37 = vld [vmem:[#allocation3 + $0x78] ss:$2 sm:$0xff]  ;;  %v3201_v17 = vld [vmem:[#allocation3 + $0x79] ss:$2 sm:$0xff]  ;;  %v6346_v0 = vld [vmem:[%s9041_s3 + $0xe0] sm:$0xff] }
 0x1fc   : > { %7079 = vmatprep.mubr.msk.f32.mxu1 %vm380_vm4, %v2784_v37  ;;  %v7583_v5 = vpack.c.bf16 %v6347_v2, %v6346_v0  ;;  %v6371_v30 = vld [vmem:[%s9043_s5 + $0x80] sm:$0xff]  ;;  %v6372_v31 = vld [vmem:[%s9043_s5 + $0x88] sm:$0xff] }
 0x1fd   : > { %7494 = vmatpush3.bf16.msra.mxu1 %v7491_v32  ;;  %v3209_v32 = vld [vmem:[#allocation3 + $0xd9] ss:$2 sm:$0xff] }
 0x1fe   : > { %7496 = vmatprep.subr.bf16.mxu1 %v7495_v36  ;;  %v2790_v55 = vld [vmem:[#allocation3 + $0xc0] ss:$2 sm:$0xff]  ;;  %v3207_v26 = vld [vmem:[#allocation3 + $0xc1] ss:$2 sm:$0xff]  ;;  %v6380_v0 = vld [vmem:[%s9043_s5 + $0x108] sm:$0xff] }
 0x1ff   : > { %v2788_v39 = vld [vmem:[#allocation3 + $0xa8] ss:$2 sm:$0xff]  ;;  %v3205_v19 = vld [vmem:[#allocation3 + $0xa9] ss:$2 sm:$0xff] }
 0x200   : > { %7080 = vmatmul.mubr.msk.f32.gmra.mrb[2].mxu1 %vm380_vm4, %v2788_v39  ;;  %v3631_v53 = vld [vmem:[#allocation3 + $0xaa] ss:$2 sm:$0xff]  ;;  %v4057_v24 = vld [vmem:[#allocation3 + $0xab] ss:$2 sm:$0xff] }
 0x201   : > { %7090 = vmatprep.mubr.msk.f32.mxu1 %vm380_vm4, %v2774_v38  ;;  %v3621_v38 = vld [vmem:[#allocation3 + $0x32] ss:$2 sm:$0xff]  ;;  %v3633_v60 = vld [vmem:[#allocation3 + $0xc2] ss:$2 sm:$0xff]  ;;  %v4059_v28 = vld [vmem:[#allocation3 + $0xc3] ss:$2 sm:$0xff] }
 0x202   : > { %v4842_v21 = vld [vmem:[#allocation4 + $0x1] ss:$2 sm:$0xff] }
 0x204   : > { %7091 = vmatmul.mubr.msk.f32.vlgmr.msra.gmra.mrb[0].mxu1 %vm380_vm4, %v2778_v43 }
 0x205   : > { %7498 = vmatpush3.bf16.msra.mxu1 %v7495_v36  ;;  %7093 = vmatprep.mubr.msk.f32.mxu1 %vm380_vm4, %v2782_v46  ;;  %v6317_v36 = vld [vmem:[%s9041_s3 + $0xd8] sm:$0xff] }
 0x206   : > { %7500 = vmatprep.subr.bf16.mxu1 %v7499_v42 }
 0x208   : > { %7094 = vmatmul.mubr.msk.f32.gmra.mrb[2].mxu1 %vm380_vm4, %v2786_v48 }
 0x209   : > { %7502 = vmatpush3.bf16.msra.mxu1 %v7499_v42  ;;  %7104 = vmatprep.mubr.msk.f32.mxu1 %vm380_vm4, %v2778_v43  ;;  %v3629_v43 = vld [vmem:[#allocation3 + $0x92] ss:$2 sm:$0xff] }
 0x20a   : > { %7504 = vmatprep.subr.bf16.mxu1 %v7503_v47 }
 0x20c   : > { %7105 = vmatmul.mubr.msk.f32.vlgmr.msra.gmra.mrb[0].mxu1 %vm380_vm4, %v2782_v46  ;;  %v3619_v46 = vld [vmem:[#allocation3 + $0x1a] ss:$2 sm:$0xff] }
 0x20d   : > { %7506 = vmatpush3.bf16.msra.mxu1 %v7503_v47  ;;  %7107 = vmatprep.mubr.msk.f32.mxu1 %vm380_vm4, %v2786_v48  ;;  %v7563_v47 = vpack.c.bf16 %v6325_v45, %v6324_v44  ;;  %v3623_v48 = vld [vmem:[#allocation3 + $0x4a] ss:$2 sm:$0xff] }
 0x20e   : > { %7508 = vmatprep.subr.bf16.mxu1 %v7507_v51 }
 0x210   : > { %7108 = vmatmul.mubr.msk.f32.gmra.mrb[2].mxu1 %vm380_vm4, %v2790_v55  ;;  %v6333_v55 = vld [vmem:[%s9041_s3 + $0x1d8] sm:$0xff] }
 0x211   : > { %7510 = vmatpush3.bf16.msra.mxu1 %v7507_v51  ;;  %7118 = vmatprep.mubr.msk.f32.mxu1 %vm380_vm4, %v2780_v33  ;;  %v3617_v33 = vld [vmem:[#allocation3 + $0x2] ss:$2 sm:$0xff] }
 0x212   : > { %7512 = vmatprep.subr.bf16.mxu1 %v7511_v54  ;;  %v3627_v51 = vld [vmem:[#allocation3 + $0x7a] ss:$2 sm:$0xff] }
 0x214   : > { %7119 = vmatmul.mubr.msk.f32.vlgmr.msra.gmra.mrb[0].mxu1 %vm380_vm4, %v2784_v37  ;;  %v7555_v37 = vpack.c.bf16 %v6317_v36, %v6316_v35  ;;  %v4501_v36 = vld [vmem:[%s9043_s5 + $0x8] sm:$0xff] }
 0x215   : > { %7514 = vmatpush3.bf16.msra.mxu1 %v7511_v54  ;;  %7121 = vmatprep.mubr.msk.f32.mxu1 %vm380_vm4, %v2788_v39  ;;  %v6322_v39 = vld [vmem:[%s9041_s3 + $0x140] sm:$0xff]  ;;  %v6332_v54 = vld [vmem:[%s9041_s3 + $0x1d0] sm:$0xff] }
 0x216   : > { %7516 = vmatprep.subr.bf16.mxu1 %v7515_v58  ;;  %v7559_v42 = vpack.c.bf16 %v6323_v40, %v6322_v39  ;;  %v7571_v56 = vpack.c.bf16 %v6333_v55, %v6332_v54  ;;  %v5929_v55 = vld [vmem:[%s9045_s7 + $0x18] sm:$0xff] }
 0x218   : > { %7122 = vmatmul.mubr.msk.f32.gmra.mrb[2].mxu1 %vm380_vm4, %v2792_v61  ;;  %v6340_v61 = vld [vmem:[%s9041_s3 + $0x70] sm:$0xff] }
 0x219   : > { %7518 = vmatpush3.bf16.msra.mxu1 %v7515_v58  ;;  %7132 = vmatprep.mubr.msk.f32.mxu1 %vm380_vm4, %v3191_v62  ;;  %v6339_v58 = vld [vmem:[%s9041_s3 + $0x68] sm:$0xff]  ;;  %v6341_v62 = vld [vmem:[%s9041_s3 + $0x78] sm:$0xff] }
 0x21a   : > { %7520 = vmatprep.subr.bf16.mxu1 %v7519_v63  ;;  %v7575_v59 = vpack.c.bf16 %v6339_v58, %v6338_v57  ;;  %v4502_v58 = vld [vmem:[%s9043_s5 + $0x10] sm:$0xff] }
 0x21c   : > { %7133 = vmatmul.mubr.msk.f32.vlgmr.msra.gmra.mrb[0].mxu1 %vm380_vm4, %v3195_v4 }
 0x21d   : > { %7522 = vmatpush3.bf16.msra.mxu1 %v7519_v63  ;;  %7135 = vmatprep.mubr.msk.f32.mxu1 %vm380_vm4, %v3199_v7  ;;  %v7579_v63 = vpack.c.bf16 %v6341_v62, %v6340_v61  ;;  %v4489_v61 = vld [vmem:[#allocation4] ss:$2 sm:$0xff] }
 0x21e   : > { %7524 = vmatprep.subr.bf16.mxu1 %v7523_v3 }
 0x220   : > { %7136 = vmatmul.mubr.msk.f32.gmra.mrb[2].mxu1 %vm380_vm4, %v3203_v9 }
 0x221   : > { %7526 = vmatpush3.bf16.msra.mxu1 %v7523_v3  ;;  %7146 = vmatprep.mubr.msk.f32.mxu1 %vm380_vm4, %v3193_v12  ;;  %v3635_v3 = vld [vmem:[#allocation3 + $0xda] ss:$2 sm:$0xff]  ;;  %v4051_v12 = vld [vmem:[#allocation3 + $0x63] ss:$2 sm:$0xff] }
 0x222   : > { %7528 = vmatprep.subr.bf16.mxu1 %v7527_v8 }
 0x224   : > { %7147 = vmatmul.mubr.msk.f32.vlgmr.msra.gmra.mrb[0].mxu1 %vm380_vm4, %v3197_v14 }
 0x225   : > { %7530 = vmatpush3.bf16.msra.mxu1 %v7527_v8  ;;  %7149 = vmatprep.mubr.msk.f32.mxu1 %vm380_vm4, %v3201_v17 }
 0x226   : > { %7532 = vmatprep.subr.bf16.mxu1 %v7531_v13 }
 0x228   : > { %7150 = vmatmul.mubr.msk.f32.gmra.mrb[2].mxu1 %vm380_vm4, %v3205_v19 }
 0x229   : > { %7534 = vmatpush3.bf16.msra.mxu1 %v7531_v13  ;;  %7160 = vmatprep.mubr.msk.f32.mxu1 %vm380_vm4, %v3195_v4  ;;  %v4043_v4 = vld [vmem:[#allocation3 + $0x3] ss:$2 sm:$0xff]  ;;  %v7591_v13 = vpack.c.bf16 %v6355_v11, %v6354_v10 }
 0x22a   : > { %7536 = vmatprep.subr.bf16.mxu1 %v7535_v18  ;;  %v6387_v10 = vld [vmem:[%s9043_s5 + $0x190] sm:$0xff]  ;;  %v6388_v11 = vld [vmem:[%s9043_s5 + $0x198] sm:$0xff] }
 0x22c   : > { %7161 = vmatmul.mubr.msk.f32.vlgmr.msra.gmra.mrb[0].mxu1 %vm380_vm4, %v3199_v7  ;;  %v6349_v7 = vld [vmem:[%s9041_s3 + $0xf8] sm:$0xff] }
 0x22d   : > { %7538 = vmatpush3.bf16.msra.mxu1 %v7535_v18  ;;  %7163 = vmatprep.mubr.msk.f32.mxu1 %vm380_vm4, %v3203_v9  ;;  %v7587_v8 = vpack.c.bf16 %v6349_v7, %v6348_v6  ;;  %v4047_v9 = vld [vmem:[#allocation3 + $0x33] ss:$2 sm:$0xff]  ;;  %v7595_v18 = vpack.c.bf16 %v6357_v16, %v6356_v15 }
 0x22e   : > { %7540 = vmatprep.subr.bf16.mxu1 %v7539_v22  ;;  %v6385_v7 = vld [vmem:[%s9043_s5 + $0x180] sm:$0xff]  ;;  %v6392_v15 = vld [vmem:[%s9043_s5 + $0x28] sm:$0xff] }
 0x230   : > { %7164 = vmatmul.mubr.msk.f32.gmra.mrb[2].mxu1 %vm380_vm4, %v3207_v26  ;;  %v6365_v26 = vld [vmem:[%s9041_s3 + $0x1f8] sm:$0xff] }
 0x231   : > { %7542 = vmatpush3.bf16.msra.mxu1 %v7539_v22  ;;  %7174 = vmatprep.mubr.msk.f32.mxu1 %vm380_vm4, %v3197_v14  ;;  %v4055_v14 = vld [vmem:[#allocation3 + $0x93] ss:$2 sm:$0xff] }
 0x232   : > { %7544 = vmatprep.subr.bf16.mxu1 %v7543_v25  ;;  %v4053_v22 = vld [vmem:[#allocation3 + $0x7b] ss:$2 sm:$0xff] }
 0x234   : > { %7175 = vmatmul.mubr.msk.f32.vlgmr.msra.gmra.mrb[0].mxu1 %vm380_vm4, %v3201_v17  ;;  %v4045_v17 = vld [vmem:[#allocation3 + $0x1b] ss:$2 sm:$0xff] }
 0x235   : > { %7546 = vmatpush3.bf16.msra.mxu1 %v7543_v25  ;;  %7177 = vmatprep.mubr.msk.f32.mxu1 %vm380_vm4, %v3205_v19  ;;  %v4049_v19 = vld [vmem:[#allocation3 + $0x4b] ss:$2 sm:$0xff]  ;;  %v6364_v25 = vld [vmem:[%s9041_s3 + $0x1f0] sm:$0xff] }
 0x236   : > { %7548 = vmatprep.subr.bf16.mxu1 %v7547_v29  ;;  %v7603_v27 = vpack.c.bf16 %v6365_v26, %v6364_v25  ;;  %v6399_v25 = vld [vmem:[%s9043_s5 + $0xb0] sm:$0xff]  ;;  %v6400_v26 = vld [vmem:[%s9043_s5 + $0xb8] sm:$0xff] }
 0x238   : > { %7178 = vmatmul.mubr.msk.f32.gmra.mrb[2].mxu1 %vm380_vm4, %v3209_v32  ;;  %v7607_v32 = vpack.c.bf16 %v6372_v31, %v6371_v30  ;;  %v6404_v30 = vld [vmem:[%s9043_s5 + $0x128] sm:$0xff] }
 0x239   : > { %7550 = vmatpush3.bf16.msra.mxu1 %v7547_v29  ;;  %7188 = vmatprep.mubr.msk.f32.mxu1 %vm380_vm4, %v3617_v33  ;;  %v4061_v29 = vld [vmem:[#allocation3 + $0xdb] ss:$2 sm:$0xff] }
 0x23a   : > { %7552 = vmatprep.subr.bf16.mxu1 %v7551_v34  ;;  %v6373_v33 = vld [vmem:[%s9043_s5 + $0x90] sm:$0xff] }
 0x23c   : > { %7189 = vmatmul.mubr.msk.f32.vlgmr.msra.gmra.mrb[0].mxu1 %vm380_vm4, %v3621_v38 }
 0x23d   : > { %7554 = vmatpush3.bf16.msra.mxu1 %v7551_v34  ;;  %7191 = vmatprep.mubr.msk.f32.mxu1 %vm380_vm4, %v3625_v41  ;;  %v6374_v34 = vld [vmem:[%s9043_s5 + $0x98] sm:$0xff] }
 0x23e   : > { %7556 = vmatprep.subr.bf16.mxu1 %v7555_v37  ;;  %v7611_v35 = vpack.c.bf16 %v6374_v34, %v6373_v33  ;;  %v6405_v33 = vld [vmem:[%s9043_s5 + $0x130] sm:$0xff]  ;;  %v6406_v34 = vld [vmem:[%s9043_s5 + $0x138] sm:$0xff] }
 0x240   : > { %7192 = vmatmul.mubr.msk.f32.gmra.mrb[2].mxu1 %vm380_vm4, %v3629_v43 }
 0x241   : > { %7558 = vmatpush3.bf16.msra.mxu1 %v7555_v37  ;;  %7202 = vmatprep.mubr.msk.f32.mxu1 %vm380_vm4, %v3619_v46  ;;  %v7615_v37 = vpack.c.bf16 %v4501_v36, %v4500_v1  ;;  %v6409_v36 = vld [vmem:[%s9043_s5 + $0x1a0] sm:$0xff] }
 0x242   : > { %7560 = vmatprep.subr.bf16.mxu1 %v7559_v42 }
 0x244   : > { %7203 = vmatmul.mubr.msk.f32.vlgmr.msra.gmra.mrb[0].mxu1 %vm380_vm4, %v3623_v48 }
 0x245   : > { %7562 = vmatpush3.bf16.msra.mxu1 %v7559_v42  ;;  %7205 = vmatprep.mubr.msk.f32.mxu1 %vm380_vm4, %v3627_v51 }
 0x246   : > { %7564 = vmatprep.subr.bf16.mxu1 %v7563_v47 }
 0x248   : > { %7206 = vmatmul.mubr.msk.f32.gmra.mrb[2].mxu1 %vm380_vm4, %v3631_v53 }
 0x249   : > { %7566 = vmatpush3.bf16.msra.mxu1 %v7563_v47  ;;  %7216 = vmatprep.mubr.msk.f32.mxu1 %vm380_vm4, %v3621_v38  ;;  %v6370_v38 = vld [vmem:[%s9042_s4] ss:$0 sm:$0xff] }
 0x24a   : > { %7568 = vmatprep.subr.bf16.mxu1 %v7567_v52 }
 0x24c   : > { %7217 = vmatmul.mubr.msk.f32.vlgmr.msra.gmra.mrb[0].mxu1 %vm380_vm4, %v3625_v41 }
 0x24d   : > { %7570 = vmatpush3.bf16.msra.mxu1 %v7567_v52  ;;  %7219 = vmatprep.mubr.msk.f32.mxu1 %vm380_vm4, %v3629_v43  ;;  %v5927_v52 = vld [vmem:[%s9045_s7 + $0x8] sm:$0xff] }
 0x24e   : > { %7572 = vmatprep.subr.bf16.mxu1 %v7571_v56 }
 0x250   : > { %7220 = vmatmul.mubr.msk.f32.gmra.mrb[2].mxu1 %vm380_vm4, %v3633_v60 }
 0x251   : > { %7574 = vmatpush3.bf16.msra.mxu1 %v7571_v56  ;;  %7230 = vmatprep.mubr.msk.f32.mxu1 %vm380_vm4, %v3623_v48 }
 0x252   : > { %7576 = vmatprep.subr.bf16.mxu1 %v7575_v59 }
 0x254   : > { %7231 = vmatmul.mubr.msk.f32.vlgmr.msra.gmra.mrb[0].mxu1 %vm380_vm4, %v3627_v51  ;;  %v5926_v51 = vld [vmem:[%s9045_s7] sm:$0xff] }
 0x255   : > { %7578 = vmatpush3.bf16.msra.mxu1 %v7575_v59  ;;  %7233 = vmatprep.mubr.msk.f32.mxu1 %vm380_vm4, %v3631_v53  ;;  %v5928_v53 = vld [vmem:[%s9045_s7 + $0x10] sm:$0xff]  ;;  %v7735_v54 = vpack.c.bf16 %v5927_v52, %v5926_v51  ;;  %v4503_v59 = vld [vmem:[%s9043_s5 + $0x18] sm:$0xff]  ;;  %v6421_v51 = vld [vmem:[%s9043_s5 + $0xc0] sm:$0xff] }
 0x256   : > { %7580 = vmatprep.subr.bf16.mxu1 %v7579_v63  ;;  %v7739_v56 = vpack.c.bf16 %v5929_v55, %v5928_v53  ;;  %v7619_v60 = vpack.c.bf16 %v4503_v59, %v4502_v58  ;;  %v6422_v52 = vld [vmem:[%s9043_s5 + $0xc8] sm:$0xff]  ;;  %v6424_v55 = vld [vmem:[%s9043_s5 + $0xd8] sm:$0xff]  ;;  %v6427_v58 = vld [vmem:[%s9043_s5 + $0x140] sm:$0xff] }
 0x257   : > { %7736 = vmatprep.subr.bf16.mxu0 %v7735_v54  ;;  %v7679_v53 = vpack.c.bf16 %v6422_v52, %v6421_v51  ;;  %v6428_v59 = vld [vmem:[%s9043_s5 + $0x148] sm:$0xff] }
 0x258   : > { %7234 = vmatmul.mubr.msk.f32.gmra.mrb[2].mxu1 %vm380_vm4, %v3635_v3  ;;  %7738 = vmatpush3.bf16.msra.mxu0 %v7735_v54  ;;  %v6381_v3 = vld [vmem:[%s9043_s5 + $0x110] sm:$0xff] }
 0x259   : > { %7582 = vmatpush3.bf16.msra.mxu1 %v7579_v63  ;;  %7244 = vmatprep.mubr.msk.f32.mxu1 %vm380_vm4, %v4043_v4  ;;  %v6379_v63 = vld [vmem:[%s9043_s5 + $0x100] sm:$0xff]  ;;  %v6382_v4 = vld [vmem:[%s9043_s5 + $0x118] sm:$0xff]  ;;  %v6423_v54 = vld [vmem:[%s9043_s5 + $0xd0] sm:$0xff] }
 0x25a   : > { %7584 = vmatprep.subr.bf16.mxu1 %v7583_v5  ;;  %7740 = vmatprep.subr.bf16.mxu0 %v7739_v56  ;;  %v7623_v2 = vpack.c.bf16 %v6380_v0, %v6379_v63  ;;  %v6430_v63 = vld [vmem:[%s9043_s5 + $0x158] sm:$0xff] }
 0x25c   : > { %7245 = vmatmul.mubr.msk.f32.vlgmr.msra.gmra.mrb[0].mxu1 %vm380_vm4, %v4047_v9  ;;  %7742 = vmatpush3.bf16.msra.mxu0 %v7739_v56  ;;  %v7683_v56 = vpack.c.bf16 %v6424_v55, %v6423_v54 }
 0x25d   : > { %7586 = vmatpush3.bf16.msra.mxu1 %v7583_v5  ;;  %7247 = vmatprep.mubr.msk.f32.mxu1 %vm380_vm4, %v4051_v12  ;;  %v7627_v5 = vpack.c.bf16 %v6382_v4, %v6381_v3  ;;  %v6433_v3 = vld [vmem:[%s9043_s5 + $0x1c0] sm:$0xff]  ;;  %v6434_v4 = vld [vmem:[%s9043_s5 + $0x1c8] sm:$0xff] }
 0x25e   : > { %7588 = vmatprep.subr.bf16.mxu1 %v7587_v8 }
 0x260   : > { %7248 = vmatmul.mubr.msk.f32.gmra.mrb[2].mxu1 %vm380_vm4, %v4055_v14 }
 0x261   : > { %7590 = vmatpush3.bf16.msra.mxu1 %v7587_v8  ;;  %7258 = vmatprep.mubr.msk.f32.mxu1 %vm380_vm4, %v4045_v17  ;;  %v6386_v8 = vld [vmem:[%s9043_s5 + $0x188] sm:$0xff]  ;;  %v6393_v17 = vld [vmem:[%s9043_s5 + $0x30] sm:$0xff] }
 0x262   : > { %7592 = vmatprep.subr.bf16.mxu1 %v7591_v13 }
 0x264   : > { %7259 = vmatmul.mubr.msk.f32.vlgmr.msra.gmra.mrb[0].mxu1 %vm380_vm4, %v4049_v19 }
 0x265   : > { %7594 = vmatpush3.bf16.msra.mxu1 %v7591_v13  ;;  %7261 = vmatprep.mubr.msk.f32.mxu1 %vm380_vm4, %v4053_v22 }
 0x266   : > { %7596 = vmatprep.subr.bf16.mxu1 %v7595_v18 }
 0x268   : > { %7262 = vmatmul.mubr.msk.f32.gmra.mrb[2].mxu1 %vm380_vm4, %v4057_v24 }
 0x269   : > { %7598 = vmatpush3.bf16.msra.mxu1 %v7595_v18  ;;  %7272 = vmatprep.mubr.msk.f32.mxu1 %vm380_vm4, %v4047_v9  ;;  %v7631_v9 = vpack.c.bf16 %v6386_v8, %v6385_v7  ;;  %v6394_v18 = vld [vmem:[%s9043_s5 + $0x38] sm:$0xff] }
 0x26a   : > { %7600 = vmatprep.subr.bf16.mxu1 %v7599_v23  ;;  %v7643_v20 = vpack.c.bf16 %v6394_v18, %v6393_v17  ;;  %v6436_v7 = vld [vmem:[%s9043_s5 + $0x1d8] sm:$0xff]  ;;  %v5558_v17 = vld [vmem:[#allocation4 + $0x3] ss:$2 sm:$0xff] }
 0x26b   : > { %v6445_v18 = vld [vmem:[%s9043_s5 + $0xe0] sm:$0xff] }
 0x26c   : > { %7273 = vmatmul.mubr.msk.f32.vlgmr.msra.gmra.mrb[0].mxu1 %vm380_vm4, %v4051_v12  ;;  %v7635_v12 = vpack.c.bf16 %v6388_v11, %v6387_v10  ;;  %v6439_v10 = vld [vmem:[%s9043_s5 + $0x60] sm:$0xff]  ;;  %v6440_v11 = vld [vmem:[%s9043_s5 + $0x68] sm:$0xff] }
 0x26d   : > { %7602 = vmatpush3.bf16.msra.mxu1 %v7599_v23  ;;  %7275 = vmatprep.mubr.msk.f32.mxu1 %vm380_vm4, %v4055_v14  ;;  %v6391_v14 = vld [vmem:[%s9043_s5 + $0x20] sm:$0xff]  ;;  %v6398_v23 = vld [vmem:[%s9043_s5 + $0xa8] sm:$0xff] }
 0x26e   : > { %7604 = vmatprep.subr.bf16.mxu1 %v7603_v27  ;;  %v7639_v16 = vpack.c.bf16 %v6392_v15, %v6391_v14  ;;  %v6442_v14 = vld [vmem:[%s9043_s5 + $0x78] sm:$0xff] }
 0x26f   : > { %v5210_v15 = vld [vmem:[#allocation4 + $0x7a] ss:$2 sm:$0xff] }
 0x270   : > { %7276 = vmatmul.mubr.msk.f32.gmra.mrb[2].mxu1 %vm380_vm4, %v4059_v28 }
 0x271   : > { %7606 = vmatpush3.bf16.msra.mxu1 %v7603_v27  ;;  %7286 = vmatprep.mubr.msk.f32.mxu1 %vm380_vm4, %v4049_v19  ;;  %v4499_v19 = vld [vmem:[#allocation4 + $0x78] ss:$2 sm:$0xff]  ;;  %v7651_v27 = vpack.c.bf16 %v6400_v26, %v6399_v25  ;;  %v6452_v26 = vld [vmem:[%s9043_s5 + $0x168] sm:$0xff] }
 0x272   : > { %7608 = vmatprep.subr.bf16.mxu1 %v7607_v32  ;;  %v6451_v25 = vld [vmem:[%s9043_s5 + $0x160] sm:$0xff] }
 0x274   : > { %7287 = vmatmul.mubr.msk.f32.vlgmr.msra.gmra.mrb[0].mxu1 %vm380_vm4, %v4053_v22  ;;  %v6397_v22 = vld [vmem:[%s9043_s5 + $0xa0] sm:$0xff] }
 0x275   : > { %7289 = vmatprep.mubr.msk.f32.mxu1 %vm380_vm4, %v4057_v24  ;;  %7610 = vmatpush3.bf16.msra.mxu1 %v7607_v32  ;;  %v7647_v24 = vpack.c.bf16 %v6398_v23, %v6397_v22  ;;  %v6448_v22 = vld [vmem:[%s9043_s5 + $0xf8] sm:$0xff] }
 0x276   : > { %7612 = vmatprep.subr.bf16.mxu1 %v7611_v35 }
 0x278   : > { %7290 = vmatmul.mubr.msk.f32.gmra.mrb[2].mxu1 %vm380_vm4, %v4061_v29  ;;  %v6403_v29 = vld [vmem:[%s9043_s5 + $0x120] sm:$0xff] }
 0x279   : > { %7614 = vmatpush3.bf16.msra.mxu1 %v7611_v35  ;;  %v7655_v32 = vpack.c.bf16 %v6404_v30, %v6403_v29  ;;  %v7659_v35 = vpack.c.bf16 %v6406_v34, %v6405_v33  ;;  %v6453_v29 = vld [vmem:[%s9043_s5 + $0x170] sm:$0xff]  ;;  %v6454_v30 = vld [vmem:[%s9043_s5 + $0x178] sm:$0xff]  ;;  %v6457_v33 = vld [vmem:[%s9043_s5 + $0x1e0] sm:$0xff] }
 0x27a   : > { %7616 = vmatprep.subr.bf16.mxu1 %v7615_v37  ;;  %v6458_v34 = vld [vmem:[%s9043_s5 + $0x1e8] sm:$0xff] }
 0x347   : > { %v7288_v39 = vpop.f32.mrb[0].mxu1 }
 0x348   : > { %v4476_v40 = vadd.f32 %v7288_v39, %v6370_v38  ;;  %v4445_v41 = vpop.f32.mrb[1].mxu1  ;;  %v6411_v39 = vld [vmem:[%s9043_s5 + $0x1b0] sm:$0xff] }
 0x349   : > { %v4475_v42 = vadd.f32 %v6370_v38, %v4445_v41 }
 0x34a   : > { %v4480_v43 = vmax.f32 %v4476_v40, 0.0  ;;  %v6412_v40 = vld [vmem:[%s9043_s5 + $0x1b8] sm:$0xff] }
 0x34b   : > { %v4479_v44 = vmax.f32 %v4475_v42, 0.0  ;;  %v7291_v45 = vpop.f32.mrb[2].mxu1  ;;  %v7667_v41 = vpack.c.bf16 %v6412_v40, %v6411_v39  ;;  %v5568_v39 = vld [vmem:[#allocation4 + $0x7b] ss:$2 sm:$0xff]  ;;  %v6463_v40 = vld [vmem:[%s9044_s6] ss:$0 sm:$0xff] }
 0x34c   : > { %4486 = vst.msk [vmem:[#allocation4 + $0x31] sm:$0xf] %vm4484_vm8, %v4480_v43  ;;  %v4478_v46 = vadd.f32 %v7291_v45, %v6370_v38  ;;  %v4455_v47 = vpop.f32.mrb[3].mxu1  ;;  %v6415_v43 = vld [vmem:[%s9043_s5 + $0x40] sm:$0xff] }
 0x34d   : > { %4485 = vst.msk [vmem:[#allocation4 + $0x19] sm:$0xf] %vm4484_vm8, %v4479_v44  ;;  %v4477_v48 = vadd.f32 %v6370_v38, %v4455_v47  ;;  %v6416_v44 = vld [vmem:[%s9043_s5 + $0x48] sm:$0xff]  ;;  %v6418_v47 = vld [vmem:[%s9043_s5 + $0x58] sm:$0xff] }
 0x34e   : > { %v4482_v49 = vmax.f32 %v4478_v46, 0.0  ;;  %v7671_v45 = vpack.c.bf16 %v6416_v44, %v6415_v43  ;;  %v6417_v46 = vld [vmem:[%s9043_s5 + $0x50] sm:$0xff] }
 0x34f   : > { %v4481_v50 = vmax.f32 %v4477_v48, 0.0  ;;  %v4852_v48 = vld [vmem:[#allocation4 + $0x79] ss:$2 sm:$0xff] }
 0x350   : > { %4488 = vst.msk [vmem:[#allocation4 + $0x61] sm:$0xf] %vm4484_vm8, %v4482_v49  ;;  %v7675_v49 = vpack.c.bf16 %v6418_v47, %v6417_v46  ;;  %v6464_v47 = vld [vmem:[%s9046_s8] ss:$0 sm:$0xff] }
 0x351   : > { %4487 = vst.msk [vmem:[#allocation4 + $0x49] sm:$0xf] %vm4484_vm8, %v4481_v50  ;;  %v5200_v50 = vld [vmem:[#allocation4 + $0x2] ss:$2 sm:$0xff] }
 0x353   : > { %v4493_v6 = vld [vmem:[#allocation4 + $0x30] ss:$2 sm:$0xff]  ;;  %v4846_v28 = vld [vmem:[#allocation4 + $0x31] ss:$2 sm:$0xff] }
 0x354   : > { %v4491_v57 = vld [vmem:[#allocation4 + $0x18] ss:$2 sm:$0xff]  ;;  %v4844_v31 = vld [vmem:[#allocation4 + $0x19] ss:$2 sm:$0xff] }
 0x355   : > { %7300 = vmatprep.mubr.msk.f32.mxu1 %vm380_vm4, %v4491_v57  ;;  %v5204_v57 = vld [vmem:[#allocation4 + $0x32] ss:$2 sm:$0xff] }
 0x357   : > { %v4497_v13 = vld [vmem:[#allocation4 + $0x60] ss:$2 sm:$0xff]  ;;  %v4850_v42 = vld [vmem:[#allocation4 + $0x61] ss:$2 sm:$0xff] }
 0x358   : > { %v4495_v62 = vld [vmem:[#allocation4 + $0x48] ss:$2 sm:$0xff]  ;;  %v4848_v1 = vld [vmem:[#allocation4 + $0x49] ss:$2 sm:$0xff] }
 0x359   : > { %7301 = vmatmul.mubr.msk.f32.vlgmr.msra.gmra.mrb[4].mxu1 %vm380_vm4, %v4495_v62 }
 0x35a   : > { %7618 = vmatpush3.bf16.msra.mxu1 %v7615_v37  ;;  %7311 = vmatprep.mubr.msk.f32.mxu1 %vm380_vm4, %v4489_v61  ;;  %v6410_v37 = vld [vmem:[%s9043_s5 + $0x1a8] sm:$0xff]  ;;  %v7687_v61 = vpack.c.bf16 %v6428_v59, %v6427_v58 }
 0x35b   : > { %7620 = vmatprep.subr.bf16.mxu1 %v7619_v60  ;;  %v7663_v38 = vpack.c.bf16 %v6410_v37, %v6409_v36  ;;  %v6460_v36 = vld [vmem:[%s9043_s5 + $0x1f8] sm:$0xff] }
 0x35e   : > { %7622 = vmatpush3.bf16.msra.mxu1 %v7619_v60  ;;  %v5202_v60 = vld [vmem:[#allocation4 + $0x1a] ss:$2 sm:$0xff] }
 0x35f   : > { %7624 = vmatprep.subr.bf16.mxu1 %v7623_v2 }
 0x361   : > { %7312 = vmatmul.mubr.msk.f32.vlgmr.msra.gmra.mrb[4].mxu1 %vm380_vm4, %v4493_v6 }
 0x362   : > { %7626 = vmatpush3.bf16.msra.mxu1 %v7623_v2  ;;  %7322 = vmatprep.mubr.msk.f32.mxu1 %vm380_vm4, %v4493_v6  ;;  %v5206_v2 = vld [vmem:[#allocation4 + $0x4a] ss:$2 sm:$0xff] }
 0x363   : > { %7628 = vmatprep.subr.bf16.mxu1 %v7627_v5  ;;  %v6435_v6 = vld [vmem:[%s9043_s5 + $0x1d0] sm:$0xff] }
 0x364   : > { %v7699_v8 = vpack.c.bf16 %v6436_v7, %v6435_v6 }
 0x366   : > { %7630 = vmatpush3.bf16.msra.mxu1 %v7627_v5  ;;  %v7695_v5 = vpack.c.bf16 %v6434_v4, %v6433_v3 }
 0x367   : > { %7632 = vmatprep.subr.bf16.mxu1 %v7631_v9 }
 0x369   : > { %7323 = vmatmul.mubr.msk.f32.vlgmr.msra.gmra.mrb[4].mxu1 %vm380_vm4, %v4497_v13  ;;  %v6441_v13 = vld [vmem:[%s9043_s5 + $0x70] sm:$0xff] }
 0x36a   : > { %7634 = vmatpush3.bf16.msra.mxu1 %v7631_v9  ;;  %7333 = vmatprep.mubr.msk.f32.mxu1 %vm380_vm4, %v4495_v62  ;;  %v6429_v62 = vld [vmem:[%s9043_s5 + $0x150] sm:$0xff] }
 0x36b   : > { %7636 = vmatprep.subr.bf16.mxu1 %v7635_v12  ;;  %v7691_v0 = vpack.c.bf16 %v6430_v63, %v6429_v62  ;;  %v5208_v9 = vld [vmem:[#allocation4 + $0x62] ss:$2 sm:$0xff] }
 0x36e   : > { %7638 = vmatpush3.bf16.msra.mxu1 %v7635_v12  ;;  %v7703_v12 = vpack.c.bf16 %v6440_v11, %v6439_v10 }
 0x36f   : > { %7640 = vmatprep.subr.bf16.mxu1 %v7639_v16 }
 0x371   : > { %7334 = vmatmul.mubr.msk.f32.vlgmr.msra.gmra.mrb[4].mxu1 %vm380_vm4, %v4499_v19  ;;  %v6446_v19 = vld [vmem:[%s9043_s5 + $0xe8] sm:$0xff] }
 0x372   : > { %7642 = vmatpush3.bf16.msra.mxu1 %v7639_v16  ;;  %7344 = vmatprep.mubr.msk.f32.mxu1 %vm380_vm4, %v4842_v21  ;;  %v7707_v16 = vpack.c.bf16 %v6442_v14, %v6441_v13  ;;  %v6447_v21 = vld [vmem:[%s9043_s5 + $0xf0] sm:$0xff] }
 0x373   : > { %7644 = vmatprep.subr.bf16.mxu1 %v7643_v20  ;;  %v7715_v23 = vpack.c.bf16 %v6448_v22, %v6447_v21 }
 0x376   : > { %7646 = vmatpush3.bf16.msra.mxu1 %v7643_v20  ;;  %v7711_v20 = vpack.c.bf16 %v6446_v19, %v6445_v18 }
 0x377   : > { %7648 = vmatprep.subr.bf16.mxu1 %v7647_v24 }
 0x379   : > { %7345 = vmatmul.mubr.msk.f32.vlgmr.msra.gmra.mrb[4].mxu1 %vm380_vm4, %v4846_v28 }
 0x37a   : > { %7650 = vmatpush3.bf16.msra.mxu1 %v7647_v24  ;;  %7355 = vmatprep.mubr.msk.f32.mxu1 %vm380_vm4, %v4844_v31  ;;  %v5562_v24 = vld [vmem:[#allocation4 + $0x33] ss:$2 sm:$0xff]  ;;  %v7723_v31 = vpack.c.bf16 %v6454_v30, %v6453_v29 }
 0x37b   : > { %7652 = vmatprep.subr.bf16.mxu1 %v7651_v27 }
 0x37e   : > { %7654 = vmatpush3.bf16.msra.mxu1 %v7651_v27  ;;  %v5560_v27 = vld [vmem:[#allocation4 + $0x1b] ss:$2 sm:$0xff] }
 0x37f   : > { %7656 = vmatprep.subr.bf16.mxu1 %v7655_v32 }
 0x381   : > { %7356 = vmatmul.mubr.msk.f32.vlgmr.msra.gmra.mrb[4].mxu1 %vm380_vm4, %v4848_v1 }
 0x382   : > { %7658 = vmatpush3.bf16.msra.mxu1 %v7655_v32  ;;  %7366 = vmatprep.mubr.msk.f32.mxu1 %vm380_vm4, %v4846_v28  ;;  %v7719_v28 = vpack.c.bf16 %v6452_v26, %v6451_v25  ;;  %v5564_v32 = vld [vmem:[#allocation4 + $0x4b] ss:$2 sm:$0xff] }
 0x383   : > { %7660 = vmatprep.subr.bf16.mxu1 %v7659_v35 }
 0x386   : > { %7662 = vmatpush3.bf16.msra.mxu1 %v7659_v35  ;;  %v7727_v35 = vpack.c.bf16 %v6458_v34, %v6457_v33 }
 0x387   : > { %7664 = vmatprep.subr.bf16.mxu1 %v7663_v38 }
 0x389   : > { %7367 = vmatmul.mubr.msk.f32.vlgmr.msra.gmra.mrb[4].mxu1 %vm380_vm4, %v4850_v42 }
 0x38a   : > { %7666 = vmatpush3.bf16.msra.mxu1 %v7663_v38  ;;  %7377 = vmatprep.mubr.msk.f32.mxu1 %vm380_vm4, %v4848_v1  ;;  %v6459_v1 = vld [vmem:[%s9043_s5 + $0x1f0] sm:$0xff] }
 0x38b   : > { %7668 = vmatprep.subr.bf16.mxu1 %v7667_v41  ;;  %v7731_v37 = vpack.c.bf16 %v6460_v36, %v6459_v1  ;;  %v5566_v38 = vld [vmem:[#allocation4 + $0x63] ss:$2 sm:$0xff] }
 0x38e   : > { %7670 = vmatpush3.bf16.msra.mxu1 %v7667_v41 }
 0x38f   : > { %7672 = vmatprep.subr.bf16.mxu1 %v7671_v45 }
 0x391   : > { %7378 = vmatmul.mubr.msk.f32.vlgmr.msra.gmra.mrb[4].mxu1 %vm380_vm4, %v4852_v48 }
 0x392   : > { %7674 = vmatpush3.bf16.msra.mxu1 %v7671_v45  ;;  %7388 = vmatprep.mubr.msk.f32.mxu1 %vm380_vm4, %v5200_v50 }
 0x393   : > { %7676 = vmatprep.subr.bf16.mxu1 %v7675_v49 }
 0x396   : > { %7678 = vmatpush3.bf16.msra.mxu1 %v7675_v49 }
 0x397   : > { %7680 = vmatprep.subr.bf16.mxu1 %v7679_v53 }
 0x399   : > { %7389 = vmatmul.mubr.msk.f32.vlgmr.msra.gmra.mrb[4].mxu1 %vm380_vm4, %v5204_v57 }
 0x39a   : > { %7682 = vmatpush3.bf16.msra.mxu1 %v7679_v53  ;;  %7399 = vmatprep.mubr.msk.f32.mxu1 %vm380_vm4, %v5202_v60 }
 0x39b   : > { %7684 = vmatprep.subr.bf16.mxu1 %v7683_v56 }
 0x39e   : > { %7686 = vmatpush3.bf16.msra.mxu1 %v7683_v56 }
 0x39f   : > { %7688 = vmatprep.subr.bf16.mxu1 %v7687_v61 }
 0x3a1   : > { %7400 = vmatmul.mubr.msk.f32.vlgmr.msra.gmra.mrb[4].mxu1 %vm380_vm4, %v5206_v2 }
 0x3a2   : > { %7690 = vmatpush3.bf16.msra.mxu1 %v7687_v61  ;;  %7410 = vmatprep.mubr.msk.f32.mxu1 %vm380_vm4, %v5204_v57 }
 0x3a3   : > { %7692 = vmatprep.subr.bf16.mxu1 %v7691_v0 }
 0x3a6   : > { %7694 = vmatpush3.bf16.msra.mxu1 %v7691_v0 }
 0x3a7   : > { %7696 = vmatprep.subr.bf16.mxu1 %v7695_v5 }
 0x3a9   : > { %7411 = vmatmul.mubr.msk.f32.vlgmr.msra.gmra.mrb[4].mxu1 %vm380_vm4, %v5208_v9 }
 0x3aa   : > { %7698 = vmatpush3.bf16.msra.mxu1 %v7695_v5  ;;  %7421 = vmatprep.mubr.msk.f32.mxu1 %vm380_vm4, %v5206_v2 }
 0x3ab   : > { %7700 = vmatprep.subr.bf16.mxu1 %v7699_v8 }
 0x3ae   : > { %7702 = vmatpush3.bf16.msra.mxu1 %v7699_v8 }
 0x3af   : > { %7704 = vmatprep.subr.bf16.mxu1 %v7703_v12 }
 0x3b1   : > { %7422 = vmatmul.mubr.msk.f32.vlgmr.msra.gmra.mrb[4].mxu1 %vm380_vm4, %v5210_v15 }
 0x3b2   : > { %7706 = vmatpush3.bf16.msra.mxu1 %v7703_v12  ;;  %7432 = vmatprep.mubr.msk.f32.mxu1 %vm380_vm4, %v5558_v17 }
 0x3b3   : > { %7708 = vmatprep.subr.bf16.mxu1 %v7707_v16 }
 0x3b6   : > { %7710 = vmatpush3.bf16.msra.mxu1 %v7707_v16 }
 0x3b7   : > { %7712 = vmatprep.subr.bf16.mxu1 %v7711_v20 }
 0x3b9   : > { %7433 = vmatmul.mubr.msk.f32.vlgmr.msra.gmra.mrb[4].mxu1 %vm380_vm4, %v5562_v24 }
 0x3ba   : > { %7714 = vmatpush3.bf16.msra.mxu1 %v7711_v20  ;;  %7443 = vmatprep.mubr.msk.f32.mxu1 %vm380_vm4, %v5560_v27 }
 0x3bb   : > { %7716 = vmatprep.subr.bf16.mxu1 %v7715_v23 }
 0x3be   : > { %7718 = vmatpush3.bf16.msra.mxu1 %v7715_v23 }
 0x3bf   : > { %7720 = vmatprep.subr.bf16.mxu1 %v7719_v28 }
 0x3c1   : > { %7444 = vmatmul.mubr.msk.f32.vlgmr.msra.gmra.mrb[4].mxu1 %vm380_vm4, %v5564_v32 }
 0x3c2   : > { %7722 = vmatpush3.bf16.msra.mxu1 %v7719_v28  ;;  %7454 = vmatprep.mubr.msk.f32.mxu1 %vm380_vm4, %v5562_v24 }
 0x3c3   : > { %7724 = vmatprep.subr.bf16.mxu1 %v7723_v31 }
 0x3c6   : > { %7726 = vmatpush3.bf16.msra.mxu1 %v7723_v31 }
 0x3c7   : > { %7728 = vmatprep.subr.bf16.mxu1 %v7727_v35 }
 0x3c9   : > { %7455 = vmatmul.mubr.msk.f32.vlgmr.msra.gmra.mrb[4].mxu1 %vm380_vm4, %v5566_v38 }
 0x3ca   : > { %7730 = vmatpush3.bf16.msra.mxu1 %v7727_v35  ;;  %7465 = vmatprep.mubr.msk.f32.mxu1 %vm380_vm4, %v5564_v32 }
 0x3cb   : > { %7732 = vmatprep.subr.bf16.mxu1 %v7731_v37 }
 0x3ce   : > { %7734 = vmatpush3.bf16.msra.mxu1 %v7731_v37 }
 0x3d1   : > { %7466 = vmatmul.mubr.msk.f32.vlgmr.msra.gmra.mrb[4].mxu1 %vm380_vm4, %v5568_v39 }
 0x4a4   : > { %v7467_v41 = vpop.f32.mrb[4].mxu1 }
 0x4a5   : > { %v5923_v42 = vadd.f32 %v7467_v41, %v6463_v40  ;;  %v5904_v43 = vpop.f32.mrb[5].mxu1 }
 0x4a6   : > { %v5922_v44 = vadd.f32 %v6463_v40, %v5904_v43 }
 0x4a7   : > { %v5925_v46 = vmax.f32 %v5923_v42, 0.0 }
 0x4a8   : > { %v5924_v45 = vmax.f32 %v5922_v44, 0.0 }
 0x4aa   : > { %7476 = vmatprep.mubr.msk.f32.mxu0 %vm380_vm4, %v5924_v45 }
 0x4ab   : > { %7477 = vmatmul.mubr.msk.f32.vlgmr.msra.gmra.mrb[8].mxu0 %vm380_vm4, %v5925_v46 }
 0x57e   : > { %v7478_v48 = vpop.f32.mrb[8].mxu0 }
 0x57f   : > { %v6009_v49 = vpop.f32.mrb[9].mxu0  ;;  %v6015_v51 = vadd.f32 %v7478_v48, %v6464_v47 }
 0x580   : > { %v6010_v50 = vadd.f32 %v6464_v47, %v6009_v49 }
 0x581   : > { %6020 = vst.msk [vmem:[%s332_s20 + $0x8] sm:$0xff] %vm6018_vm9, %v6015_v51 }
 0x582   : > { %6019 = vst.msk [vmem:[%s332_s20] sm:$0xff] %vm6018_vm9, %v6010_v50 }
 0x583 PF: > { %s19_s30 = sadd.s32 1, %s7968_s30  }
 0x584   : > { %p16_p5 = scmp.ge.s32.totalorder %s19_s30, 4  }
 0x586   :  { %18 = sbr.rel (!%p16_p5) target bundleno = 1 (0x1), region = 270 }

</bundles_post_ra>
